<compile_context>
chip_gen: v7x
topology: tpu7x:2x2x1
jax: 0.10.0
libtpu: 0.0.40
codegen_flags: <defaults>
</compile_context>

<pallas_src>
import functools

import jax
import jax.numpy as jnp
from jax.experimental import pallas as pl
from jax.experimental.pallas import tpu as pltpu


# ---------------------------------------------------------------------------
# Pallas kernels
# ---------------------------------------------------------------------------
def _matmul_bias_kernel(x_ref, w_ref, b_ref, o_ref, *, apply_relu):
    # x: (TM, K), w: (K, N), b: (1, N) -> o: (TM, N); f32 accumulation on MXU.
    acc = jnp.dot(x_ref[...], w_ref[...], preferred_element_type=jnp.float32)
    acc = acc + b_ref[...]
    if apply_relu:
        acc = jnp.maximum(acc, 0.0)
    o_ref[...] = acc.astype(o_ref.dtype)


def matmul_bias(x, w, b, *, apply_relu, block_m=512):
    """y = x @ w + b (optionally ReLU), tiled over rows of x.

    Weight / bias blocks stay resident; only the M axis is gridded so the
    per-step VMEM footprint is a few MiB regardless of batch size.
    """
    M, K = x.shape
    K2, N = w.shape
    assert K == K2, (K, K2)
    tm = min(block_m, M)
    kernel = functools.partial(_matmul_bias_kernel, apply_relu=apply_relu)
    return pl.pallas_call(
        kernel,
        out_shape=jax.ShapeDtypeStruct((M, N), jnp.float32),
        grid=(pl.cdiv(M, tm),),
        in_specs=[
            pl.BlockSpec((tm, K), lambda i: (i, 0)),
            pl.BlockSpec((K, N), lambda i: (0, 0)),
            pl.BlockSpec((1, N), lambda i: (0, 0)),
        ],
        out_specs=pl.BlockSpec((tm, N), lambda i: (i, 0)),
        compiler_params=pltpu.CompilerParams(
            dimension_semantics=("parallel",)),
    )(x, w, b.reshape(1, N))


def _fc_head_kernel(x_ref, w1_ref, b1_ref, w2_ref, b2_ref, o_ref):
    # Fused fc1 + ReLU + fc2 (dropout is identity at inference).
    h = jnp.dot(x_ref[...], w1_ref[...], preferred_element_type=jnp.float32)
    h = jnp.maximum(h + b1_ref[...], 0.0)
    # TODO(synk): nn.Dropout(0.25) is identity in eval/inference mode; training-mode RNG mask not implemented.
    y = jnp.dot(h.astype(w2_ref.dtype), w2_ref[...],
                preferred_element_type=jnp.float32)
    o_ref[...] = (y + b2_ref[...]).astype(o_ref.dtype)


def fc_head(x, w1, b1, w2, b2, *, block_m=512):
    """x: (B, 1152) bf16, w1: (1152,512) bf16, w2: (512,128) lane-padded bf16."""
    M, K = x.shape
    H = w1.shape[1]
    NO = w2.shape[1]
    tm = min(block_m, M)
    return pl.pallas_call(
        _fc_head_kernel,
        out_shape=jax.ShapeDtypeStruct((M, NO), jnp.float32),
        grid=(pl.cdiv(M, tm),),
        in_specs=[
            pl.BlockSpec((tm, K), lambda i: (i, 0)),
            pl.BlockSpec((K, H), lambda i: (0, 0)),
            pl.BlockSpec((1, H), lambda i: (0, 0)),
            pl.BlockSpec((H, NO), lambda i: (0, 0)),
            pl.BlockSpec((1, NO), lambda i: (0, 0)),
        ],
        out_specs=pl.BlockSpec((tm, NO), lambda i: (i, 0)),
        compiler_params=pltpu.CompilerParams(
            dimension_semantics=("parallel",)),
    )(x, w1, b1.reshape(1, H), w2, b2.reshape(1, NO))


def _maxpool_kernel(x_ref, o_ref, *, c):
    # x block: (TR, 2, Wo, 2*C).  Vertical 2-max, then horizontal 2-max over
    # the two C-wide halves of the lane dimension.  All f32 (VPU-friendly on v5e).
    x = x_ref[...]
    v = jnp.maximum(x[:, 0], x[:, 1])            # (TR, Wo, 2*C)
    o_ref[...] = jnp.maximum(v[:, :, :c], v[:, :, c:])


def maxpool2x2(x, *, block_rows=512):
    """2x2/stride-2 max pool (floor mode = nn.MaxPool2d(2,2)).  NHWC, f32.

    Single-input kernel: the activation is reshaped (zero-copy for even H/W)
    to (N*Ho, 2, Wo, 2*C) so one HBM read produces the pooled output.
    """
    N, H, W, C = x.shape
    Ho, Wo = H // 2, W // 2
    xs = x[:, :2 * Ho, :2 * Wo, :]               # floor mode drops odd edge
    xs = xs.reshape(N * Ho, 2, Wo, 2 * C)
    R = N * Ho
    tr = min(block_rows, R)
    out = pl.pallas_call(
        functools.partial(_maxpool_kernel, c=C),
        out_shape=jax.ShapeDtypeStruct((R, Wo, C), x.dtype),
        grid=(pl.cdiv(R, tr),),
        in_specs=[pl.BlockSpec((tr, 2, Wo, 2 * C), lambda i: (i, 0, 0, 0))],
        out_specs=pl.BlockSpec((tr, Wo, C), lambda i: (i, 0, 0)),
        compiler_params=pltpu.CompilerParams(
            dimension_semantics=("parallel",)),
    )(xs)
    return out.reshape(N, Ho, Wo, C)


# ---------------------------------------------------------------------------
# Conv as im2col + Pallas matmul
# ---------------------------------------------------------------------------
def conv3x3_relu(x, w_mat, b, *, block_m=512):
    """F.relu(conv2d 3x3, padding=1) in NHWC layout via im2col + Pallas matmul.

    x: (N,H,W,Cin) f32, w_mat: (9*Cin, Cout) in (kh,kw,ci) row order (bf16 for
    the MXU-bound layers, f32 for conv1), b: (Cout,) f32.
    """
    N, H, W, Cin = x.shape
    Cout = w_mat.shape[1]
    xc = x.astype(w_mat.dtype)                   # bf16 operands where it pays off
    xp = jnp.pad(xc, ((0, 0), (1, 1), (1, 1), (0, 0)))
    patches = jnp.concatenate(
        [xp[:, kh:kh + H, kw:kw + W, :] for kh in range(3) for kw in range(3)],
        axis=-1,
    ).reshape(N * H * W, 9 * Cin)
    y = matmul_bias(patches, w_mat, b, apply_relu=True, block_m=block_m)
    return y.reshape(N, H, W, Cout)


# ---------------------------------------------------------------------------
# Parameters
# ---------------------------------------------------------------------------
def init_params(key, num_classes=10):
    """PyTorch-layout parameters (as nn.Conv2d / nn.Linear store them)."""
    ks = jax.random.split(key, 10)
    f32 = jnp.float32

    def conv_w(k, cout, cin):
        return 0.05 * jax.random.normal(k, (cout, cin, 3, 3), f32)

    def lin_w(k, out_f, in_f):                   # PyTorch Linear layout: (out, in)
        return 0.02 * jax.random.normal(k, (out_f, in_f), f32)

    return {
        "w1": conv_w(ks[0], 32, 1),   "b1": 0.01 * jax.random.normal(ks[1], (32,), f32),
        "w2": conv_w(ks[2], 64, 32),  "b2": 0.01 * jax.random.normal(ks[3], (64,), f32),
        "w3": conv_w(ks[4], 128, 64), "b3": 0.01 * jax.random.normal(ks[5], (128,), f32),
        "wfc1": lin_w(ks[6], 512, 128 * 3 * 3),
        "bfc1": 0.01 * jax.random.normal(ks[7], (512,), f32),
        "wfc2": lin_w(ks[8], num_classes, 512),
        "bfc2": 0.01 * jax.random.normal(ks[9], (num_classes,), f32),
    }


def prepare_params(p):
    """One-time layout/dtype prep so the forward pass has no weight transposes.

    * conv weights -> (9*Cin, Cout) im2col matrices in (kh,kw,ci) order
      (bf16 for MXU-bound conv2/conv3; conv1 stays f32).
    * fc1 weight -> (1152, 512) with columns permuted from PyTorch's (C,H,W)
      flatten order to our NHWC (H,W,C) flatten order, bf16.
    * fc2 weight -> (512, 128): transposed and zero-padded from num_classes to
      128 output lanes (wrapper slices the logits back).
    """
    def conv_mat(w, dtype):
        cout = w.shape[0]
        return jnp.transpose(w, (2, 3, 1, 0)).reshape(-1, cout).astype(dtype)

    num_classes = p["wfc2"].shape[0]
    wfc1 = p["wfc1"].reshape(512, 128, 3, 3)
    wfc1 = jnp.transpose(wfc1, (2, 3, 1, 0)).reshape(3 * 3 * 128, 512)
    wfc2 = jnp.zeros((512, 128), jnp.float32).at[:, :num_classes].set(p["wfc2"].T)
    bfc2 = jnp.zeros((128,), jnp.float32).at[:num_classes].set(p["bfc2"])
    return {
        "w1": conv_mat(p["w1"], jnp.float32),  "b1": p["b1"],
        "w2": conv_mat(p["w2"], jnp.bfloat16), "b2": p["b2"],
        "w3": conv_mat(p["w3"], jnp.bfloat16), "b3": p["b3"],
        "wfc1": wfc1.astype(jnp.bfloat16),     "bfc1": p["bfc1"],
        "wfc2": wfc2.astype(jnp.bfloat16),     "bfc2": bfc2,
    }


# ---------------------------------------------------------------------------
# Model forward
# ---------------------------------------------------------------------------
@functools.partial(jax.jit, static_argnames=("num_classes",))
def mnist_cnn_forward(x_nchw, params, num_classes=10):
    """x_nchw: (N, 1, 28, 28) float32 -> logits (N, num_classes) float32."""
    x = jnp.transpose(x_nchw, (0, 2, 3, 1))                       # NCHW -> NHWC
    x = maxpool2x2(conv3x3_relu(x, params["w1"], params["b1"]))   # (N,14,14, 32)
    x = maxpool2x2(conv3x3_relu(x, params["w2"], params["b2"]))   # (N, 7, 7, 64)
    x = maxpool2x2(conv3x3_relu(x, params["w3"], params["b3"]))   # (N, 3, 3,128)
    n = x.shape[0]
    # Plain NHWC flatten; wfc1's columns were pre-permuted to this order at
    # init so no activation transpose is needed to match PyTorch's view().
    x = x.reshape(n, 3 * 3 * 128).astype(params["wfc1"].dtype)
    logits = fc_head(x, params["wfc1"], params["bfc1"],
                     params["wfc2"], params["bfc2"])               # (N, 128)
    return logits[:, :num_classes]


if __name__ == "__main__":
    key = jax.random.PRNGKey(0)
    k_x, k_p = jax.random.split(key)
    # Architecture requires 28x28 input (128*3*3 flatten); small batch of 2.
    x = jax.random.normal(k_x, (2, 1, 28, 28), jnp.float32)
    params = prepare_params(init_params(k_p))
    logits = mnist_cnn_forward(x, params, num_classes=10)
    jax.block_until_ready(logits)
    assert logits.shape == (2, 10) and logits.dtype == jnp.float32
    print("KERNEL_OK")
</pallas_src>

<mosaic_0001>
module attributes {stable_mosaic.version = 11 : i64} {
  func.func @_matmul_bias_kernel(%arg0: i32, %arg1: memref<512x9xf32, #tpu.memory_space<vmem>>, %arg2: memref<9x32xf32, #tpu.memory_space<vmem>>, %arg3: memref<1x32xf32, #tpu.memory_space<vmem>>, %arg4: memref<512x32xf32, #tpu.memory_space<vmem>>) attributes {dimension_semantics = [#tpu.dimension_semantics<parallel>], iteration_bounds = array<i64: 4>, scalar_prefetch = 0 : i64, scratch_operands = 0 : i64, tpu.core_type = #tpu.core_type<tc>, window_params = [{transform_indices = @transform_0, window_bounds = array<i64: 512, 9>}, {pipeline_mode = #tpu.pipeline_mode<synchronous>, transform_indices = @transform_1, window_bounds = array<i64: 9, 32>}, {pipeline_mode = #tpu.pipeline_mode<synchronous>, transform_indices = @transform_2, window_bounds = array<i64: 1, 32>}, {transform_indices = @transform_3, window_bounds = array<i64: 512, 32>}]} {
    %c0 = arith.constant 0 : index
    %c0_0 = arith.constant 0 : index
    %0 = vector.load %arg1[%c0, %c0_0] : memref<512x9xf32, #tpu.memory_space<vmem>>, vector<512x9xf32>
    %c0_1 = arith.constant 0 : index
    %c0_2 = arith.constant 0 : index
    %1 = vector.load %arg2[%c0_1, %c0_2] : memref<9x32xf32, #tpu.memory_space<vmem>>, vector<9x32xf32>
    %cst = arith.constant dense<0.000000e+00> : vector<512x32xf32>
    %2 = tpu.matmul %0, %1, %cst {dimension_numbers = #tpu.dot_dimension_numbers<[1], [0], [0], [1], [0, 0, 1, 1], [], []>} : vector<512x9xf32>, vector<9x32xf32>, vector<512x32xf32> -> vector<512x32xf32>
    %c0_3 = arith.constant 0 : index
    %c0_4 = arith.constant 0 : index
    %3 = vector.load %arg3[%c0_3, %c0_4] : memref<1x32xf32, #tpu.memory_space<vmem>>, vector<1x32xf32>
    %4 = vector.broadcast %3 : vector<1x32xf32> to vector<512x32xf32>
    %5 = arith.addf %2, %4 : vector<512x32xf32>
    %cst_5 = arith.constant 0.000000e+00 : f32
    %6 = vector.broadcast %cst_5 : f32 to vector<512x32xf32>
    %7 = arith.maximumf %5, %6 : vector<512x32xf32>
    %c0_6 = arith.constant 0 : index
    %c0_7 = arith.constant 0 : index
    %8 = vector.load %arg4[%c0_6, %c0_7] : memref<512x32xf32, #tpu.memory_space<vmem>>, vector<512x32xf32>
    tpu.vector_store %arg4[%c0_6, %c0_7], %7 {strides = array<i32>} : memref<512x32xf32, #tpu.memory_space<vmem>>, vector<512x32xf32>,
    return
  }
  func.func @transform_0(%arg0: i32) -> (i32, i32) {
    %c0_i32 = arith.constant 0 : i32
    %c0_i32_0 = arith.constant 0 : i32
    return %arg0, %c0_i32 : i32, i32
  }
  func.func @transform_1(%arg0: i32) -> (i32, i32) {
    %c0_i32 = arith.constant 0 : i32
    %c0_i32_0 = arith.constant 0 : i32
    %c0_i32_1 = arith.constant 0 : i32
    return %c0_i32, %c0_i32_0 : i32, i32
  }
  func.func @transform_2(%arg0: i32) -> (i32, i32) {
    %c0_i32 = arith.constant 0 : i32
    %c0_i32_0 = arith.constant 0 : i32
    %c0_i32_1 = arith.constant 0 : i32
    return %c0_i32, %c0_i32_0 : i32, i32
  }
  func.func @transform_3(%arg0: i32) -> (i32, i32) {
    %c0_i32 = arith.constant 0 : i32
    %c0_i32_0 = arith.constant 0 : i32
    return %arg0, %c0_i32 : i32, i32
  }
}

module attributes {stable_mosaic.version = 11 : i64} {
  func.func @_maxpool_kernel(%arg0: i32, %arg1: memref<28x2x14x64xf32, #tpu.memory_space<vmem>>, %arg2: memref<28x14x32xf32, #tpu.memory_space<vmem>>) attributes {dimension_semantics = [#tpu.dimension_semantics<parallel>], iteration_bounds = array<i64: 1>, scalar_prefetch = 0 : i64, scratch_operands = 0 : i64, tpu.core_type = #tpu.core_type<tc>, window_params = [{transform_indices = @transform_0, window_bounds = array<i64: 28, 2, 14, 64>}, {transform_indices = @transform_1, window_bounds = array<i64: 28, 14, 32>}]} {
    %c0 = arith.constant 0 : index
    %c0_0 = arith.constant 0 : index
    %c0_1 = arith.constant 0 : index
    %c0_2 = arith.constant 0 : index
    %0 = vector.load %arg1[%c0, %c0_0, %c0_1, %c0_2] : memref<28x2x14x64xf32, #tpu.memory_space<vmem>>, vector<28x2x14x64xf32>
    %1 = vector.extract_strided_slice %0 {offsets = [0, 0, 0, 0], sizes = [28, 1, 14, 64], strides = [1, 1, 1, 1]} : vector<28x2x14x64xf32> to vector<28x1x14x64xf32>
    %2 = vector.shape_cast %1 : vector<28x1x14x64xf32> to vector<28x14x64xf32>
    %3 = vector.extract_strided_slice %0 {offsets = [0, 1, 0, 0], sizes = [28, 1, 14, 64], strides = [1, 1, 1, 1]} : vector<28x2x14x64xf32> to vector<28x1x14x64xf32>
    %4 = vector.shape_cast %3 : vector<28x1x14x64xf32> to vector<28x14x64xf32>
    %5 = arith.maximumf %2, %4 : vector<28x14x64xf32>
    %6 = vector.extract_strided_slice %5 {offsets = [0, 0, 0], sizes = [28, 14, 32], strides = [1, 1, 1]} : vector<28x14x64xf32> to vector<28x14x32xf32>
    %7 = vector.extract_strided_slice %5 {offsets = [0, 0, 32], sizes = [28, 14, 32], strides = [1, 1, 1]} : vector<28x14x64xf32> to vector<28x14x32xf32>
    %8 = arith.maximumf %6, %7 : vector<28x14x32xf32>
    %c0_3 = arith.constant 0 : index
    %c0_4 = arith.constant 0 : index
    %c0_5 = arith.constant 0 : index
    %9 = vector.load %arg2[%c0_3, %c0_4, %c0_5] : memref<28x14x32xf32, #tpu.memory_space<vmem>>, vector<28x14x32xf32>
    tpu.vector_store %arg2[%c0_3, %c0_4, %c0_5], %8 {strides = array<i32>} : memref<28x14x32xf32, #tpu.memory_space<vmem>>, vector<28x14x32xf32>,
    return
  }
  func.func @transform_0(%arg0: i32) -> (i32, i32, i32, i32) {
    %c0_i32 = arith.constant 0 : i32
    %c0_i32_0 = arith.constant 0 : i32
    %c0_i32_1 = arith.constant 0 : i32
    %c0_i32_2 = arith.constant 0 : i32
    return %arg0, %c0_i32, %c0_i32_0, %c0_i32_1 : i32, i32, i32, i32
  }
  func.func @transform_1(%arg0: i32) -> (i32, i32, i32) {
    %c0_i32 = arith.constant 0 : i32
    %c0_i32_0 = arith.constant 0 : i32
    %c0_i32_1 = arith.constant 0 : i32
    return %arg0, %c0_i32, %c0_i32_0 : i32, i32, i32
  }
}

module attributes {stable_mosaic.version = 11 : i64} {
  func.func @_matmul_bias_kernel(%arg0: i32, %arg1: memref<392x288xbf16, #tpu.memory_space<vmem>>, %arg2: memref<288x64xbf16, #tpu.memory_space<vmem>>, %arg3: memref<1x64xf32, #tpu.memory_space<vmem>>, %arg4: memref<392x64xf32, #tpu.memory_space<vmem>>) attributes {dimension_semantics = [#tpu.dimension_semantics<parallel>], iteration_bounds = array<i64: 1>, scalar_prefetch = 0 : i64, scratch_operands = 0 : i64, tpu.core_type = #tpu.core_type<tc>, window_params = [{transform_indices = @transform_0, window_bounds = array<i64: 392, 288>}, {pipeline_mode = #tpu.pipeline_mode<synchronous>, transform_indices = @transform_1, window_bounds = array<i64: 288, 64>}, {pipeline_mode = #tpu.pipeline_mode<synchronous>, transform_indices = @transform_2, window_bounds = array<i64: 1, 64>}, {transform_indices = @transform_3, window_bounds = array<i64: 392, 64>}]} {
    %c0 = arith.constant 0 : index
    %c0_0 = arith.constant 0 : index
    %0 = vector.load %arg1[%c0, %c0_0] : memref<392x288xbf16, #tpu.memory_space<vmem>>, vector<392x288xbf16>
    %c0_1 = arith.constant 0 : index
    %c0_2 = arith.constant 0 : index
    %1 = vector.load %arg2[%c0_1, %c0_2] : memref<288x64xbf16, #tpu.memory_space<vmem>>, vector<288x64xbf16>
    %cst = arith.constant dense<0.000000e+00> : vector<392x64xf32>
    %2 = tpu.matmul %0, %1, %cst {dimension_numbers = #tpu.dot_dimension_numbers<[1], [0], [0], [1], [0, 0, 1, 1], [], []>} : vector<392x288xbf16>, vector<288x64xbf16>, vector<392x64xf32> -> vector<392x64xf32>
    %c0_3 = arith.constant 0 : index
    %c0_4 = arith.constant 0 : index
    %3 = vector.load %arg3[%c0_3, %c0_4] : memref<1x64xf32, #tpu.memory_space<vmem>>, vector<1x64xf32>
    %4 = vector.broadcast %3 : vector<1x64xf32> to vector<392x64xf32>
    %5 = arith.addf %2, %4 : vector<392x64xf32>
    %cst_5 = arith.constant 0.000000e+00 : f32
    %6 = vector.broadcast %cst_5 : f32 to vector<392x64xf32>
    %7 = arith.maximumf %5, %6 : vector<392x64xf32>
    %c0_6 = arith.constant 0 : index
    %c0_7 = arith.constant 0 : index
    %8 = vector.load %arg4[%c0_6, %c0_7] : memref<392x64xf32, #tpu.memory_space<vmem>>, vector<392x64xf32>
    tpu.vector_store %arg4[%c0_6, %c0_7], %7 {strides = array<i32>} : memref<392x64xf32, #tpu.memory_space<vmem>>, vector<392x64xf32>,
    return
  }
  func.func @transform_0(%arg0: i32) -> (i32, i32) {
    %c0_i32 = arith.constant 0 : i32
    %c0_i32_0 = arith.constant 0 : i32
    return %arg0, %c0_i32 : i32, i32
  }
  func.func @transform_1(%arg0: i32) -> (i32, i32) {
    %c0_i32 = arith.constant 0 : i32
    %c0_i32_0 = arith.constant 0 : i32
    %c0_i32_1 = arith.constant 0 : i32
    return %c0_i32, %c0_i32_0 : i32, i32
  }
  func.func @transform_2(%arg0: i32) -> (i32, i32) {
    %c0_i32 = arith.constant 0 : i32
    %c0_i32_0 = arith.constant 0 : i32
    %c0_i32_1 = arith.constant 0 : i32
    return %c0_i32, %c0_i32_0 : i32, i32
  }
  func.func @transform_3(%arg0: i32) -> (i32, i32) {
    %c0_i32 = arith.constant 0 : i32
    %c0_i32_0 = arith.constant 0 : i32
    return %arg0, %c0_i32 : i32, i32
  }
}

module attributes {stable_mosaic.version = 11 : i64} {
  func.func @_maxpool_kernel(%arg0: i32, %arg1: memref<14x2x7x128xf32, #tpu.memory_space<vmem>>, %arg2: memref<14x7x64xf32, #tpu.memory_space<vmem>>) attributes {dimension_semantics = [#tpu.dimension_semantics<parallel>], iteration_bounds = array<i64: 1>, scalar_prefetch = 0 : i64, scratch_operands = 0 : i64, tpu.core_type = #tpu.core_type<tc>, window_params = [{transform_indices = @transform_0, window_bounds = array<i64: 14, 2, 7, 128>}, {transform_indices = @transform_1, window_bounds = array<i64: 14, 7, 64>}]} {
    %c0 = arith.constant 0 : index
    %c0_0 = arith.constant 0 : index
    %c0_1 = arith.constant 0 : index
    %c0_2 = arith.constant 0 : index
    %0 = vector.load %arg1[%c0, %c0_0, %c0_1, %c0_2] : memref<14x2x7x128xf32, #tpu.memory_space<vmem>>, vector<14x2x7x128xf32>
    %1 = vector.extract_strided_slice %0 {offsets = [0, 0, 0, 0], sizes = [14, 1, 7, 128], strides = [1, 1, 1, 1]} : vector<14x2x7x128xf32> to vector<14x1x7x128xf32>
    %2 = vector.shape_cast %1 : vector<14x1x7x128xf32> to vector<14x7x128xf32>
    %3 = vector.extract_strided_slice %0 {offsets = [0, 1, 0, 0], sizes = [14, 1, 7, 128], strides = [1, 1, 1, 1]} : vector<14x2x7x128xf32> to vector<14x1x7x128xf32>
    %4 = vector.shape_cast %3 : vector<14x1x7x128xf32> to vector<14x7x128xf32>
    %5 = arith.maximumf %2, %4 : vector<14x7x128xf32>
    %6 = vector.extract_strided_slice %5 {offsets = [0, 0, 0], sizes = [14, 7, 64], strides = [1, 1, 1]} : vector<14x7x128xf32> to vector<14x7x64xf32>
    %7 = vector.extract_strided_slice %5 {offsets = [0, 0, 64], sizes = [14, 7, 64], strides = [1, 1, 1]} : vector<14x7x128xf32> to vector<14x7x64xf32>
    %8 = arith.maximumf %6, %7 : vector<14x7x64xf32>
    %c0_3 = arith.constant 0 : index
    %c0_4 = arith.constant 0 : index
    %c0_5 = arith.constant 0 : index
    %9 = vector.load %arg2[%c0_3, %c0_4, %c0_5] : memref<14x7x64xf32, #tpu.memory_space<vmem>>, vector<14x7x64xf32>
    tpu.vector_store %arg2[%c0_3, %c0_4, %c0_5], %8 {strides = array<i32>} : memref<14x7x64xf32, #tpu.memory_space<vmem>>, vector<14x7x64xf32>,
    return
  }
  func.func @transform_0(%arg0: i32) -> (i32, i32, i32, i32) {
    %c0_i32 = arith.constant 0 : i32
    %c0_i32_0 = arith.constant 0 : i32
    %c0_i32_1 = arith.constant 0 : i32
    %c0_i32_2 = arith.constant 0 : i32
    return %arg0, %c0_i32, %c0_i32_0, %c0_i32_1 : i32, i32, i32, i32
  }
  func.func @transform_1(%arg0: i32) -> (i32, i32, i32) {
    %c0_i32 = arith.constant 0 : i32
    %c0_i32_0 = arith.constant 0 : i32
    %c0_i32_1 = arith.constant 0 : i32
    return %arg0, %c0_i32, %c0_i32_0 : i32, i32, i32
  }
}

module attributes {stable_mosaic.version = 11 : i64} {
  func.func @_matmul_bias_kernel(%arg0: i32, %arg1: memref<98x576xbf16, #tpu.memory_space<vmem>>, %arg2: memref<576x128xbf16, #tpu.memory_space<vmem>>, %arg3: memref<1x128xf32, #tpu.memory_space<vmem>>, %arg4: memref<98x128xf32, #tpu.memory_space<vmem>>) attributes {dimension_semantics = [#tpu.dimension_semantics<parallel>], iteration_bounds = array<i64: 1>, scalar_prefetch = 0 : i64, scratch_operands = 0 : i64, tpu.core_type = #tpu.core_type<tc>, window_params = [{transform_indices = @transform_0, window_bounds = array<i64: 98, 576>}, {pipeline_mode = #tpu.pipeline_mode<synchronous>, transform_indices = @transform_1, window_bounds = array<i64: 576, 128>}, {pipeline_mode = #tpu.pipeline_mode<synchronous>, transform_indices = @transform_2, window_bounds = array<i64: 1, 128>}, {transform_indices = @transform_3, window_bounds = array<i64: 98, 128>}]} {
    %c0 = arith.constant 0 : index
    %c0_0 = arith.constant 0 : index
    %0 = vector.load %arg1[%c0, %c0_0] : memref<98x576xbf16, #tpu.memory_space<vmem>>, vector<98x576xbf16>
    %c0_1 = arith.constant 0 : index
    %c0_2 = arith.constant 0 : index
    %1 = vector.load %arg2[%c0_1, %c0_2] : memref<576x128xbf16, #tpu.memory_space<vmem>>, vector<576x128xbf16>
    %cst = arith.constant dense<0.000000e+00> : vector<98x128xf32>
    %2 = tpu.matmul %0, %1, %cst {dimension_numbers = #tpu.dot_dimension_numbers<[1], [0], [0], [1], [0, 0, 1, 1], [], []>} : vector<98x576xbf16>, vector<576x128xbf16>, vector<98x128xf32> -> vector<98x128xf32>
    %c0_3 = arith.constant 0 : index
    %c0_4 = arith.constant 0 : index
    %3 = vector.load %arg3[%c0_3, %c0_4] : memref<1x128xf32, #tpu.memory_space<vmem>>, vector<1x128xf32>
    %4 = vector.broadcast %3 : vector<1x128xf32> to vector<98x128xf32>
    %5 = arith.addf %2, %4 : vector<98x128xf32>
    %cst_5 = arith.constant 0.000000e+00 : f32
    %6 = vector.broadcast %cst_5 : f32 to vector<98x128xf32>
    %7 = arith.maximumf %5, %6 : vector<98x128xf32>
    %c0_6 = arith.constant 0 : index
    %c0_7 = arith.constant 0 : index
    %8 = vector.load %arg4[%c0_6, %c0_7] : memref<98x128xf32, #tpu.memory_space<vmem>>, vector<98x128xf32>
    tpu.vector_store %arg4[%c0_6, %c0_7], %7 {strides = array<i32>} : memref<98x128xf32, #tpu.memory_space<vmem>>, vector<98x128xf32>,
    return
  }
  func.func @transform_0(%arg0: i32) -> (i32, i32) {
    %c0_i32 = arith.constant 0 : i32
    %c0_i32_0 = arith.constant 0 : i32
    return %arg0, %c0_i32 : i32, i32
  }
  func.func @transform_1(%arg0: i32) -> (i32, i32) {
    %c0_i32 = arith.constant 0 : i32
    %c0_i32_0 = arith.constant 0 : i32
    %c0_i32_1 = arith.constant 0 : i32
    return %c0_i32, %c0_i32_0 : i32, i32
  }
  func.func @transform_2(%arg0: i32) -> (i32, i32) {
    %c0_i32 = arith.constant 0 : i32
    %c0_i32_0 = arith.constant 0 : i32
    %c0_i32_1 = arith.constant 0 : i32
    return %c0_i32, %c0_i32_0 : i32, i32
  }
  func.func @transform_3(%arg0: i32) -> (i32, i32) {
    %c0_i32 = arith.constant 0 : i32
    %c0_i32_0 = arith.constant 0 : i32
    return %arg0, %c0_i32 : i32, i32
  }
}

module attributes {stable_mosaic.version = 11 : i64} {
  func.func @_maxpool_kernel(%arg0: i32, %arg1: memref<6x2x3x256xf32, #tpu.memory_space<vmem>>, %arg2: memref<6x3x128xf32, #tpu.memory_space<vmem>>) attributes {dimension_semantics = [#tpu.dimension_semantics<parallel>], iteration_bounds = array<i64: 1>, scalar_prefetch = 0 : i64, scratch_operands = 0 : i64, tpu.core_type = #tpu.core_type<tc>, window_params = [{transform_indices = @transform_0, window_bounds = array<i64: 6, 2, 3, 256>}, {transform_indices = @transform_1, window_bounds = array<i64: 6, 3, 128>}]} {
    %c0 = arith.constant 0 : index
    %c0_0 = arith.constant 0 : index
    %c0_1 = arith.constant 0 : index
    %c0_2 = arith.constant 0 : index
    %0 = vector.load %arg1[%c0, %c0_0, %c0_1, %c0_2] : memref<6x2x3x256xf32, #tpu.memory_space<vmem>>, vector<6x2x3x256xf32>
    %1 = vector.extract_strided_slice %0 {offsets = [0, 0, 0, 0], sizes = [6, 1, 3, 256], strides = [1, 1, 1, 1]} : vector<6x2x3x256xf32> to vector<6x1x3x256xf32>
    %2 = vector.shape_cast %1 : vector<6x1x3x256xf32> to vector<6x3x256xf32>
    %3 = vector.extract_strided_slice %0 {offsets = [0, 1, 0, 0], sizes = [6, 1, 3, 256], strides = [1, 1, 1, 1]} : vector<6x2x3x256xf32> to vector<6x1x3x256xf32>
    %4 = vector.shape_cast %3 : vector<6x1x3x256xf32> to vector<6x3x256xf32>
    %5 = arith.maximumf %2, %4 : vector<6x3x256xf32>
    %6 = vector.extract_strided_slice %5 {offsets = [0, 0, 0], sizes = [6, 3, 128], strides = [1, 1, 1]} : vector<6x3x256xf32> to vector<6x3x128xf32>
    %7 = vector.extract_strided_slice %5 {offsets = [0, 0, 128], sizes = [6, 3, 128], strides = [1, 1, 1]} : vector<6x3x256xf32> to vector<6x3x128xf32>
    %8 = arith.maximumf %6, %7 : vector<6x3x128xf32>
    %c0_3 = arith.constant 0 : index
    %c0_4 = arith.constant 0 : index
    %c0_5 = arith.constant 0 : index
    %9 = vector.load %arg2[%c0_3, %c0_4, %c0_5] : memref<6x3x128xf32, #tpu.memory_space<vmem>>, vector<6x3x128xf32>
    tpu.vector_store %arg2[%c0_3, %c0_4, %c0_5], %8 {strides = array<i32>} : memref<6x3x128xf32, #tpu.memory_space<vmem>>, vector<6x3x128xf32>,
    return
  }
  func.func @transform_0(%arg0: i32) -> (i32, i32, i32, i32) {
    %c0_i32 = arith.constant 0 : i32
    %c0_i32_0 = arith.constant 0 : i32
    %c0_i32_1 = arith.constant 0 : i32
    %c0_i32_2 = arith.constant 0 : i32
    return %arg0, %c0_i32, %c0_i32_0, %c0_i32_1 : i32, i32, i32, i32
  }
  func.func @transform_1(%arg0: i32) -> (i32, i32, i32) {
    %c0_i32 = arith.constant 0 : i32
    %c0_i32_0 = arith.constant 0 : i32
    %c0_i32_1 = arith.constant 0 : i32
    return %arg0, %c0_i32, %c0_i32_0 : i32, i32, i32
  }
}

module attributes {stable_mosaic.version = 11 : i64} {
  func.func @_fc_head_kernel(%arg0: i32, %arg1: memref<2x1152xbf16, #tpu.memory_space<vmem>>, %arg2: memref<1152x512xbf16, #tpu.memory_space<vmem>>, %arg3: memref<1x512xf32, #tpu.memory_space<vmem>>, %arg4: memref<512x128xbf16, #tpu.memory_space<vmem>>, %arg5: memref<1x128xf32, #tpu.memory_space<vmem>>, %arg6: memref<2x128xf32, #tpu.memory_space<vmem>>) attributes {dimension_semantics = [#tpu.dimension_semantics<parallel>], iteration_bounds = array<i64: 1>, scalar_prefetch = 0 : i64, scratch_operands = 0 : i64, tpu.core_type = #tpu.core_type<tc>, window_params = [{transform_indices = @transform_0, window_bounds = array<i64: 2, 1152>}, {pipeline_mode = #tpu.pipeline_mode<synchronous>, transform_indices = @transform_1, window_bounds = array<i64: 1152, 512>}, {pipeline_mode = #tpu.pipeline_mode<synchronous>, transform_indices = @transform_2, window_bounds = array<i64: 1, 512>}, {pipeline_mode = #tpu.pipeline_mode<synchronous>, transform_indices = @transform_3, window_bounds = array<i64: 512, 128>}, {pipeline_mode = #tpu.pipeline_mode<synchronous>, transform_indices = @transform_4, window_bounds = array<i64: 1, 128>}, {transform_indices = @transform_5, window_bounds = array<i64: 2, 128>}]} {
    %c0 = arith.constant 0 : index
    %c0_0 = arith.constant 0 : index
    %0 = vector.load %arg1[%c0, %c0_0] : memref<2x1152xbf16, #tpu.memory_space<vmem>>, vector<2x1152xbf16>
    %c0_1 = arith.constant 0 : index
    %c0_2 = arith.constant 0 : index
    %1 = vector.load %arg2[%c0_1, %c0_2] : memref<1152x512xbf16, #tpu.memory_space<vmem>>, vector<1152x512xbf16>
    %cst = arith.constant dense<0.000000e+00> : vector<2x512xf32>
    %2 = tpu.matmul %0, %1, %cst {dimension_numbers = #tpu.dot_dimension_numbers<[1], [0], [0], [1], [0, 0, 1, 1], [], []>} : vector<2x1152xbf16>, vector<1152x512xbf16>, vector<2x512xf32> -> vector<2x512xf32>
    %c0_3 = arith.constant 0 : index
    %c0_4 = arith.constant 0 : index
    %3 = vector.load %arg3[%c0_3, %c0_4] : memref<1x512xf32, #tpu.memory_space<vmem>>, vector<1x512xf32>
    %4 = vector.broadcast %3 : vector<1x512xf32> to vector<2x512xf32>
    %5 = arith.addf %2, %4 : vector<2x512xf32>
    %cst_5 = arith.constant 0.000000e+00 : f32
    %6 = vector.broadcast %cst_5 : f32 to vector<2x512xf32>
    %7 = arith.maximumf %5, %6 : vector<2x512xf32>
    %8 = arith.truncf %7 : vector<2x512xf32> to vector<2x512xbf16>
    %c0_6 = arith.constant 0 : index
    %c0_7 = arith.constant 0 : index
    %9 = vector.load %arg4[%c0_6, %c0_7] : memref<512x128xbf16, #tpu.memory_space<vmem>>, vector<512x128xbf16>
    %cst_8 = arith.constant dense<0.000000e+00> : vector<2x128xf32>
    %10 = tpu.matmul %8, %9, %cst_8 {dimension_numbers = #tpu.dot_dimension_numbers<[1], [0], [0], [1], [0, 0, 1, 1], [], []>} : vector<2x512xbf16>, vector<512x128xbf16>, vector<2x128xf32> -> vector<2x128xf32>
    %c0_9 = arith.constant 0 : index
    %c0_10 = arith.constant 0 : index
    %11 = vector.load %arg5[%c0_9, %c0_10] : memref<1x128xf32, #tpu.memory_space<vmem>>, vector<1x128xf32>
    %12 = vector.broadcast %11 : vector<1x128xf32> to vector<2x128xf32>
    %13 = arith.addf %10, %12 : vector<2x128xf32>
    %c0_11 = arith.constant 0 : index
    %c0_12 = arith.constant 0 : index
    %14 = vector.load %arg6[%c0_11, %c0_12] : memref<2x128xf32, #tpu.memory_space<vmem>>, vector<2x128xf32>
    tpu.vector_store %arg6[%c0_11, %c0_12], %13 {strides = array<i32>} : memref<2x128xf32, #tpu.memory_space<vmem>>, vector<2x128xf32>,
    return
  }
  func.func @transform_0(%arg0: i32) -> (i32, i32) {
    %c0_i32 = arith.constant 0 : i32
    %c0_i32_0 = arith.constant 0 : i32
    return %arg0, %c0_i32 : i32, i32
  }
  func.func @transform_1(%arg0: i32) -> (i32, i32) {
    %c0_i32 = arith.constant 0 : i32
    %c0_i32_0 = arith.constant 0 : i32
    %c0_i32_1 = arith.constant 0 : i32
    return %c0_i32, %c0_i32_0 : i32, i32
  }
  func.func @transform_2(%arg0: i32) -> (i32, i32) {
    %c0_i32 = arith.constant 0 : i32
    %c0_i32_0 = arith.constant 0 : i32
    %c0_i32_1 = arith.constant 0 : i32
    return %c0_i32, %c0_i32_0 : i32, i32
  }
  func.func @transform_3(%arg0: i32) -> (i32, i32) {
    %c0_i32 = arith.constant 0 : i32
    %c0_i32_0 = arith.constant 0 : i32
    %c0_i32_1 = arith.constant 0 : i32
    return %c0_i32, %c0_i32_0 : i32, i32
  }
  func.func @transform_4(%arg0: i32) -> (i32, i32) {
    %c0_i32 = arith.constant 0 : i32
    %c0_i32_0 = arith.constant 0 : i32
    %c0_i32_1 = arith.constant 0 : i32
    return %c0_i32, %c0_i32_0 : i32, i32
  }
  func.func @transform_5(%arg0: i32) -> (i32, i32) {
    %c0_i32 = arith.constant 0 : i32
    %c0_i32_0 = arith.constant 0 : i32
    return %arg0, %c0_i32 : i32, i32
  }
}

</mosaic_0001>

<bundles_post_ra>
// kernel: mnist_cnn_forward.7
= control target key start
LH: loop header
LB: loop body
LE: loop exit
PB: predicated region body
PF: predicated region fallthrough
CT: control target
= control target key end

     0   :  { %s1908_s12 = smov 0   ;;  %s1910_s13 = smov 0   ;;  %s2487_s0 = inlined_call_operand.vmem [shape: f32[1568,9], index: 0, kind: input, shape index: {}]   ;;  %s2488_s1 = inlined_call_operand.vmem [shape: f32[9,32], index: 1, kind: input, shape index: {}]   ;;  %s2489_s2 = inlined_call_operand.vmem [shape: f32[1,32], index: 2, kind: input, shape index: {}]   ;;  %s2490_s3 = inlined_call_operand.vmem [shape: f32[1568,32], index: 3, kind: output, shape index: {}]  }
   0x1   :  { %s1912_s14 = smov 0  }
   0x2 LB: > { %s1921_s15 = sadd.s32 4294967295, %s1853_s14   ;;  %s1923_s16 = sadd.s32 1, %s1853_s14   ;;  %s1853_s14 = sphi %s1912_s14, %s2499_s14   ;;  %s1849_s13 = sphi %s1910_s13, %s2498_s13   ;;  %s1845_s12 = sphi %s1908_s12, %s2497_s12  }
   0x3   : > { %s85_s17 = ssub.s32 %s1853_s14, %s1923_s16  ;;  %s88_s18 = sadd.s32 1, %s1849_s13 }
   0x4   : > { %p86_p0 = scmp.eq.s32.totalorder %s85_s17, 0  ;;  %p98_p1 = scmp.ne.s32.totalorder %s1849_s13, %s1845_s12 }
   0x5   : > { %p99_p2 = scmp.eq.s32.totalorder %s1921_s15, 3  ;;  %p1446_p3 = scmp.ge.s32.totalorder %s1853_s14, 1 }
   0x6   : > { %s1931_s19 = scalar_select %p86_p0, %s1849_s13, %s88_s18  }
   0x7   : > { %p1933_p4 = por %p99_p2, %p98_p1  ;;  %p146_p5 = scmp.lt.s32.totalorder %s1853_s14, 5 }
   0x9   : > { %p147_p6 = pnand %p1446_p3, %p146_p5 }
   0xa   : > { %v256_v0 = vld [vmem:[%s2488_s1] sm:$0xff] (!%p147_p6)  ;;  %v257_v1 = vld [vmem:[%s2488_s1 + $0x8] sm:$0x1] (!%p147_p6)  ;;  %vm458_vm0 = vcmask (!%p147_p6), 1040384   ;;  %s1944_s25 = sshll.u32 (!%p147_p6), %s1921_s15, 6  ;;  %vm1887_vm1 = vmmov (!%p147_p6), 1  }
   0xb   : > { %150 = sbr.rel (%p147_p6) target bundleno = 375 (0x177), region = 32  ;;  %v1702_v2 = vpack.c.bf16 (!%p147_p6), %v257_v1, %v256_v0  ;;  %vm1703_vm2 = vmpackc.low (!%p147_p6), %vm458_vm0, %vm1887_vm1  ;;  %p178_p7 = scmp.lt.s32.totalorder (!%p147_p6), %s1944_s25, 195  ;;  %vm265_vm3 = vcmask (!%p147_p6), 72704   ;;  %vm911_vm4 = vcmask (!%p147_p6), 261120  }
   0xc   : > { %s170_s4 = sand.u32 (!%p147_p6), 1, %s1845_s12  }
   0xd   : > { %1704 = vmatprep.subr.msk.bf16.mxu0 (!%p147_p6), %vm1703_vm2, %v1702_v2  ;;  %1708 = vmatprep.subr.msk.bf16.mxu1 (!%p147_p6), %vm1703_vm2, %v1702_v2  ;;  %s1447_s7 = sshll.u32 (!%p147_p6), %s170_s4, 9 }
   0xe   : > { %1707 = vmatpush3.bf16.msk.msra.mxu0 (!%p147_p6), %vm1703_vm2, %v1702_v2  ;;  %1709 = vmatpush3.bf16.msk.msra.mxu1 (!%p147_p6), %vm1703_vm2, %v1702_v2  ;;  %s2091_s8 = scalar_lea.vmem (!%p147_p6), [#allocation2], %s1447_s7  }
  0x12   : > { %s179_s26 = scalar_select %p178_p7, %s1944_s25, 195 }
  0x13   : > { %s984_s9 = ssub.s32 (%p1933_p4), 196, %s1944_s25  ;;  %s1533_s10 = sshll.u32 (%p1933_p4), %s1921_s15, 9 }
  0x14   : > { %s1449_s27 = sshll.u32 %s179_s26, 3  ;;  %p985_p8 = scmp.lt.s32.totalorder (%p1933_p4), %s984_s9, 64 }
  0x15   : > { %s1951_s30 = scalar_lea.vmem %s2487_s0, %s1449_s27  ;;  %s2288_s14 = scalar_lea.vmem (%p1933_p4), %s2490_s3, %s1533_s10  }
  0x16   : > { %v192_v3 = vld [vmem:[%s1951_s30] sm:$0xff]  ;;  %v193_v5 = vld [vmem:[%s1951_s30 + $0x8] sm:$0xff]  ;;  %v194_v7 = vld [vmem:[%s1951_s30 + $0x10] sm:$0xff] }
  0x17   : > { %v224_v4 = vld [vmem:[%s1951_s30 + $0x100] sm:$0xff]  ;;  %1606 = vmatprep.mubr.msk.f32.mxu0 %vm265_vm3, %v192_v3  ;;  %v225_v6 = vld [vmem:[%s1951_s30 + $0x108] sm:$0xff]  ;;  %v226_v8 = vld [vmem:[%s1951_s30 + $0x110] sm:$0xff] }
  0x18   : > { %1654 = vmatprep.mubr.msk.f32.mxu1 %vm265_vm3, %v224_v4  ;;  %1607 = vmatmul.mubr.msk.f32.vlgmr.msra.gmra.mrb[0].mxu0 %vm265_vm3, %v193_v5  ;;  %v195_v9 = vld [vmem:[%s1951_s30 + $0x18] sm:$0xff]  ;;  %v196_v11 = vld [vmem:[%s1951_s30 + $0x20] sm:$0xff]  ;;  %v197_v13 = vld [vmem:[%s1951_s30 + $0x28] sm:$0xff] }
  0x19   : > { %1655 = vmatmul.mubr.msk.f32.vlgmr.msra.gmra.mrb[0].mxu1 %vm265_vm3, %v225_v6  ;;  %1609 = vmatprep.mubr.msk.f32.mxu0 %vm265_vm3, %v194_v7  ;;  %v227_v10 = vld [vmem:[%s1951_s30 + $0x118] sm:$0xff]  ;;  %v228_v12 = vld [vmem:[%s1951_s30 + $0x120] sm:$0xff]  ;;  %v229_v14 = vld [vmem:[%s1951_s30 + $0x128] sm:$0xff] }
  0x1a   : > { %1657 = vmatprep.mubr.msk.f32.mxu1 %vm265_vm3, %v226_v8  ;;  %v198_v15 = vld [vmem:[%s1951_s30 + $0x30] sm:$0xff]  ;;  %v199_v17 = vld [vmem:[%s1951_s30 + $0x38] sm:$0xff]  ;;  %v200_v19 = vld [vmem:[%s1951_s30 + $0x40] sm:$0xff] }
  0x1b   : > { %v230_v16 = vld [vmem:[%s1951_s30 + $0x130] sm:$0xff]  ;;  %v231_v18 = vld [vmem:[%s1951_s30 + $0x138] sm:$0xff]  ;;  %v232_v20 = vld [vmem:[%s1951_s30 + $0x140] sm:$0xff] }
  0x1c   : > { %1610 = vmatmul.mubr.msk.f32.gmra.mrb[2].mxu0 %vm265_vm3, %v195_v9  ;;  %v201_v21 = vld [vmem:[%s1951_s30 + $0x48] sm:$0xff]  ;;  %v202_v23 = vld [vmem:[%s1951_s30 + $0x50] sm:$0xff]  ;;  %v203_v25 = vld [vmem:[%s1951_s30 + $0x58] sm:$0xff] }
  0x1d   : > { %1658 = vmatmul.mubr.msk.f32.gmra.mrb[2].mxu1 %vm265_vm3, %v227_v10  ;;  %1612 = vmatprep.mubr.msk.f32.mxu0 %vm265_vm3, %v196_v11  ;;  %v233_v22 = vld [vmem:[%s1951_s30 + $0x148] sm:$0xff]  ;;  %v234_v24 = vld [vmem:[%s1951_s30 + $0x150] sm:$0xff]  ;;  %v235_v26 = vld [vmem:[%s1951_s30 + $0x158] sm:$0xff] }
  0x1e   : > { %1660 = vmatprep.mubr.msk.f32.mxu1 %vm265_vm3, %v228_v12  ;;  %v204_v27 = vld [vmem:[%s1951_s30 + $0x60] sm:$0xff]  ;;  %v205_v29 = vld [vmem:[%s1951_s30 + $0x68] sm:$0xff]  ;;  %v206_v31 = vld [vmem:[%s1951_s30 + $0x70] sm:$0xff] }
  0x1f   : > { %v236_v28 = vld [vmem:[%s1951_s30 + $0x160] sm:$0xff]  ;;  %v237_v30 = vld [vmem:[%s1951_s30 + $0x168] sm:$0xff]  ;;  %v238_v32 = vld [vmem:[%s1951_s30 + $0x170] sm:$0xff] }
  0x20   : > { %1613 = vmatmul.mubr.msk.f32.gmra.mrb[4].mxu0 %vm265_vm3, %v197_v13  ;;  %v207_v33 = vld [vmem:[%s1951_s30 + $0x78] sm:$0xff]  ;;  %v208_v35 = vld [vmem:[%s1951_s30 + $0x80] sm:$0xff]  ;;  %v209_v37 = vld [vmem:[%s1951_s30 + $0x88] sm:$0xff] }
  0x21   : > { %1661 = vmatmul.mubr.msk.f32.gmra.mrb[4].mxu1 %vm265_vm3, %v229_v14  ;;  %1615 = vmatprep.mubr.msk.f32.mxu0 %vm265_vm3, %v198_v15  ;;  %v239_v34 = vld [vmem:[%s1951_s30 + $0x178] sm:$0xff]  ;;  %v240_v36 = vld [vmem:[%s1951_s30 + $0x180] sm:$0xff]  ;;  %v241_v38 = vld [vmem:[%s1951_s30 + $0x188] sm:$0xff] }
  0x22   : > { %1663 = vmatprep.mubr.msk.f32.mxu1 %vm265_vm3, %v230_v16  ;;  %v210_v39 = vld [vmem:[%s1951_s30 + $0x90] sm:$0xff]  ;;  %v211_v41 = vld [vmem:[%s1951_s30 + $0x98] sm:$0xff]  ;;  %v212_v43 = vld [vmem:[%s1951_s30 + $0xa0] sm:$0xff] }
  0x23   : > { %v242_v40 = vld [vmem:[%s1951_s30 + $0x190] sm:$0xff]  ;;  %v243_v42 = vld [vmem:[%s1951_s30 + $0x198] sm:$0xff]  ;;  %v244_v44 = vld [vmem:[%s1951_s30 + $0x1a0] sm:$0xff] }
  0x24   : > { %1616 = vmatmul.mubr.msk.f32.gmra.mrb[6].mxu0 %vm265_vm3, %v199_v17  ;;  %v213_v45 = vld [vmem:[%s1951_s30 + $0xa8] sm:$0xff]  ;;  %v214_v47 = vld [vmem:[%s1951_s30 + $0xb0] sm:$0xff]  ;;  %v215_v49 = vld [vmem:[%s1951_s30 + $0xb8] sm:$0xff] }
  0x25   : > { %1664 = vmatmul.mubr.msk.f32.gmra.mrb[6].mxu1 %vm265_vm3, %v231_v18  ;;  %1618 = vmatprep.mubr.msk.f32.mxu0 %vm265_vm3, %v200_v19  ;;  %v245_v46 = vld [vmem:[%s1951_s30 + $0x1a8] sm:$0xff]  ;;  %v246_v48 = vld [vmem:[%s1951_s30 + $0x1b0] sm:$0xff]  ;;  %v247_v50 = vld [vmem:[%s1951_s30 + $0x1b8] sm:$0xff] }
  0x26   : > { %1666 = vmatprep.mubr.msk.f32.mxu1 %vm265_vm3, %v232_v20  ;;  %v216_v51 = vld [vmem:[%s1951_s30 + $0xc0] sm:$0xff]  ;;  %v217_v53 = vld [vmem:[%s1951_s30 + $0xc8] sm:$0xff]  ;;  %v218_v55 = vld [vmem:[%s1951_s30 + $0xd0] sm:$0xff] }
  0x27   : > { %v248_v52 = vld [vmem:[%s1951_s30 + $0x1c0] sm:$0xff]  ;;  %v249_v54 = vld [vmem:[%s1951_s30 + $0x1c8] sm:$0xff]  ;;  %v250_v56 = vld [vmem:[%s1951_s30 + $0x1d0] sm:$0xff] }
  0x28   : > { %1619 = vmatmul.mubr.msk.f32.gmra.mrb[8].mxu0 %vm265_vm3, %v201_v21  ;;  %v219_v57 = vld [vmem:[%s1951_s30 + $0xd8] sm:$0xff]  ;;  %v220_v59 = vld [vmem:[%s1951_s30 + $0xe0] sm:$0xff]  ;;  %v221_v61 = vld [vmem:[%s1951_s30 + $0xe8] sm:$0xff] }
  0x29   : > { %1667 = vmatmul.mubr.msk.f32.gmra.mrb[8].mxu1 %vm265_vm3, %v233_v22  ;;  %1621 = vmatprep.mubr.msk.f32.mxu0 %vm265_vm3, %v202_v23  ;;  %v251_v58 = vld [vmem:[%s1951_s30 + $0x1d8] sm:$0xff]  ;;  %v252_v60 = vld [vmem:[%s1951_s30 + $0x1e0] sm:$0xff]  ;;  %v253_v62 = vld [vmem:[%s1951_s30 + $0x1e8] sm:$0xff] }
  0x2a   : > { %1669 = vmatprep.mubr.msk.f32.mxu1 %vm265_vm3, %v234_v24  ;;  %v222_v63 = vld [vmem:[%s1951_s30 + $0xf0] sm:$0xff]  ;;  %v223_v1 = vld [vmem:[%s1951_s30 + $0xf8] sm:$0xff]  ;;  %v2085_v3 = vld [vmem:[%s2489_s2] ss:$0 sm:$0xff] }
  0x2b   : > { %v254_v0 = vld [vmem:[%s1951_s30 + $0x1f0] sm:$0xff]  ;;  %v255_v2 = vld [vmem:[%s1951_s30 + $0x1f8] sm:$0xff] }
  0x2c   : > { %1622 = vmatmul.mubr.msk.f32.gmra.mrb[10].mxu0 %vm265_vm3, %v203_v25 }
  0x2d   : > { %1670 = vmatmul.mubr.msk.f32.gmra.mrb[10].mxu1 %vm265_vm3, %v235_v26  ;;  %1624 = vmatprep.mubr.msk.f32.mxu0 %vm265_vm3, %v204_v27 }
  0x2e   : > { %1672 = vmatprep.mubr.msk.f32.mxu1 %vm265_vm3, %v236_v28 }
  0x30   : > { %1625 = vmatmul.mubr.msk.f32.gmra.mrb[12].mxu0 %vm265_vm3, %v205_v29 }
  0x31   : > { %1673 = vmatmul.mubr.msk.f32.gmra.mrb[12].mxu1 %vm265_vm3, %v237_v30  ;;  %1627 = vmatprep.mubr.msk.f32.mxu0 %vm265_vm3, %v206_v31 }
  0x32   : > { %1675 = vmatprep.mubr.msk.f32.mxu1 %vm265_vm3, %v238_v32 }
  0x34   : > { %1628 = vmatmul.mubr.msk.f32.gmra.mrb[14].mxu0 %vm265_vm3, %v207_v33 }
  0x35   : > { %1676 = vmatmul.mubr.msk.f32.gmra.mrb[14].mxu1 %vm265_vm3, %v239_v34  ;;  %1630 = vmatprep.mubr.msk.f32.mxu0 %vm265_vm3, %v208_v35 }
  0x36   : > { %1678 = vmatprep.mubr.msk.f32.mxu1 %vm265_vm3, %v240_v36 }
  0x38   : > { %1631 = vmatmul.mubr.msk.f32.gmra.mrb[16].mxu0 %vm265_vm3, %v209_v37 }
  0x39   : > { %1679 = vmatmul.mubr.msk.f32.gmra.mrb[16].mxu1 %vm265_vm3, %v241_v38  ;;  %1633 = vmatprep.mubr.msk.f32.mxu0 %vm265_vm3, %v210_v39 }
  0x3a   : > { %1681 = vmatprep.mubr.msk.f32.mxu1 %vm265_vm3, %v242_v40 }
  0x3c   : > { %1634 = vmatmul.mubr.msk.f32.gmra.mrb[18].mxu0 %vm265_vm3, %v211_v41 }
  0x3d   : > { %1682 = vmatmul.mubr.msk.f32.gmra.mrb[18].mxu1 %vm265_vm3, %v243_v42  ;;  %1636 = vmatprep.mubr.msk.f32.mxu0 %vm265_vm3, %v212_v43 }
  0x3e   : > { %1684 = vmatprep.mubr.msk.f32.mxu1 %vm265_vm3, %v244_v44 }
  0x40   : > { %1637 = vmatmul.mubr.msk.f32.gmra.mrb[20].mxu0 %vm265_vm3, %v213_v45 }
  0x41   : > { %1685 = vmatmul.mubr.msk.f32.gmra.mrb[20].mxu1 %vm265_vm3, %v245_v46  ;;  %1639 = vmatprep.mubr.msk.f32.mxu0 %vm265_vm3, %v214_v47 }
  0x42   : > { %1687 = vmatprep.mubr.msk.f32.mxu1 %vm265_vm3, %v246_v48 }
  0x44   : > { %1640 = vmatmul.mubr.msk.f32.gmra.mrb[22].mxu0 %vm265_vm3, %v215_v49 }
  0x45   : > { %1688 = vmatmul.mubr.msk.f32.gmra.mrb[22].mxu1 %vm265_vm3, %v247_v50  ;;  %1642 = vmatprep.mubr.msk.f32.mxu0 %vm265_vm3, %v216_v51 }
  0x46   : > { %1690 = vmatprep.mubr.msk.f32.mxu1 %vm265_vm3, %v248_v52 }
  0x48   : > { %1643 = vmatmul.mubr.msk.f32.gmra.mrb[24].mxu0 %vm265_vm3, %v217_v53 }
  0x49   : > { %1691 = vmatmul.mubr.msk.f32.gmra.mrb[24].mxu1 %vm265_vm3, %v249_v54  ;;  %1645 = vmatprep.mubr.msk.f32.mxu0 %vm265_vm3, %v218_v55 }
  0x4a   : > { %1693 = vmatprep.mubr.msk.f32.mxu1 %vm265_vm3, %v250_v56 }
  0x4c   : > { %1646 = vmatmul.mubr.msk.f32.gmra.mrb[26].mxu0 %vm265_vm3, %v219_v57 }
  0x4d   : > { %1694 = vmatmul.mubr.msk.f32.gmra.mrb[26].mxu1 %vm265_vm3, %v251_v58  ;;  %1648 = vmatprep.mubr.msk.f32.mxu0 %vm265_vm3, %v220_v59 }
  0x4e   : > { %1696 = vmatprep.mubr.msk.f32.mxu1 %vm265_vm3, %v252_v60 }
  0x50   : > { %1649 = vmatmul.mubr.msk.f32.gmra.mrb[28].mxu0 %vm265_vm3, %v221_v61 }
  0x51   : > { %1697 = vmatmul.mubr.msk.f32.gmra.mrb[28].mxu1 %vm265_vm3, %v253_v62  ;;  %1651 = vmatprep.mubr.msk.f32.mxu0 %vm265_vm3, %v222_v63 }
  0x52   : > { %1699 = vmatprep.mubr.msk.f32.mxu1 %vm265_vm3, %v254_v0 }
  0x54   : > { %1652 = vmatmul.mubr.msk.f32.gmra.mrb[30].mxu0 %vm265_vm3, %v223_v1 }
  0x55   : > { %1700 = vmatmul.mubr.msk.f32.gmra.mrb[30].mxu1 %vm265_vm3, %v255_v2 }
  0xeb   : > { %v1608_v4 = vpop.f32.mrb[0].mxu0 }
  0xec   : > { %v1656_v5 = vpop.f32.mrb[0].mxu1  ;;  %v534_v6 = vadd.f32 %v1608_v4, %v2085_v3  ;;  %v528_v8 = vpop.f32.mrb[1].mxu0 }
  0xed   : > { %v694_v7 = vadd.f32 %v1656_v5, %v2085_v3  ;;  %v688_v9 = vpop.f32.mrb[1].mxu1  ;;  %v529_v10 = vadd.f32 %v2085_v3, %v528_v8 }
  0xee   : > { %v689_v11 = vadd.f32 %v2085_v3, %v688_v9  ;;  %v848_v12 = vmax.f32 %v534_v6, 0.0 }
  0xef   : > { %v880_v13 = vmax.f32 %v694_v7, 0.0  ;;  %v847_v14 = vmax.f32 %v529_v10, 0.0  ;;  %v1611_v16 = vpop.f32.mrb[2].mxu0 }
  0xf0   : > { %v879_v15 = vmax.f32 %v689_v11, 0.0  ;;  %v1659_v17 = vpop.f32.mrb[2].mxu1  ;;  %913 = vst.msk [vmem:[%s2091_s8 + $0x8] sm:$0xff] %vm911_vm4, %v848_v12  ;;  %v544_v18 = vadd.f32 %v1611_v16, %v2085_v3  ;;  %v538_v20 = vpop.f32.mrb[3].mxu0 }
  0xf1   : > { %945 = vst.msk [vmem:[%s2091_s8 + $0x108] sm:$0xff] %vm911_vm4, %v880_v13  ;;  %v704_v19 = vadd.f32 %v1659_v17, %v2085_v3  ;;  %v698_v21 = vpop.f32.mrb[3].mxu1  ;;  %912 = vst.msk [vmem:[%s2091_s8] sm:$0xff] %vm911_vm4, %v847_v14  ;;  %v539_v22 = vadd.f32 %v2085_v3, %v538_v20 }
  0xf2   : > { %944 = vst.msk [vmem:[%s2091_s8 + $0x100] sm:$0xff] %vm911_vm4, %v879_v15  ;;  %v699_v23 = vadd.f32 %v2085_v3, %v698_v21  ;;  %v850_v24 = vmax.f32 %v544_v18, 0.0 }
  0xf3   : > { %v882_v25 = vmax.f32 %v704_v19, 0.0  ;;  %v849_v26 = vmax.f32 %v539_v22, 0.0  ;;  %v1614_v28 = vpop.f32.mrb[4].mxu0 }
  0xf4   : > { %v881_v27 = vmax.f32 %v699_v23, 0.0  ;;  %v1662_v29 = vpop.f32.mrb[4].mxu1  ;;  %915 = vst.msk [vmem:[%s2091_s8 + $0x18] sm:$0xff] %vm911_vm4, %v850_v24  ;;  %v554_v30 = vadd.f32 %v1614_v28, %v2085_v3  ;;  %v548_v32 = vpop.f32.mrb[5].mxu0 }
  0xf5   : > { %947 = vst.msk [vmem:[%s2091_s8 + $0x118] sm:$0xff] %vm911_vm4, %v882_v25  ;;  %v714_v31 = vadd.f32 %v1662_v29, %v2085_v3  ;;  %v708_v33 = vpop.f32.mrb[5].mxu1  ;;  %914 = vst.msk [vmem:[%s2091_s8 + $0x10] sm:$0xff] %vm911_vm4, %v849_v26  ;;  %v549_v34 = vadd.f32 %v2085_v3, %v548_v32 }
  0xf6   : > { %946 = vst.msk [vmem:[%s2091_s8 + $0x110] sm:$0xff] %vm911_vm4, %v881_v27  ;;  %v709_v35 = vadd.f32 %v2085_v3, %v708_v33  ;;  %v852_v36 = vmax.f32 %v554_v30, 0.0 }
  0xf7   : > { %v884_v37 = vmax.f32 %v714_v31, 0.0  ;;  %v851_v38 = vmax.f32 %v549_v34, 0.0  ;;  %v1617_v40 = vpop.f32.mrb[6].mxu0 }
  0xf8   : > { %v883_v39 = vmax.f32 %v709_v35, 0.0  ;;  %v1665_v41 = vpop.f32.mrb[6].mxu1  ;;  %917 = vst.msk [vmem:[%s2091_s8 + $0x28] sm:$0xff] %vm911_vm4, %v852_v36  ;;  %v564_v42 = vadd.f32 %v1617_v40, %v2085_v3  ;;  %v558_v44 = vpop.f32.mrb[7].mxu0 }
  0xf9   : > { %949 = vst.msk [vmem:[%s2091_s8 + $0x128] sm:$0xff] %vm911_vm4, %v884_v37  ;;  %v724_v43 = vadd.f32 %v1665_v41, %v2085_v3  ;;  %v718_v45 = vpop.f32.mrb[7].mxu1  ;;  %916 = vst.msk [vmem:[%s2091_s8 + $0x20] sm:$0xff] %vm911_vm4, %v851_v38  ;;  %v559_v46 = vadd.f32 %v2085_v3, %v558_v44 }
  0xfa   : > { %948 = vst.msk [vmem:[%s2091_s8 + $0x120] sm:$0xff] %vm911_vm4, %v883_v39  ;;  %v719_v47 = vadd.f32 %v2085_v3, %v718_v45  ;;  %v854_v48 = vmax.f32 %v564_v42, 0.0 }
  0xfb   : > { %v886_v49 = vmax.f32 %v724_v43, 0.0  ;;  %v853_v50 = vmax.f32 %v559_v46, 0.0  ;;  %v1620_v52 = vpop.f32.mrb[8].mxu0 }
  0xfc   : > { %v885_v51 = vmax.f32 %v719_v47, 0.0  ;;  %v1668_v53 = vpop.f32.mrb[8].mxu1  ;;  %919 = vst.msk [vmem:[%s2091_s8 + $0x38] sm:$0xff] %vm911_vm4, %v854_v48  ;;  %v574_v54 = vadd.f32 %v1620_v52, %v2085_v3  ;;  %v568_v56 = vpop.f32.mrb[9].mxu0 }
  0xfd   : > { %951 = vst.msk [vmem:[%s2091_s8 + $0x138] sm:$0xff] %vm911_vm4, %v886_v49  ;;  %v734_v55 = vadd.f32 %v1668_v53, %v2085_v3  ;;  %v728_v57 = vpop.f32.mrb[9].mxu1  ;;  %918 = vst.msk [vmem:[%s2091_s8 + $0x30] sm:$0xff] %vm911_vm4, %v853_v50  ;;  %v569_v58 = vadd.f32 %v2085_v3, %v568_v56 }
  0xfe   : > { %950 = vst.msk [vmem:[%s2091_s8 + $0x130] sm:$0xff] %vm911_vm4, %v885_v51  ;;  %v729_v59 = vadd.f32 %v2085_v3, %v728_v57  ;;  %v856_v60 = vmax.f32 %v574_v54, 0.0 }
  0xff   : > { %v888_v61 = vmax.f32 %v734_v55, 0.0  ;;  %v855_v62 = vmax.f32 %v569_v58, 0.0  ;;  %v1623_v0 = vpop.f32.mrb[10].mxu0 }
 0x100   : > { %v887_v63 = vmax.f32 %v729_v59, 0.0  ;;  %v1671_v1 = vpop.f32.mrb[10].mxu1  ;;  %921 = vst.msk [vmem:[%s2091_s8 + $0x48] sm:$0xff] %vm911_vm4, %v856_v60  ;;  %v584_v2 = vadd.f32 %v1623_v0, %v2085_v3  ;;  %v578_v5 = vpop.f32.mrb[11].mxu0 }
 0x101   : > { %953 = vst.msk [vmem:[%s2091_s8 + $0x148] sm:$0xff] %vm911_vm4, %v888_v61  ;;  %v744_v4 = vadd.f32 %v1671_v1, %v2085_v3  ;;  %v738_v6 = vpop.f32.mrb[11].mxu1  ;;  %920 = vst.msk [vmem:[%s2091_s8 + $0x40] sm:$0xff] %vm911_vm4, %v855_v62  ;;  %v579_v7 = vadd.f32 %v2085_v3, %v578_v5 }
 0x102   : > { %952 = vst.msk [vmem:[%s2091_s8 + $0x140] sm:$0xff] %vm911_vm4, %v887_v63  ;;  %v739_v8 = vadd.f32 %v2085_v3, %v738_v6  ;;  %v858_v9 = vmax.f32 %v584_v2, 0.0 }
 0x103   : > { %v890_v10 = vmax.f32 %v744_v4, 0.0  ;;  %v857_v11 = vmax.f32 %v579_v7, 0.0  ;;  %v1626_v13 = vpop.f32.mrb[12].mxu0 }
 0x104   : > { %v889_v12 = vmax.f32 %v739_v8, 0.0  ;;  %v1674_v14 = vpop.f32.mrb[12].mxu1  ;;  %923 = vst.msk [vmem:[%s2091_s8 + $0x58] sm:$0xff] %vm911_vm4, %v858_v9  ;;  %v594_v15 = vadd.f32 %v1626_v13, %v2085_v3  ;;  %v588_v17 = vpop.f32.mrb[13].mxu0 }
 0x105   : > { %955 = vst.msk [vmem:[%s2091_s8 + $0x158] sm:$0xff] %vm911_vm4, %v890_v10  ;;  %v754_v16 = vadd.f32 %v1674_v14, %v2085_v3  ;;  %v748_v18 = vpop.f32.mrb[13].mxu1  ;;  %922 = vst.msk [vmem:[%s2091_s8 + $0x50] sm:$0xff] %vm911_vm4, %v857_v11  ;;  %v589_v19 = vadd.f32 %v2085_v3, %v588_v17 }
 0x106   : > { %954 = vst.msk [vmem:[%s2091_s8 + $0x150] sm:$0xff] %vm911_vm4, %v889_v12  ;;  %v749_v20 = vadd.f32 %v2085_v3, %v748_v18  ;;  %v860_v21 = vmax.f32 %v594_v15, 0.0 }
 0x107   : > { %v892_v22 = vmax.f32 %v754_v16, 0.0  ;;  %v859_v23 = vmax.f32 %v589_v19, 0.0  ;;  %v1629_v25 = vpop.f32.mrb[14].mxu0 }
 0x108   : > { %v891_v24 = vmax.f32 %v749_v20, 0.0  ;;  %v1677_v26 = vpop.f32.mrb[14].mxu1  ;;  %925 = vst.msk [vmem:[%s2091_s8 + $0x68] sm:$0xff] %vm911_vm4, %v860_v21  ;;  %v604_v27 = vadd.f32 %v1629_v25, %v2085_v3  ;;  %v598_v29 = vpop.f32.mrb[15].mxu0 }
 0x109   : > { %957 = vst.msk [vmem:[%s2091_s8 + $0x168] sm:$0xff] %vm911_vm4, %v892_v22  ;;  %v764_v28 = vadd.f32 %v1677_v26, %v2085_v3  ;;  %v758_v30 = vpop.f32.mrb[15].mxu1  ;;  %924 = vst.msk [vmem:[%s2091_s8 + $0x60] sm:$0xff] %vm911_vm4, %v859_v23  ;;  %v599_v31 = vadd.f32 %v2085_v3, %v598_v29 }
 0x10a   : > { %956 = vst.msk [vmem:[%s2091_s8 + $0x160] sm:$0xff] %vm911_vm4, %v891_v24  ;;  %v759_v32 = vadd.f32 %v2085_v3, %v758_v30  ;;  %v862_v33 = vmax.f32 %v604_v27, 0.0 }
 0x10b   : > { %v894_v34 = vmax.f32 %v764_v28, 0.0  ;;  %v861_v35 = vmax.f32 %v599_v31, 0.0  ;;  %v1632_v37 = vpop.f32.mrb[16].mxu0 }
 0x10c   : > { %v893_v36 = vmax.f32 %v759_v32, 0.0  ;;  %v1680_v38 = vpop.f32.mrb[16].mxu1  ;;  %927 = vst.msk [vmem:[%s2091_s8 + $0x78] sm:$0xff] %vm911_vm4, %v862_v33  ;;  %v614_v39 = vadd.f32 %v1632_v37, %v2085_v3  ;;  %v608_v41 = vpop.f32.mrb[17].mxu0 }
 0x10d   : > { %959 = vst.msk [vmem:[%s2091_s8 + $0x178] sm:$0xff] %vm911_vm4, %v894_v34  ;;  %v774_v40 = vadd.f32 %v1680_v38, %v2085_v3  ;;  %v768_v42 = vpop.f32.mrb[17].mxu1  ;;  %926 = vst.msk [vmem:[%s2091_s8 + $0x70] sm:$0xff] %vm911_vm4, %v861_v35  ;;  %v609_v43 = vadd.f32 %v2085_v3, %v608_v41 }
 0x10e   : > { %958 = vst.msk [vmem:[%s2091_s8 + $0x170] sm:$0xff] %vm911_vm4, %v893_v36  ;;  %v769_v44 = vadd.f32 %v2085_v3, %v768_v42  ;;  %v864_v45 = vmax.f32 %v614_v39, 0.0 }
 0x10f   : > { %v896_v46 = vmax.f32 %v774_v40, 0.0  ;;  %v863_v47 = vmax.f32 %v609_v43, 0.0  ;;  %v1635_v49 = vpop.f32.mrb[18].mxu0 }
 0x110   : > { %v895_v48 = vmax.f32 %v769_v44, 0.0  ;;  %v1683_v50 = vpop.f32.mrb[18].mxu1  ;;  %929 = vst.msk [vmem:[%s2091_s8 + $0x88] sm:$0xff] %vm911_vm4, %v864_v45  ;;  %v624_v51 = vadd.f32 %v1635_v49, %v2085_v3  ;;  %v618_v53 = vpop.f32.mrb[19].mxu0 }
 0x111   : > { %961 = vst.msk [vmem:[%s2091_s8 + $0x188] sm:$0xff] %vm911_vm4, %v896_v46  ;;  %v784_v52 = vadd.f32 %v1683_v50, %v2085_v3  ;;  %v778_v54 = vpop.f32.mrb[19].mxu1  ;;  %928 = vst.msk [vmem:[%s2091_s8 + $0x80] sm:$0xff] %vm911_vm4, %v863_v47  ;;  %v619_v55 = vadd.f32 %v2085_v3, %v618_v53 }
 0x112   : > { %960 = vst.msk [vmem:[%s2091_s8 + $0x180] sm:$0xff] %vm911_vm4, %v895_v48  ;;  %v779_v56 = vadd.f32 %v2085_v3, %v778_v54  ;;  %v866_v57 = vmax.f32 %v624_v51, 0.0 }
 0x113   : > { %v898_v58 = vmax.f32 %v784_v52, 0.0  ;;  %v865_v59 = vmax.f32 %v619_v55, 0.0  ;;  %v1638_v61 = vpop.f32.mrb[20].mxu0 }
 0x114   : > { %v897_v60 = vmax.f32 %v779_v56, 0.0  ;;  %v1686_v62 = vpop.f32.mrb[20].mxu1  ;;  %931 = vst.msk [vmem:[%s2091_s8 + $0x98] sm:$0xff] %vm911_vm4, %v866_v57  ;;  %v634_v63 = vadd.f32 %v1638_v61, %v2085_v3  ;;  %v628_v1 = vpop.f32.mrb[21].mxu0 }
 0x115   : > { %963 = vst.msk [vmem:[%s2091_s8 + $0x198] sm:$0xff] %vm911_vm4, %v898_v58  ;;  %v794_v0 = vadd.f32 %v1686_v62, %v2085_v3  ;;  %v788_v2 = vpop.f32.mrb[21].mxu1  ;;  %930 = vst.msk [vmem:[%s2091_s8 + $0x90] sm:$0xff] %vm911_vm4, %v865_v59  ;;  %v629_v4 = vadd.f32 %v2085_v3, %v628_v1 }
 0x116   : > { %962 = vst.msk [vmem:[%s2091_s8 + $0x190] sm:$0xff] %vm911_vm4, %v897_v60  ;;  %v789_v5 = vadd.f32 %v2085_v3, %v788_v2  ;;  %v868_v6 = vmax.f32 %v634_v63, 0.0 }
 0x117   : > { %v900_v7 = vmax.f32 %v794_v0, 0.0  ;;  %v867_v8 = vmax.f32 %v629_v4, 0.0  ;;  %v1641_v10 = vpop.f32.mrb[22].mxu0 }
 0x118   : > { %v899_v9 = vmax.f32 %v789_v5, 0.0  ;;  %v1689_v11 = vpop.f32.mrb[22].mxu1  ;;  %933 = vst.msk [vmem:[%s2091_s8 + $0xa8] sm:$0xff] %vm911_vm4, %v868_v6  ;;  %v644_v12 = vadd.f32 %v1641_v10, %v2085_v3  ;;  %v638_v14 = vpop.f32.mrb[23].mxu0 }
 0x119   : > { %965 = vst.msk [vmem:[%s2091_s8 + $0x1a8] sm:$0xff] %vm911_vm4, %v900_v7  ;;  %v804_v13 = vadd.f32 %v1689_v11, %v2085_v3  ;;  %v798_v15 = vpop.f32.mrb[23].mxu1  ;;  %932 = vst.msk [vmem:[%s2091_s8 + $0xa0] sm:$0xff] %vm911_vm4, %v867_v8  ;;  %v639_v16 = vadd.f32 %v2085_v3, %v638_v14 }
 0x11a   : > { %964 = vst.msk [vmem:[%s2091_s8 + $0x1a0] sm:$0xff] %vm911_vm4, %v899_v9  ;;  %v799_v17 = vadd.f32 %v2085_v3, %v798_v15  ;;  %v870_v18 = vmax.f32 %v644_v12, 0.0 }
 0x11b   : > { %v902_v19 = vmax.f32 %v804_v13, 0.0  ;;  %v869_v20 = vmax.f32 %v639_v16, 0.0  ;;  %v1644_v22 = vpop.f32.mrb[24].mxu0 }
 0x11c   : > { %v901_v21 = vmax.f32 %v799_v17, 0.0  ;;  %v1692_v23 = vpop.f32.mrb[24].mxu1  ;;  %935 = vst.msk [vmem:[%s2091_s8 + $0xb8] sm:$0xff] %vm911_vm4, %v870_v18  ;;  %v654_v24 = vadd.f32 %v1644_v22, %v2085_v3  ;;  %v648_v26 = vpop.f32.mrb[25].mxu0 }
 0x11d   : > { %967 = vst.msk [vmem:[%s2091_s8 + $0x1b8] sm:$0xff] %vm911_vm4, %v902_v19  ;;  %v814_v25 = vadd.f32 %v1692_v23, %v2085_v3  ;;  %v808_v27 = vpop.f32.mrb[25].mxu1  ;;  %934 = vst.msk [vmem:[%s2091_s8 + $0xb0] sm:$0xff] %vm911_vm4, %v869_v20  ;;  %v649_v28 = vadd.f32 %v2085_v3, %v648_v26 }
 0x11e   : > { %966 = vst.msk [vmem:[%s2091_s8 + $0x1b0] sm:$0xff] %vm911_vm4, %v901_v21  ;;  %v809_v29 = vadd.f32 %v2085_v3, %v808_v27  ;;  %v872_v30 = vmax.f32 %v654_v24, 0.0 }
 0x11f   : > { %v904_v31 = vmax.f32 %v814_v25, 0.0  ;;  %v871_v32 = vmax.f32 %v649_v28, 0.0  ;;  %v1647_v34 = vpop.f32.mrb[26].mxu0 }
 0x120   : > { %v903_v33 = vmax.f32 %v809_v29, 0.0  ;;  %v1695_v35 = vpop.f32.mrb[26].mxu1  ;;  %937 = vst.msk [vmem:[%s2091_s8 + $0xc8] sm:$0xff] %vm911_vm4, %v872_v30  ;;  %v664_v36 = vadd.f32 %v1647_v34, %v2085_v3  ;;  %v658_v38 = vpop.f32.mrb[27].mxu0 }
 0x121   : > { %969 = vst.msk [vmem:[%s2091_s8 + $0x1c8] sm:$0xff] %vm911_vm4, %v904_v31  ;;  %v824_v37 = vadd.f32 %v1695_v35, %v2085_v3  ;;  %v818_v39 = vpop.f32.mrb[27].mxu1  ;;  %936 = vst.msk [vmem:[%s2091_s8 + $0xc0] sm:$0xff] %vm911_vm4, %v871_v32  ;;  %v659_v40 = vadd.f32 %v2085_v3, %v658_v38 }
 0x122   : > { %968 = vst.msk [vmem:[%s2091_s8 + $0x1c0] sm:$0xff] %vm911_vm4, %v903_v33  ;;  %v819_v41 = vadd.f32 %v2085_v3, %v818_v39  ;;  %v874_v42 = vmax.f32 %v664_v36, 0.0 }
 0x123   : > { %v906_v43 = vmax.f32 %v824_v37, 0.0  ;;  %v873_v44 = vmax.f32 %v659_v40, 0.0  ;;  %v1650_v46 = vpop.f32.mrb[28].mxu0 }
 0x124   : > { %v905_v45 = vmax.f32 %v819_v41, 0.0  ;;  %v1698_v47 = vpop.f32.mrb[28].mxu1  ;;  %939 = vst.msk [vmem:[%s2091_s8 + $0xd8] sm:$0xff] %vm911_vm4, %v874_v42  ;;  %v674_v48 = vadd.f32 %v1650_v46, %v2085_v3  ;;  %v668_v50 = vpop.f32.mrb[29].mxu0 }
 0x125   : > { %971 = vst.msk [vmem:[%s2091_s8 + $0x1d8] sm:$0xff] %vm911_vm4, %v906_v43  ;;  %v834_v49 = vadd.f32 %v1698_v47, %v2085_v3  ;;  %v828_v51 = vpop.f32.mrb[29].mxu1  ;;  %938 = vst.msk [vmem:[%s2091_s8 + $0xd0] sm:$0xff] %vm911_vm4, %v873_v44  ;;  %v669_v52 = vadd.f32 %v2085_v3, %v668_v50 }
 0x126   : > { %970 = vst.msk [vmem:[%s2091_s8 + $0x1d0] sm:$0xff] %vm911_vm4, %v905_v45  ;;  %v829_v53 = vadd.f32 %v2085_v3, %v828_v51  ;;  %v876_v54 = vmax.f32 %v674_v48, 0.0 }
 0x127   : > { %v908_v55 = vmax.f32 %v834_v49, 0.0  ;;  %v875_v56 = vmax.f32 %v669_v52, 0.0  ;;  %v1653_v58 = vpop.f32.mrb[30].mxu0 }
 0x128   : > { %v907_v57 = vmax.f32 %v829_v53, 0.0  ;;  %v1701_v59 = vpop.f32.mrb[30].mxu1  ;;  %941 = vst.msk [vmem:[%s2091_s8 + $0xe8] sm:$0xff] %vm911_vm4, %v876_v54  ;;  %v684_v60 = vadd.f32 %v1653_v58, %v2085_v3  ;;  %v678_v62 = vpop.f32.mrb[31].mxu0  ;;  %982 = sbr.rel (!%p1933_p4) target bundleno = 375 (0x177), region = 36 }
 0x129   : > { %973 = vst.msk [vmem:[%s2091_s8 + $0x1e8] sm:$0xff] %vm911_vm4, %v908_v55  ;;  %v844_v61 = vadd.f32 %v1701_v59, %v2085_v3  ;;  %v838_v63 = vpop.f32.mrb[31].mxu1  ;;  %940 = vst.msk [vmem:[%s2091_s8 + $0xe0] sm:$0xff] %vm911_vm4, %v875_v56  ;;  %v679_v0 = vadd.f32 %v2085_v3, %v678_v62 }
 0x12a   : > { %972 = vst.msk [vmem:[%s2091_s8 + $0x1e0] sm:$0xff] %vm911_vm4, %v907_v57  ;;  %v839_v1 = vadd.f32 %v2085_v3, %v838_v63  ;;  %v878_v2 = vmax.f32 %v684_v60, 0.0 }
 0x12b   : > { %v910_v4 = vmax.f32 %v844_v61, 0.0  ;;  %v877_v5 = vmax.f32 %v679_v0, 0.0 }
 0x12c   : > { %v909_v6 = vmax.f32 %v839_v1, 0.0  ;;  %943 = vst.msk [vmem:[%s2091_s8 + $0xf8] sm:$0xff] %vm911_vm4, %v878_v2 }
 0x12d   : > { %975 = vst.msk [vmem:[%s2091_s8 + $0x1f8] sm:$0xff] %vm911_vm4, %v910_v4  ;;  %942 = vst.msk [vmem:[%s2091_s8 + $0xf0] sm:$0xff] %vm911_vm4, %v877_v5 }
 0x12e   : > { %974 = vst.msk [vmem:[%s2091_s8 + $0x1f0] sm:$0xff] %vm911_vm4, %v909_v6 }
 0x12f   : > { %s2501_s9 = smov (!%p985_p8, %s984_s9), 64 }
 0x130   : > { %s1518_s17 = sshll.u32 %s2501_s9, 7 }
 0x131   : > { %p1521_p9 = scmp.eq.s32.totalorder %s1518_s17, 0 }
 0x132   : > { %s2294_s18 = sshrl.u32 (!%p1521_p9), %s2501_s9, 6 }
 0x133   : > { %993 = sbr.rel (%p1521_p9) target bundleno = 375 (0x177), region = 40  ;;  %p1522_p10 = scmp.le.s32.totalorder (!%p1521_p9), %s2294_s18, 0 }
 0x13a   : > { %1399 = sbr.rel (%p1522_p10) target bundleno = 354 (0x162), region = 116  ;;  %s2492_s15 = smov (!%p1522_p10), %s2288_s14 }
 0x13b   : > { %s2493_s20 = smov (!%p1522_p10), %s2091_s8  ;;  %s2303_s21 = smov (!%p1522_p10), 0  }
 0x13c   : > { %s2305_s22 = smov (!%p1522_p10), 0  }
 0x141 LB: >> { %v1181_v3 = vld [vmem:[%s1861_s20] sm:$0xff]  ;;  %v1183_v7 = vld [vmem:[%s1861_s20 + $0x8] sm:$0xff]  ;;  %v1185_v8 = vld [vmem:[%s1861_s20 + $0x10] sm:$0xff]  ;;  %s1309_s23 = sadd.s32 1, %s1865_s21  ;;  %s1175_s22 = sadd.s32 1, %s1869_s22   ;;  %s1869_s22 = sphi %s2305_s22, %s1175_s22   ;;  %s1865_s21 = sphi %s2303_s21, %s2496_s21   ;;  %s1861_s20 = sphi %s2493_s20, %s2495_s20   ;;  %s1857_s15 = sphi %s2492_s15, %s2494_s15  }
 0x142   : >> { %1182 = vst [vmem:[%s1857_s15] sm:$0xff] %v1181_v3  ;;  %1184 = vst [vmem:[%s1857_s15 + $0x8] sm:$0xff] %v1183_v7  ;;  %v1187_v9 = vld [vmem:[%s1861_s20 + $0x18] sm:$0xff]  ;;  %v1189_v10 = vld [vmem:[%s1861_s20 + $0x20] sm:$0xff]  ;;  %p1310_p11 = scmp.ge.s32.totalorder %s1309_s23, %s2294_s18  ;;  %p1174_p12 = scmp.ge.s32.totalorder %s1175_s22, %s2294_s18 }
 0x143   : >> { %1186 = vst [vmem:[%s1857_s15 + $0x10] sm:$0xff] %v1185_v8  ;;  %v1191_v11 = vld [vmem:[%s1861_s20 + $0x28] sm:$0xff]  ;;  %1188 = vst [vmem:[%s1857_s15 + $0x18] sm:$0xff] %v1187_v9  ;;  %v1193_v12 = vld [vmem:[%s1861_s20 + $0x30] sm:$0xff] }
 0x144   : >> { %1190 = vst [vmem:[%s1857_s15 + $0x20] sm:$0xff] %v1189_v10  ;;  %1192 = vst [vmem:[%s1857_s15 + $0x28] sm:$0xff] %v1191_v11  ;;  %v1195_v13 = vld [vmem:[%s1861_s20 + $0x38] sm:$0xff]  ;;  %v1197_v14 = vld [vmem:[%s1861_s20 + $0x40] sm:$0xff]  ;;  %s2503_s23 = smov (%p1310_p11, %s1309_s23), 0 }
 0x145   : >> { %1194 = vst [vmem:[%s1857_s15 + $0x30] sm:$0xff] %v1193_v12  ;;  %1196 = vst [vmem:[%s1857_s15 + $0x38] sm:$0xff] %v1195_v13  ;;  %v1199_v15 = vld [vmem:[%s1861_s20 + $0x48] sm:$0xff]  ;;  %v1201_v16 = vld [vmem:[%s1861_s20 + $0x50] sm:$0xff]  ;;  %s1523_s24 = sshll.u32 %s2503_s23, 9  ;;  %s2496_s21 = smov %s2503_s23 }
 0x146   : >> { %1198 = vst [vmem:[%s1857_s15 + $0x40] sm:$0xff] %v1197_v14  ;;  %v1203_v17 = vld [vmem:[%s1861_s20 + $0x58] sm:$0xff]  ;;  %1200 = vst [vmem:[%s1857_s15 + $0x48] sm:$0xff] %v1199_v15  ;;  %v1205_v18 = vld [vmem:[%s1861_s20 + $0x60] sm:$0xff]  ;;  %s2361_s25 = scalar_lea.vmem %s2091_s8, %s1523_s24 [#allocation2]   ;;  %s2364_s26 = scalar_lea.vmem %s2288_s14, %s1523_s24  }
 0x147   : >> { %1202 = vst [vmem:[%s1857_s15 + $0x50] sm:$0xff] %v1201_v16  ;;  %1204 = vst [vmem:[%s1857_s15 + $0x58] sm:$0xff] %v1203_v17  ;;  %v1207_v19 = vld [vmem:[%s1861_s20 + $0x68] sm:$0xff]  ;;  %v1209_v20 = vld [vmem:[%s1861_s20 + $0x70] sm:$0xff] }
 0x148   : >> { %1206 = vst [vmem:[%s1857_s15 + $0x60] sm:$0xff] %v1205_v18  ;;  %1208 = vst [vmem:[%s1857_s15 + $0x68] sm:$0xff] %v1207_v19  ;;  %v1211_v21 = vld [vmem:[%s1861_s20 + $0x78] sm:$0xff]  ;;  %v1213_v22 = vld [vmem:[%s1861_s20 + $0x80] sm:$0xff] }
 0x149   : >> { %1210 = vst [vmem:[%s1857_s15 + $0x70] sm:$0xff] %v1209_v20  ;;  %v1215_v23 = vld [vmem:[%s1861_s20 + $0x88] sm:$0xff]  ;;  %1212 = vst [vmem:[%s1857_s15 + $0x78] sm:$0xff] %v1211_v21  ;;  %v1217_v24 = vld [vmem:[%s1861_s20 + $0x90] sm:$0xff] }
 0x14a   : >> { %1214 = vst [vmem:[%s1857_s15 + $0x80] sm:$0xff] %v1213_v22  ;;  %1216 = vst [vmem:[%s1857_s15 + $0x88] sm:$0xff] %v1215_v23  ;;  %v1219_v25 = vld [vmem:[%s1861_s20 + $0x98] sm:$0xff]  ;;  %v1221_v26 = vld [vmem:[%s1861_s20 + $0xa0] sm:$0xff] }
 0x14b   : >> { %1218 = vst [vmem:[%s1857_s15 + $0x90] sm:$0xff] %v1217_v24  ;;  %1220 = vst [vmem:[%s1857_s15 + $0x98] sm:$0xff] %v1219_v25  ;;  %v1223_v27 = vld [vmem:[%s1861_s20 + $0xa8] sm:$0xff]  ;;  %v1225_v28 = vld [vmem:[%s1861_s20 + $0xb0] sm:$0xff] }
 0x14c   : >> { %1222 = vst [vmem:[%s1857_s15 + $0xa0] sm:$0xff] %v1221_v26  ;;  %v1227_v29 = vld [vmem:[%s1861_s20 + $0xb8] sm:$0xff]  ;;  %1224 = vst [vmem:[%s1857_s15 + $0xa8] sm:$0xff] %v1223_v27  ;;  %v1229_v30 = vld [vmem:[%s1861_s20 + $0xc0] sm:$0xff] }
 0x14d   : >> { %1226 = vst [vmem:[%s1857_s15 + $0xb0] sm:$0xff] %v1225_v28  ;;  %1228 = vst [vmem:[%s1857_s15 + $0xb8] sm:$0xff] %v1227_v29  ;;  %v1231_v31 = vld [vmem:[%s1861_s20 + $0xc8] sm:$0xff]  ;;  %v1233_v32 = vld [vmem:[%s1861_s20 + $0xd0] sm:$0xff] }
 0x14e   : >> { %1230 = vst [vmem:[%s1857_s15 + $0xc0] sm:$0xff] %v1229_v30  ;;  %1232 = vst [vmem:[%s1857_s15 + $0xc8] sm:$0xff] %v1231_v31  ;;  %v1235_v33 = vld [vmem:[%s1861_s20 + $0xd8] sm:$0xff]  ;;  %v1237_v34 = vld [vmem:[%s1861_s20 + $0xe0] sm:$0xff] }
 0x14f   : >> { %1234 = vst [vmem:[%s1857_s15 + $0xd0] sm:$0xff] %v1233_v32  ;;  %v1239_v35 = vld [vmem:[%s1861_s20 + $0xe8] sm:$0xff]  ;;  %1236 = vst [vmem:[%s1857_s15 + $0xd8] sm:$0xff] %v1235_v33  ;;  %v1241_v36 = vld [vmem:[%s1861_s20 + $0xf0] sm:$0xff] }
 0x150   : >> { %1238 = vst [vmem:[%s1857_s15 + $0xe0] sm:$0xff] %v1237_v34  ;;  %1240 = vst [vmem:[%s1857_s15 + $0xe8] sm:$0xff] %v1239_v35  ;;  %v1243_v37 = vld [vmem:[%s1861_s20 + $0xf8] sm:$0xff]  ;;  %v1245_v38 = vld [vmem:[%s1861_s20 + $0x100] sm:$0xff] }
 0x151   : >> { %1242 = vst [vmem:[%s1857_s15 + $0xf0] sm:$0xff] %v1241_v36  ;;  %1244 = vst [vmem:[%s1857_s15 + $0xf8] sm:$0xff] %v1243_v37  ;;  %v1247_v39 = vld [vmem:[%s1861_s20 + $0x108] sm:$0xff]  ;;  %v1249_v40 = vld [vmem:[%s1861_s20 + $0x110] sm:$0xff] }
 0x152   : >> { %1246 = vst [vmem:[%s1857_s15 + $0x100] sm:$0xff] %v1245_v38  ;;  %v1251_v41 = vld [vmem:[%s1861_s20 + $0x118] sm:$0xff]  ;;  %1248 = vst [vmem:[%s1857_s15 + $0x108] sm:$0xff] %v1247_v39  ;;  %v1253_v42 = vld [vmem:[%s1861_s20 + $0x120] sm:$0xff] }
 0x153   : >> { %1250 = vst [vmem:[%s1857_s15 + $0x110] sm:$0xff] %v1249_v40  ;;  %1252 = vst [vmem:[%s1857_s15 + $0x118] sm:$0xff] %v1251_v41  ;;  %v1255_v43 = vld [vmem:[%s1861_s20 + $0x128] sm:$0xff]  ;;  %v1257_v44 = vld [vmem:[%s1861_s20 + $0x130] sm:$0xff] }
 0x154   : >> { %1254 = vst [vmem:[%s1857_s15 + $0x120] sm:$0xff] %v1253_v42  ;;  %1256 = vst [vmem:[%s1857_s15 + $0x128] sm:$0xff] %v1255_v43  ;;  %v1259_v45 = vld [vmem:[%s1861_s20 + $0x138] sm:$0xff]  ;;  %v1261_v46 = vld [vmem:[%s1861_s20 + $0x140] sm:$0xff] }
 0x155   : >> { %1258 = vst [vmem:[%s1857_s15 + $0x130] sm:$0xff] %v1257_v44  ;;  %v1263_v47 = vld [vmem:[%s1861_s20 + $0x148] sm:$0xff]  ;;  %1260 = vst [vmem:[%s1857_s15 + $0x138] sm:$0xff] %v1259_v45  ;;  %v1265_v48 = vld [vmem:[%s1861_s20 + $0x150] sm:$0xff] }
 0x156   : >> { %1262 = vst [vmem:[%s1857_s15 + $0x140] sm:$0xff] %v1261_v46  ;;  %1264 = vst [vmem:[%s1857_s15 + $0x148] sm:$0xff] %v1263_v47  ;;  %v1267_v49 = vld [vmem:[%s1861_s20 + $0x158] sm:$0xff]  ;;  %v1269_v50 = vld [vmem:[%s1861_s20 + $0x160] sm:$0xff] }
 0x157   : >> { %1266 = vst [vmem:[%s1857_s15 + $0x150] sm:$0xff] %v1265_v48  ;;  %1268 = vst [vmem:[%s1857_s15 + $0x158] sm:$0xff] %v1267_v49  ;;  %v1271_v51 = vld [vmem:[%s1861_s20 + $0x168] sm:$0xff]  ;;  %v1273_v52 = vld [vmem:[%s1861_s20 + $0x170] sm:$0xff] }
 0x158   : >> { %1270 = vst [vmem:[%s1857_s15 + $0x160] sm:$0xff] %v1269_v50  ;;  %v1275_v53 = vld [vmem:[%s1861_s20 + $0x178] sm:$0xff]  ;;  %1272 = vst [vmem:[%s1857_s15 + $0x168] sm:$0xff] %v1271_v51  ;;  %v1277_v54 = vld [vmem:[%s1861_s20 + $0x180] sm:$0xff] }
 0x159   : >> { %1274 = vst [vmem:[%s1857_s15 + $0x170] sm:$0xff] %v1273_v52  ;;  %1276 = vst [vmem:[%s1857_s15 + $0x178] sm:$0xff] %v1275_v53  ;;  %v1279_v55 = vld [vmem:[%s1861_s20 + $0x188] sm:$0xff]  ;;  %v1281_v56 = vld [vmem:[%s1861_s20 + $0x190] sm:$0xff] }
 0x15a   : >> { %1278 = vst [vmem:[%s1857_s15 + $0x180] sm:$0xff] %v1277_v54  ;;  %1280 = vst [vmem:[%s1857_s15 + $0x188] sm:$0xff] %v1279_v55  ;;  %v1283_v57 = vld [vmem:[%s1861_s20 + $0x198] sm:$0xff]  ;;  %v1285_v58 = vld [vmem:[%s1861_s20 + $0x1a0] sm:$0xff] }
 0x15b   : >> { %1282 = vst [vmem:[%s1857_s15 + $0x190] sm:$0xff] %v1281_v56  ;;  %v1287_v59 = vld [vmem:[%s1861_s20 + $0x1a8] sm:$0xff]  ;;  %1284 = vst [vmem:[%s1857_s15 + $0x198] sm:$0xff] %v1283_v57  ;;  %v1289_v60 = vld [vmem:[%s1861_s20 + $0x1b0] sm:$0xff]  ;;  %1177 = sbr.rel (!%p1174_p12) target bundleno = 321 (0x141), region = 122 }
 0x15c   : >> { %1286 = vst [vmem:[%s1857_s15 + $0x1a0] sm:$0xff] %v1285_v58  ;;  %1288 = vst [vmem:[%s1857_s15 + $0x1a8] sm:$0xff] %v1287_v59  ;;  %v1291_v61 = vld [vmem:[%s1861_s20 + $0x1b8] sm:$0xff]  ;;  %v1293_v62 = vld [vmem:[%s1861_s20 + $0x1c0] sm:$0xff] }
 0x15d   : >> { %1290 = vst [vmem:[%s1857_s15 + $0x1b0] sm:$0xff] %v1289_v60  ;;  %1292 = vst [vmem:[%s1857_s15 + $0x1b8] sm:$0xff] %v1291_v61  ;;  %v1295_v63 = vld [vmem:[%s1861_s20 + $0x1c8] sm:$0xff]  ;;  %v1297_v0 = vld [vmem:[%s1861_s20 + $0x1d0] sm:$0xff] }
 0x15e   : >> { %1294 = vst [vmem:[%s1857_s15 + $0x1c0] sm:$0xff] %v1293_v62  ;;  %v1299_v1 = vld [vmem:[%s1861_s20 + $0x1d8] sm:$0xff]  ;;  %1296 = vst [vmem:[%s1857_s15 + $0x1c8] sm:$0xff] %v1295_v63  ;;  %v1301_v2 = vld [vmem:[%s1861_s20 + $0x1e0] sm:$0xff] }
 0x15f   : >> { %1298 = vst [vmem:[%s1857_s15 + $0x1d0] sm:$0xff] %v1297_v0  ;;  %1300 = vst [vmem:[%s1857_s15 + $0x1d8] sm:$0xff] %v1299_v1  ;;  %v1303_v4 = vld [vmem:[%s1861_s20 + $0x1e8] sm:$0xff]  ;;  %v1305_v5 = vld [vmem:[%s1861_s20 + $0x1f0] sm:$0xff] }
 0x160   : >> { %1302 = vst [vmem:[%s1857_s15 + $0x1e0] sm:$0xff] %v1301_v2  ;;  %1304 = vst [vmem:[%s1857_s15 + $0x1e8] sm:$0xff] %v1303_v4  ;;  %v1307_v6 = vld [vmem:[%s1861_s20 + $0x1f8] sm:$0xff]  ;;  %s2495_s20 = smov %s2361_s25 }
 0x161   : >> { %1306 = vst [vmem:[%s1857_s15 + $0x1f0] sm:$0xff] %v1305_v5  ;;  %1308 = vst [vmem:[%s1857_s15 + $0x1f8] sm:$0xff] %v1307_v6  ;;  %s2494_s15 = smov %s2364_s26 }
 0x162 PF: > { %s2469_s27 = sand.u32 63, %s2501_s9   ;;  %s1534_s28 = sshll.u32 %s2294_s18, 9 }
 0x163   : > { %s1320_s29 = scalar_lea.vmem %s2091_s8, %s1534_s28 [#allocation2]   ;;  %s1322_s30 = scalar_lea.vmem %s2288_s14, %s1534_s28  }
 0x164   : > { %p1528_p13 = scmp.le.s32.totalorder %s2469_s27, 0 }
 0x165   : > { %s1871_s4 = smov (!%p1528_p13), %s1322_s30   ;;  %s1875_s5 = smov (!%p1528_p13), %s1320_s29  }
 0x166   : > { %1413 = sbr.rel (%p1528_p13) target bundleno = 375 (0x177), region = 127  ;;  %s1879_s6 = smov (!%p1528_p13), 0  }
 0x167   : > { %s1883_s7 = smov (!%p1528_p13), 0  }
 0x16d LB: >> { %v1332_v3 = vld [vmem:[%s1877_s5] sm:$0xff]  ;;  %s1334_s9 = sadd.s32 1, %s1881_s6  ;;  %s1326_s7 = sadd.s32 1, %s1885_s7   ;;  %s1885_s7 = sphi %s1883_s7, %s1326_s7   ;;  %s1881_s6 = sphi %s1879_s6, %s1880_s6   ;;  %s1877_s5 = sphi %s1875_s5, %s1339_s5   ;;  %s1873_s4 = sphi %s1871_s4, %s1340_s4  }
 0x16e   : >> { %1333 = vst [vmem:[%s1873_s4] sm:$0xff] %v1332_v3  ;;  %p1335_p0 = scmp.ge.s32.totalorder %s1334_s9, %s2469_s27  ;;  %p1325_p1 = scmp.ge.s32.totalorder %s1326_s7, %s2469_s27 }
 0x170   : >> { %s2505_s9 = smov (%p1335_p0, %s1334_s9), 0  ;;  %1328 = sbr.rel (!%p1325_p1) target bundleno = 365 (0x16d), region = 133 }
 0x171   : >> { %s1529_s8 = sshll.u32 %s2505_s9, 3  ;;  %s1880_s6 = smov %s2505_s9  }
 0x172   : >> { %s1339_s5 = scalar_lea.vmem %s1320_s29, %s1529_s8 [#allocation2]   ;;  %s1340_s4 = scalar_lea.vmem %s1322_s30, %s1529_s8  }
 0x177 PF: > { %p10_p2 = scmp.ge.s32.totalorder %s1923_s16, 6   ;;  %s2497_s12 = smov %s1849_s13 }
 0x178   : > { %s2498_s13 = smov %s1931_s19  ;;  %s2499_s14 = smov %s1923_s16 }
 0x179   :  { %12 = sbr.rel (!%p10_p2) target bundleno = 2 (0x2), region = 144 }

// kernel: mnist_cnn_forward.8
= control target key start
LH: loop header
LB: loop body
LE: loop exit
PB: predicated region body
PF: predicated region fallthrough
CT: control target
= control target key end

     0   :  { %s519_s22 = smov 96   ;;  %vm456_vm0 = vcmask 261120   ;;  %vm458_vm1 = vcmask 259072   ;;  %s1370_s0 = inlined_call_operand.vmem [shape: f32[28,2,14,64], index: 0, kind: input, shape index: {}]   ;;  %s1371_s1 = inlined_call_operand.vmem [shape: f32[28,14,32], index: 1, kind: output, shape index: {}]  }
   0x1   :  { %v12_v0 = vld [vmem:[%s1370_s0 + $0x20] sm:$0xff]  ;;  %v14_v1 = vld [vmem:[%s1370_s0 + $0x30] sm:$0xff]  ;;  %v13_v5 = vld [vmem:[%s1370_s0 + $0x28] sm:$0x3f] }
   0x2   :  { %v8_v2 = vld [vmem:[%s1370_s0] sm:$0xff]  ;;  %v539_v3 = vmax.f32 %v12_v0, %v14_v1  ;;  %v10_v4 = vld [vmem:[%s1370_s0 + $0x10] sm:$0xff]  ;;  %v15_v6 = vld [vmem:[%s1370_s0 + $0x38] sm:$0x3f] }
   0x3   :  { %v550_v7 = vmax.f32 %v8_v2, %v10_v4  ;;  %v9_v8 = vld [vmem:[%s1370_s0 + $0x8] sm:$0x3f]  ;;  %v11_v9 = vld [vmem:[%s1370_s0 + $0x18] sm:$0x3f]  ;;  %v560_v10 = vmax.f32 %v13_v5, %v15_v6  ;;  %v16_v14 = vld [vmem:[%s1370_s0 + $0x40] sm:$0xff] }
   0x4   :  { %236 = vrot.lane.b32.xlu1 %v539_v3, %s519_s22  ;;  %v564_v11 = vmax.f32 %v9_v8, %v11_v9  ;;  %v17_v12 = vld [vmem:[%s1370_s0 + $0x48] sm:$0x3f]  ;;  %v19_v13 = vld [vmem:[%s1370_s0 + $0x58] sm:$0x3f]  ;;  %v18_v15 = vld [vmem:[%s1370_s0 + $0x50] sm:$0xff] }
   0x5   :  { %232 = vrot.lane.b32.xlu0 %v550_v7, %s519_s22  ;;  %v580_v16 = vmax.f32 %v17_v12, %v19_v13  ;;  %v584_v17 = vmax.f32 %v16_v14, %v18_v15  ;;  %v21_v18 = vld [vmem:[%s1370_s0 + $0x68] sm:$0x3f]  ;;  %v23_v19 = vld [vmem:[%s1370_s0 + $0x78] sm:$0x3f]  ;;  %v20_v20 = vld [vmem:[%s1370_s0 + $0x60] sm:$0xff] }
   0x6   :  { %v22_v21 = vld [vmem:[%s1370_s0 + $0x70] sm:$0xff]  ;;  %v600_v22 = vmax.f32 %v21_v18, %v23_v19  ;;  %v25_v24 = vld [vmem:[%s1370_s0 + $0x88] sm:$0x3f]  ;;  %v27_v25 = vld [vmem:[%s1370_s0 + $0x98] sm:$0x3f] }
   0x7   :  { %v604_v23 = vmax.f32 %v20_v20, %v22_v21  ;;  %v24_v26 = vld [vmem:[%s1370_s0 + $0x80] sm:$0xff]  ;;  %v26_v27 = vld [vmem:[%s1370_s0 + $0x90] sm:$0xff]  ;;  %v620_v28 = vmax.f32 %v25_v24, %v27_v25  ;;  %v29_v30 = vld [vmem:[%s1370_s0 + $0xa8] sm:$0x3f] }
   0x8   :  { %238 = vrot.lane.b32.xlu1 %v560_v10, %s519_s22  ;;  %v624_v29 = vmax.f32 %v24_v26, %v26_v27  ;;  %v31_v31 = vld [vmem:[%s1370_s0 + $0xb8] sm:$0x3f]  ;;  %v28_v32 = vld [vmem:[%s1370_s0 + $0xa0] sm:$0xff]  ;;  %v30_v33 = vld [vmem:[%s1370_s0 + $0xb0] sm:$0xff] }
   0x9   :  { %234 = vrot.lane.b32.xlu0 %v564_v11, %s519_s22  ;;  %v640_v34 = vmax.f32 %v29_v30, %v31_v31  ;;  %v644_v35 = vmax.f32 %v28_v32, %v30_v33  ;;  %v33_v36 = vld [vmem:[%s1370_s0 + $0xc8] sm:$0x3f]  ;;  %v35_v37 = vld [vmem:[%s1370_s0 + $0xd8] sm:$0x3f]  ;;  %v32_v38 = vld [vmem:[%s1370_s0 + $0xc0] sm:$0xff] }
   0xa   :  { %v34_v39 = vld [vmem:[%s1370_s0 + $0xd0] sm:$0xff]  ;;  %v660_v40 = vmax.f32 %v33_v36, %v35_v37  ;;  %v37_v42 = vld [vmem:[%s1370_s0 + $0xe8] sm:$0x3f]  ;;  %v39_v43 = vld [vmem:[%s1370_s0 + $0xf8] sm:$0x3f] }
   0xb   :  { %v664_v41 = vmax.f32 %v32_v38, %v34_v39  ;;  %v36_v44 = vld [vmem:[%s1370_s0 + $0xe0] sm:$0xff]  ;;  %v38_v45 = vld [vmem:[%s1370_s0 + $0xf0] sm:$0xff]  ;;  %v680_v46 = vmax.f32 %v37_v42, %v39_v43  ;;  %v41_v48 = vld [vmem:[%s1370_s0 + $0x108] sm:$0x3f] }
   0xc   :  { %242 = vrot.lane.b32.xlu1 %v580_v16, %s519_s22  ;;  %v684_v47 = vmax.f32 %v36_v44, %v38_v45  ;;  %v43_v49 = vld [vmem:[%s1370_s0 + $0x118] sm:$0x3f]  ;;  %v40_v50 = vld [vmem:[%s1370_s0 + $0x100] sm:$0xff]  ;;  %v42_v51 = vld [vmem:[%s1370_s0 + $0x110] sm:$0xff] }
   0xd   :  { %240 = vrot.lane.b32.xlu0 %v584_v17, %s519_s22  ;;  %v700_v52 = vmax.f32 %v41_v48, %v43_v49  ;;  %v704_v53 = vmax.f32 %v40_v50, %v42_v51  ;;  %v45_v54 = vld [vmem:[%s1370_s0 + $0x128] sm:$0x3f]  ;;  %v47_v55 = vld [vmem:[%s1370_s0 + $0x138] sm:$0x3f]  ;;  %v44_v56 = vld [vmem:[%s1370_s0 + $0x120] sm:$0xff] }
   0xe   :  { %v46_v57 = vld [vmem:[%s1370_s0 + $0x130] sm:$0xff]  ;;  %v720_v58 = vmax.f32 %v45_v54, %v47_v55  ;;  %v49_v60 = vld [vmem:[%s1370_s0 + $0x148] sm:$0x3f]  ;;  %v51_v61 = vld [vmem:[%s1370_s0 + $0x158] sm:$0x3f] }
   0xf   :  { %v724_v59 = vmax.f32 %v44_v56, %v46_v57  ;;  %v48_v62 = vld [vmem:[%s1370_s0 + $0x140] sm:$0xff]  ;;  %v50_v63 = vld [vmem:[%s1370_s0 + $0x150] sm:$0xff]  ;;  %v740_v0 = vmax.f32 %v49_v60, %v51_v61  ;;  %v53_v2 = vld [vmem:[%s1370_s0 + $0x168] sm:$0x3f] }
  0x10   :  { %246 = vrot.lane.b32.xlu1 %v600_v22, %s519_s22  ;;  %v744_v1 = vmax.f32 %v48_v62, %v50_v63  ;;  %v55_v4 = vld [vmem:[%s1370_s0 + $0x178] sm:$0x3f]  ;;  %v52_v5 = vld [vmem:[%s1370_s0 + $0x160] sm:$0xff]  ;;  %v54_v6 = vld [vmem:[%s1370_s0 + $0x170] sm:$0xff] }
  0x11   :  { %244 = vrot.lane.b32.xlu0 %v604_v23, %s519_s22  ;;  %v760_v8 = vmax.f32 %v53_v2, %v55_v4  ;;  %v764_v9 = vmax.f32 %v52_v5, %v54_v6  ;;  %v57_v12 = vld [vmem:[%s1370_s0 + $0x188] sm:$0x3f]  ;;  %v59_v13 = vld [vmem:[%s1370_s0 + $0x198] sm:$0x3f]  ;;  %v56_v14 = vld [vmem:[%s1370_s0 + $0x180] sm:$0xff] }
  0x12   :  { %v58_v15 = vld [vmem:[%s1370_s0 + $0x190] sm:$0xff]  ;;  %v780_v18 = vmax.f32 %v57_v12, %v59_v13  ;;  %v61_v20 = vld [vmem:[%s1370_s0 + $0x1a8] sm:$0x3f]  ;;  %v63_v21 = vld [vmem:[%s1370_s0 + $0x1b8] sm:$0x3f] }
  0x13   :  { %v784_v19 = vmax.f32 %v56_v14, %v58_v15  ;;  %v60_v24 = vld [vmem:[%s1370_s0 + $0x1a0] sm:$0xff]  ;;  %v62_v25 = vld [vmem:[%s1370_s0 + $0x1b0] sm:$0xff]  ;;  %v800_v26 = vmax.f32 %v61_v20, %v63_v21  ;;  %v65_v30 = vld [vmem:[%s1370_s0 + $0x1c8] sm:$0x3f] }
  0x14   :  { %250 = vrot.lane.b32.xlu1 %v620_v28, %s519_s22  ;;  %v804_v27 = vmax.f32 %v60_v24, %v62_v25  ;;  %v67_v31 = vld [vmem:[%s1370_s0 + $0x1d8] sm:$0x3f]  ;;  %v64_v32 = vld [vmem:[%s1370_s0 + $0x1c0] sm:$0xff]  ;;  %v66_v33 = vld [vmem:[%s1370_s0 + $0x1d0] sm:$0xff] }
  0x15   :  { %248 = vrot.lane.b32.xlu0 %v624_v29, %s519_s22  ;;  %v820_v36 = vmax.f32 %v65_v30, %v67_v31  ;;  %v824_v37 = vmax.f32 %v64_v32, %v66_v33  ;;  %v69_v38 = vld [vmem:[%s1370_s0 + $0x1e8] sm:$0x3f]  ;;  %v71_v39 = vld [vmem:[%s1370_s0 + $0x1f8] sm:$0x3f]  ;;  %v68_v42 = vld [vmem:[%s1370_s0 + $0x1e0] sm:$0xff] }
  0x16   :  { %v70_v43 = vld [vmem:[%s1370_s0 + $0x1f0] sm:$0xff]  ;;  %v840_v44 = vmax.f32 %v69_v38, %v71_v39  ;;  %v73_v48 = vld [vmem:[%s1370_s0 + $0x208] sm:$0x3f]  ;;  %v75_v49 = vld [vmem:[%s1370_s0 + $0x218] sm:$0x3f] }
  0x17   :  { %v844_v45 = vmax.f32 %v68_v42, %v70_v43  ;;  %v72_v50 = vld [vmem:[%s1370_s0 + $0x200] sm:$0xff]  ;;  %v74_v51 = vld [vmem:[%s1370_s0 + $0x210] sm:$0xff]  ;;  %v860_v54 = vmax.f32 %v73_v48, %v75_v49  ;;  %v77_v56 = vld [vmem:[%s1370_s0 + $0x228] sm:$0x3f] }
  0x18   :  { %254 = vrot.lane.b32.xlu1 %v640_v34, %s519_s22  ;;  %v864_v55 = vmax.f32 %v72_v50, %v74_v51  ;;  %v79_v57 = vld [vmem:[%s1370_s0 + $0x238] sm:$0x3f]  ;;  %v76_v60 = vld [vmem:[%s1370_s0 + $0x220] sm:$0xff]  ;;  %v78_v61 = vld [vmem:[%s1370_s0 + $0x230] sm:$0xff] }
  0x19   :  { %252 = vrot.lane.b32.xlu0 %v644_v35, %s519_s22  ;;  %v880_v62 = vmax.f32 %v77_v56, %v79_v57  ;;  %v884_v63 = vmax.f32 %v76_v60, %v78_v61  ;;  %v81_v2 = vld [vmem:[%s1370_s0 + $0x248] sm:$0x3f]  ;;  %v83_v4 = vld [vmem:[%s1370_s0 + $0x258] sm:$0x3f]  ;;  %v80_v5 = vld [vmem:[%s1370_s0 + $0x240] sm:$0xff] }
  0x1a   :  { %v82_v6 = vld [vmem:[%s1370_s0 + $0x250] sm:$0xff]  ;;  %v900_v12 = vmax.f32 %v81_v2, %v83_v4  ;;  %v85_v14 = vld [vmem:[%s1370_s0 + $0x268] sm:$0x3f]  ;;  %v87_v15 = vld [vmem:[%s1370_s0 + $0x278] sm:$0x3f] }
  0x1b   :  { %v904_v13 = vmax.f32 %v80_v5, %v82_v6  ;;  %v84_v20 = vld [vmem:[%s1370_s0 + $0x260] sm:$0xff]  ;;  %v86_v21 = vld [vmem:[%s1370_s0 + $0x270] sm:$0xff]  ;;  %v920_v24 = vmax.f32 %v85_v14, %v87_v15  ;;  %v89_v30 = vld [vmem:[%s1370_s0 + $0x288] sm:$0x3f] }
  0x1c   :  { %258 = vrot.lane.b32.xlu1 %v660_v40, %s519_s22  ;;  %v924_v25 = vmax.f32 %v84_v20, %v86_v21  ;;  %v91_v31 = vld [vmem:[%s1370_s0 + $0x298] sm:$0x3f]  ;;  %v88_v32 = vld [vmem:[%s1370_s0 + $0x280] sm:$0xff]  ;;  %v90_v33 = vld [vmem:[%s1370_s0 + $0x290] sm:$0xff] }
  0x1d   :  { %256 = vrot.lane.b32.xlu0 %v664_v41, %s519_s22  ;;  %v940_v38 = vmax.f32 %v89_v30, %v91_v31  ;;  %v944_v39 = vmax.f32 %v88_v32, %v90_v33  ;;  %v93_v42 = vld [vmem:[%s1370_s0 + $0x2a8] sm:$0x3f]  ;;  %v95_v43 = vld [vmem:[%s1370_s0 + $0x2b8] sm:$0x3f]  ;;  %v92_v48 = vld [vmem:[%s1370_s0 + $0x2a0] sm:$0xff] }
  0x1e   :  { %v94_v49 = vld [vmem:[%s1370_s0 + $0x2b0] sm:$0xff]  ;;  %v960_v50 = vmax.f32 %v93_v42, %v95_v43  ;;  %v97_v56 = vld [vmem:[%s1370_s0 + $0x2c8] sm:$0x3f]  ;;  %v99_v57 = vld [vmem:[%s1370_s0 + $0x2d8] sm:$0x3f] }
  0x1f   :  { %v964_v51 = vmax.f32 %v92_v48, %v94_v49  ;;  %v96_v60 = vld [vmem:[%s1370_s0 + $0x2c0] sm:$0xff]  ;;  %v98_v61 = vld [vmem:[%s1370_s0 + $0x2d0] sm:$0xff]  ;;  %v980_v2 = vmax.f32 %v97_v56, %v99_v57  ;;  %v101_v5 = vld [vmem:[%s1370_s0 + $0x2e8] sm:$0x3f] }
  0x20   :  { %262 = vrot.lane.b32.xlu1 %v680_v46, %s519_s22  ;;  %v984_v4 = vmax.f32 %v96_v60, %v98_v61  ;;  %v103_v6 = vld [vmem:[%s1370_s0 + $0x2f8] sm:$0x3f]  ;;  %v100_v14 = vld [vmem:[%s1370_s0 + $0x2e0] sm:$0xff]  ;;  %v102_v15 = vld [vmem:[%s1370_s0 + $0x2f0] sm:$0xff] }
  0x21   :  { %260 = vrot.lane.b32.xlu0 %v684_v47, %s519_s22  ;;  %v1000_v20 = vmax.f32 %v101_v5, %v103_v6  ;;  %v1004_v21 = vmax.f32 %v100_v14, %v102_v15  ;;  %v105_v30 = vld [vmem:[%s1370_s0 + $0x308] sm:$0x3f]  ;;  %v107_v31 = vld [vmem:[%s1370_s0 + $0x318] sm:$0x3f]  ;;  %v104_v32 = vld [vmem:[%s1370_s0 + $0x300] sm:$0xff] }
  0x22   :  { %v106_v33 = vld [vmem:[%s1370_s0 + $0x310] sm:$0xff]  ;;  %v1020_v42 = vmax.f32 %v105_v30, %v107_v31  ;;  %v109_v48 = vld [vmem:[%s1370_s0 + $0x328] sm:$0x3f]  ;;  %v111_v49 = vld [vmem:[%s1370_s0 + $0x338] sm:$0x3f] }
  0x23   :  { %v1024_v43 = vmax.f32 %v104_v32, %v106_v33  ;;  %v108_v56 = vld [vmem:[%s1370_s0 + $0x320] sm:$0xff]  ;;  %v110_v57 = vld [vmem:[%s1370_s0 + $0x330] sm:$0xff]  ;;  %v1040_v60 = vmax.f32 %v109_v48, %v111_v49  ;;  %v113_v5 = vld [vmem:[%s1370_s0 + $0x348] sm:$0x3f] }
  0x24   :  { %266 = vrot.lane.b32.xlu1 %v700_v52, %s519_s22  ;;  %v1044_v61 = vmax.f32 %v108_v56, %v110_v57  ;;  %v115_v6 = vld [vmem:[%s1370_s0 + $0x358] sm:$0x3f]  ;;  %v112_v14 = vld [vmem:[%s1370_s0 + $0x340] sm:$0xff]  ;;  %v114_v15 = vld [vmem:[%s1370_s0 + $0x350] sm:$0xff] }
  0x25   :  { %264 = vrot.lane.b32.xlu0 %v704_v53, %s519_s22  ;;  %v1060_v30 = vmax.f32 %v113_v5, %v115_v6  ;;  %v1064_v31 = vmax.f32 %v112_v14, %v114_v15  ;;  %v117_v32 = vld [vmem:[%s1370_s0 + $0x368] sm:$0x3f]  ;;  %v119_v33 = vld [vmem:[%s1370_s0 + $0x378] sm:$0x3f]  ;;  %v116_v48 = vld [vmem:[%s1370_s0 + $0x360] sm:$0xff] }
  0x26   :  { %v118_v49 = vld [vmem:[%s1370_s0 + $0x370] sm:$0xff]  ;;  %v1080_v56 = vmax.f32 %v117_v32, %v119_v33 }
  0x27   :  { %v1084_v57 = vmax.f32 %v116_v48, %v118_v49 }
  0x28   :  { %270 = vrot.lane.b32.xlu1 %v720_v58, %s519_s22 }
  0x29   :  { %268 = vrot.lane.b32.xlu0 %v724_v59, %s519_s22 }
  0x2c   :  { %274 = vrot.lane.b32.xlu1 %v740_v0, %s519_s22 }
  0x2d   :  { %272 = vrot.lane.b32.xlu0 %v744_v1, %s519_s22 }
  0x30   :  { %278 = vrot.lane.b32.xlu1 %v760_v8, %s519_s22 }
  0x31   :  { %276 = vrot.lane.b32.xlu0 %v764_v9, %s519_s22 }
  0x34   :  { %282 = vrot.lane.b32.xlu1 %v780_v18, %s519_s22 }
  0x35   :  { %280 = vrot.lane.b32.xlu0 %v784_v19, %s519_s22 }
  0x38   :  { %286 = vrot.lane.b32.xlu1 %v800_v26, %s519_s22 }
  0x39   :  { %284 = vrot.lane.b32.xlu0 %v804_v27, %s519_s22 }
  0x3c   :  { %290 = vrot.lane.b32.xlu1 %v820_v36, %s519_s22 }
  0x3d   :  { %288 = vrot.lane.b32.xlu0 %v824_v37, %s519_s22 }
  0x40   :  { %294 = vrot.lane.b32.xlu1 %v840_v44, %s519_s22 }
  0x41   :  { %292 = vrot.lane.b32.xlu0 %v844_v45, %s519_s22 }
  0x44   :  { %298 = vrot.lane.b32.xlu1 %v860_v54, %s519_s22 }
  0x45   :  { %296 = vrot.lane.b32.xlu0 %v864_v55, %s519_s22 }
  0x48   :  { %302 = vrot.lane.b32.xlu1 %v880_v62, %s519_s22 }
  0x49   :  { %300 = vrot.lane.b32.xlu0 %v884_v63, %s519_s22 }
  0x4c   :  { %306 = vrot.lane.b32.xlu1 %v900_v12, %s519_s22 }
  0x4d   :  { %304 = vrot.lane.b32.xlu0 %v904_v13, %s519_s22 }
  0x50   :  { %310 = vrot.lane.b32.xlu1 %v920_v24, %s519_s22 }
  0x51   :  { %308 = vrot.lane.b32.xlu0 %v924_v25, %s519_s22 }
  0x54   :  { %314 = vrot.lane.b32.xlu1 %v940_v38, %s519_s22 }
  0x55   :  { %312 = vrot.lane.b32.xlu0 %v944_v39, %s519_s22 }
  0x58   :  { %318 = vrot.lane.b32.xlu1 %v960_v50, %s519_s22 }
  0x59   :  { %316 = vrot.lane.b32.xlu0 %v964_v51, %s519_s22 }
  0x5c   :  { %322 = vrot.lane.b32.xlu1 %v980_v2, %s519_s22 }
  0x5d   :  { %320 = vrot.lane.b32.xlu0 %v984_v4, %s519_s22 }
  0x60   :  { %326 = vrot.lane.b32.xlu1 %v1000_v20, %s519_s22 }
  0x61   :  { %324 = vrot.lane.b32.xlu0 %v1004_v21, %s519_s22 }
  0x64   :  { %330 = vrot.lane.b32.xlu1 %v1020_v42, %s519_s22 }
  0x65   :  { %328 = vrot.lane.b32.xlu0 %v1024_v43, %s519_s22 }
  0x68   :  { %334 = vrot.lane.b32.xlu1 %v1040_v60, %s519_s22 }
  0x69   :  { %332 = vrot.lane.b32.xlu0 %v1044_v61, %s519_s22 }
  0x6c   :  { %338 = vrot.lane.b32.xlu1 %v1060_v30, %s519_s22 }
  0x6d   :  { %336 = vrot.lane.b32.xlu0 %v1064_v31, %s519_s22 }
  0x70   :  { %342 = vrot.lane.b32.xlu1 %v1080_v56, %s519_s22 }
  0x71   :  { %340 = vrot.lane.b32.xlu0 %v1084_v57, %s519_s22 }
  0x76   :  { %v237_v5 = vpop.permute.xlu1 %236 }
  0x77   :  { %v402_v6 = vmax.f32 %v539_v3, %v237_v5  ;;  %v233_v14 = vpop.permute.xlu0 %232 }
  0x78   :  { %v400_v15 = vmax.f32 %v550_v7, %v233_v14 }
  0x79   :  { %460 = vst.msk [vmem:[%s1371_s1 + $0x10] sm:$0xff] %vm456_vm0, %v402_v6 }
  0x7a   :  { %457 = vst.msk [vmem:[%s1371_s1] sm:$0xff] %vm456_vm0, %v400_v15  ;;  %v239_v32 = vpop.permute.xlu1 %238 }
  0x7b   :  { %v403_v33 = vmax.f32 %v560_v10, %v239_v32  ;;  %v235_v48 = vpop.permute.xlu0 %234 }
  0x7c   :  { %v401_v3 = vmax.f32 %v564_v11, %v235_v48 }
  0x7d   :  { %461 = vst.msk [vmem:[%s1371_s1 + $0x18] sm:$0x3f] %vm458_vm1, %v403_v33 }
  0x7e   :  { %459 = vst.msk [vmem:[%s1371_s1 + $0x8] sm:$0x3f] %vm458_vm1, %v401_v3  ;;  %v243_v7 = vpop.permute.xlu1 %242 }
  0x7f   :  { %v405_v49 = vmax.f32 %v580_v16, %v243_v7  ;;  %v241_v5 = vpop.permute.xlu0 %240 }
  0x80   :  { %v404_v6 = vmax.f32 %v584_v17, %v241_v5 }
  0x81   :  { %463 = vst.msk [vmem:[%s1371_s1 + $0x28] sm:$0x3f] %vm458_vm1, %v405_v49 }
  0x82   :  { %462 = vst.msk [vmem:[%s1371_s1 + $0x20] sm:$0xff] %vm456_vm0, %v404_v6  ;;  %v247_v10 = vpop.permute.xlu1 %246 }
  0x83   :  { %v407_v11 = vmax.f32 %v600_v22, %v247_v10  ;;  %v245_v14 = vpop.permute.xlu0 %244 }
  0x84   :  { %v406_v15 = vmax.f32 %v604_v23, %v245_v14 }
  0x85   :  { %465 = vst.msk [vmem:[%s1371_s1 + $0x38] sm:$0x3f] %vm458_vm1, %v407_v11 }
  0x86   :  { %464 = vst.msk [vmem:[%s1371_s1 + $0x30] sm:$0xff] %vm456_vm0, %v406_v15  ;;  %v251_v16 = vpop.permute.xlu1 %250 }
  0x87   :  { %v409_v17 = vmax.f32 %v620_v28, %v251_v16  ;;  %v249_v32 = vpop.permute.xlu0 %248 }
  0x88   :  { %v408_v33 = vmax.f32 %v624_v29, %v249_v32 }
  0x89   :  { %467 = vst.msk [vmem:[%s1371_s1 + $0x48] sm:$0x3f] %vm458_vm1, %v409_v17 }
  0x8a   :  { %466 = vst.msk [vmem:[%s1371_s1 + $0x40] sm:$0xff] %vm456_vm0, %v408_v33  ;;  %v255_v22 = vpop.permute.xlu1 %254 }
  0x8b   :  { %v411_v23 = vmax.f32 %v640_v34, %v255_v22  ;;  %v253_v48 = vpop.permute.xlu0 %252 }
  0x8c   :  { %v410_v3 = vmax.f32 %v644_v35, %v253_v48 }
  0x8d   :  { %469 = vst.msk [vmem:[%s1371_s1 + $0x58] sm:$0x3f] %vm458_vm1, %v411_v23 }
  0x8e   :  { %468 = vst.msk [vmem:[%s1371_s1 + $0x50] sm:$0xff] %vm456_vm0, %v410_v3  ;;  %v259_v28 = vpop.permute.xlu1 %258 }
  0x8f   :  { %v413_v29 = vmax.f32 %v660_v40, %v259_v28  ;;  %v257_v7 = vpop.permute.xlu0 %256 }
  0x90   :  { %v412_v49 = vmax.f32 %v664_v41, %v257_v7 }
  0x91   :  { %471 = vst.msk [vmem:[%s1371_s1 + $0x68] sm:$0x3f] %vm458_vm1, %v413_v29 }
  0x92   :  { %470 = vst.msk [vmem:[%s1371_s1 + $0x60] sm:$0xff] %vm456_vm0, %v412_v49  ;;  %v263_v34 = vpop.permute.xlu1 %262 }
  0x93   :  { %v415_v35 = vmax.f32 %v680_v46, %v263_v34  ;;  %v261_v5 = vpop.permute.xlu0 %260 }
  0x94   :  { %v414_v6 = vmax.f32 %v684_v47, %v261_v5 }
  0x95   :  { %473 = vst.msk [vmem:[%s1371_s1 + $0x78] sm:$0x3f] %vm458_vm1, %v415_v35 }
  0x96   :  { %472 = vst.msk [vmem:[%s1371_s1 + $0x70] sm:$0xff] %vm456_vm0, %v414_v6  ;;  %v267_v40 = vpop.permute.xlu1 %266 }
  0x97   :  { %v417_v41 = vmax.f32 %v700_v52, %v267_v40  ;;  %v265_v10 = vpop.permute.xlu0 %264 }
  0x98   :  { %v416_v11 = vmax.f32 %v704_v53, %v265_v10 }
  0x99   :  { %475 = vst.msk [vmem:[%s1371_s1 + $0x88] sm:$0x3f] %vm458_vm1, %v417_v41 }
  0x9a   :  { %474 = vst.msk [vmem:[%s1371_s1 + $0x80] sm:$0xff] %vm456_vm0, %v416_v11  ;;  %v271_v46 = vpop.permute.xlu1 %270 }
  0x9b   :  { %v419_v47 = vmax.f32 %v720_v58, %v271_v46  ;;  %v269_v14 = vpop.permute.xlu0 %268 }
  0x9c   :  { %v418_v15 = vmax.f32 %v724_v59, %v269_v14 }
  0x9d   :  { %477 = vst.msk [vmem:[%s1371_s1 + $0x98] sm:$0x3f] %vm458_vm1, %v419_v47 }
  0x9e   :  { %476 = vst.msk [vmem:[%s1371_s1 + $0x90] sm:$0xff] %vm456_vm0, %v418_v15  ;;  %v275_v52 = vpop.permute.xlu1 %274 }
  0x9f   :  { %v421_v53 = vmax.f32 %v740_v0, %v275_v52  ;;  %v273_v16 = vpop.permute.xlu0 %272 }
  0xa0   :  { %v420_v17 = vmax.f32 %v744_v1, %v273_v16 }
  0xa1   :  { %479 = vst.msk [vmem:[%s1371_s1 + $0xa8] sm:$0x3f] %vm458_vm1, %v421_v53 }
  0xa2   :  { %478 = vst.msk [vmem:[%s1371_s1 + $0xa0] sm:$0xff] %vm456_vm0, %v420_v17  ;;  %v279_v58 = vpop.permute.xlu1 %278 }
  0xa3   :  { %v423_v59 = vmax.f32 %v760_v8, %v279_v58  ;;  %v277_v32 = vpop.permute.xlu0 %276 }
  0xa4   :  { %v422_v33 = vmax.f32 %v764_v9, %v277_v32 }
  0xa5   :  { %481 = vst.msk [vmem:[%s1371_s1 + $0xb8] sm:$0x3f] %vm458_vm1, %v423_v59 }
  0xa6   :  { %480 = vst.msk [vmem:[%s1371_s1 + $0xb0] sm:$0xff] %vm456_vm0, %v422_v33  ;;  %v283_v0 = vpop.permute.xlu1 %282 }
  0xa7   :  { %v425_v1 = vmax.f32 %v780_v18, %v283_v0  ;;  %v281_v22 = vpop.permute.xlu0 %280 }
  0xa8   :  { %v424_v23 = vmax.f32 %v784_v19, %v281_v22 }
  0xa9   :  { %483 = vst.msk [vmem:[%s1371_s1 + $0xc8] sm:$0x3f] %vm458_vm1, %v425_v1 }
  0xaa   :  { %482 = vst.msk [vmem:[%s1371_s1 + $0xc0] sm:$0xff] %vm456_vm0, %v424_v23  ;;  %v287_v8 = vpop.permute.xlu1 %286 }
  0xab   :  { %v427_v9 = vmax.f32 %v800_v26, %v287_v8  ;;  %v285_v48 = vpop.permute.xlu0 %284 }
  0xac   :  { %v426_v3 = vmax.f32 %v804_v27, %v285_v48 }
  0xad   :  { %485 = vst.msk [vmem:[%s1371_s1 + $0xd8] sm:$0x3f] %vm458_vm1, %v427_v9 }
  0xae   :  { %484 = vst.msk [vmem:[%s1371_s1 + $0xd0] sm:$0xff] %vm456_vm0, %v426_v3  ;;  %v291_v18 = vpop.permute.xlu1 %290 }
  0xaf   :  { %v429_v19 = vmax.f32 %v820_v36, %v291_v18  ;;  %v289_v28 = vpop.permute.xlu0 %288 }
  0xb0   :  { %v428_v29 = vmax.f32 %v824_v37, %v289_v28 }
  0xb1   :  { %487 = vst.msk [vmem:[%s1371_s1 + $0xe8] sm:$0x3f] %vm458_vm1, %v429_v19 }
  0xb2   :  { %486 = vst.msk [vmem:[%s1371_s1 + $0xe0] sm:$0xff] %vm456_vm0, %v428_v29  ;;  %v295_v26 = vpop.permute.xlu1 %294 }
  0xb3   :  { %v431_v27 = vmax.f32 %v840_v44, %v295_v26  ;;  %v293_v7 = vpop.permute.xlu0 %292 }
  0xb4   :  { %v430_v49 = vmax.f32 %v844_v45, %v293_v7 }
  0xb5   :  { %489 = vst.msk [vmem:[%s1371_s1 + $0xf8] sm:$0x3f] %vm458_vm1, %v431_v27 }
  0xb6   :  { %488 = vst.msk [vmem:[%s1371_s1 + $0xf0] sm:$0xff] %vm456_vm0, %v430_v49  ;;  %v299_v36 = vpop.permute.xlu1 %298 }
  0xb7   :  { %v433_v37 = vmax.f32 %v860_v54, %v299_v36  ;;  %v297_v34 = vpop.permute.xlu0 %296 }
  0xb8   :  { %v432_v35 = vmax.f32 %v864_v55, %v297_v34 }
  0xb9   :  { %491 = vst.msk [vmem:[%s1371_s1 + $0x108] sm:$0x3f] %vm458_vm1, %v433_v37 }
  0xba   :  { %490 = vst.msk [vmem:[%s1371_s1 + $0x100] sm:$0xff] %vm456_vm0, %v432_v35  ;;  %v303_v44 = vpop.permute.xlu1 %302 }
  0xbb   :  { %v435_v45 = vmax.f32 %v880_v62, %v303_v44  ;;  %v301_v5 = vpop.permute.xlu0 %300 }
  0xbc   :  { %v434_v6 = vmax.f32 %v884_v63, %v301_v5 }
  0xbd   :  { %493 = vst.msk [vmem:[%s1371_s1 + $0x118] sm:$0x3f] %vm458_vm1, %v435_v45 }
  0xbe   :  { %492 = vst.msk [vmem:[%s1371_s1 + $0x110] sm:$0xff] %vm456_vm0, %v434_v6  ;;  %v307_v54 = vpop.permute.xlu1 %306 }
  0xbf   :  { %v437_v55 = vmax.f32 %v900_v12, %v307_v54  ;;  %v305_v40 = vpop.permute.xlu0 %304 }
  0xc0   :  { %v436_v41 = vmax.f32 %v904_v13, %v305_v40 }
  0xc1   :  { %495 = vst.msk [vmem:[%s1371_s1 + $0x128] sm:$0x3f] %vm458_vm1, %v437_v55 }
  0xc2   :  { %494 = vst.msk [vmem:[%s1371_s1 + $0x120] sm:$0xff] %vm456_vm0, %v436_v41  ;;  %v311_v62 = vpop.permute.xlu1 %310 }
  0xc3   :  { %v439_v63 = vmax.f32 %v920_v24, %v311_v62  ;;  %v309_v10 = vpop.permute.xlu0 %308 }
  0xc4   :  { %v438_v11 = vmax.f32 %v924_v25, %v309_v10 }
  0xc5   :  { %497 = vst.msk [vmem:[%s1371_s1 + $0x138] sm:$0x3f] %vm458_vm1, %v439_v63 }
  0xc6   :  { %496 = vst.msk [vmem:[%s1371_s1 + $0x130] sm:$0xff] %vm456_vm0, %v438_v11  ;;  %v315_v12 = vpop.permute.xlu1 %314 }
  0xc7   :  { %v441_v13 = vmax.f32 %v940_v38, %v315_v12  ;;  %v313_v46 = vpop.permute.xlu0 %312 }
  0xc8   :  { %v440_v47 = vmax.f32 %v944_v39, %v313_v46 }
  0xc9   :  { %499 = vst.msk [vmem:[%s1371_s1 + $0x148] sm:$0x3f] %vm458_vm1, %v441_v13 }
  0xca   :  { %498 = vst.msk [vmem:[%s1371_s1 + $0x140] sm:$0xff] %vm456_vm0, %v440_v47  ;;  %v319_v24 = vpop.permute.xlu1 %318 }
  0xcb   :  { %v443_v25 = vmax.f32 %v960_v50, %v319_v24  ;;  %v317_v14 = vpop.permute.xlu0 %316 }
  0xcc   :  { %v442_v15 = vmax.f32 %v964_v51, %v317_v14 }
  0xcd   :  { %501 = vst.msk [vmem:[%s1371_s1 + $0x158] sm:$0x3f] %vm458_vm1, %v443_v25 }
  0xce   :  { %500 = vst.msk [vmem:[%s1371_s1 + $0x150] sm:$0xff] %vm456_vm0, %v442_v15  ;;  %v323_v38 = vpop.permute.xlu1 %322 }
  0xcf   :  { %v445_v39 = vmax.f32 %v980_v2, %v323_v38  ;;  %v321_v52 = vpop.permute.xlu0 %320 }
  0xd0   :  { %v444_v53 = vmax.f32 %v984_v4, %v321_v52 }
  0xd1   :  { %503 = vst.msk [vmem:[%s1371_s1 + $0x168] sm:$0x3f] %vm458_vm1, %v445_v39 }
  0xd2   :  { %502 = vst.msk [vmem:[%s1371_s1 + $0x160] sm:$0xff] %vm456_vm0, %v444_v53  ;;  %v327_v50 = vpop.permute.xlu1 %326 }
  0xd3   :  { %v447_v51 = vmax.f32 %v1000_v20, %v327_v50  ;;  %v325_v16 = vpop.permute.xlu0 %324 }
  0xd4   :  { %v446_v17 = vmax.f32 %v1004_v21, %v325_v16 }
  0xd5   :  { %505 = vst.msk [vmem:[%s1371_s1 + $0x178] sm:$0x3f] %vm458_vm1, %v447_v51 }
  0xd6   :  { %504 = vst.msk [vmem:[%s1371_s1 + $0x170] sm:$0xff] %vm456_vm0, %v446_v17  ;;  %v331_v2 = vpop.permute.xlu1 %330 }
  0xd7   :  { %v449_v4 = vmax.f32 %v1020_v42, %v331_v2  ;;  %v329_v58 = vpop.permute.xlu0 %328 }
  0xd8   :  { %v448_v59 = vmax.f32 %v1024_v43, %v329_v58 }
  0xd9   :  { %507 = vst.msk [vmem:[%s1371_s1 + $0x188] sm:$0x3f] %vm458_vm1, %v449_v4 }
  0xda   :  { %506 = vst.msk [vmem:[%s1371_s1 + $0x180] sm:$0xff] %vm456_vm0, %v448_v59  ;;  %v335_v20 = vpop.permute.xlu1 %334 }
  0xdb   :  { %v451_v21 = vmax.f32 %v1040_v60, %v335_v20  ;;  %v333_v32 = vpop.permute.xlu0 %332 }
  0xdc   :  { %v450_v33 = vmax.f32 %v1044_v61, %v333_v32 }
  0xdd   :  { %509 = vst.msk [vmem:[%s1371_s1 + $0x198] sm:$0x3f] %vm458_vm1, %v451_v21 }
  0xde   :  { %508 = vst.msk [vmem:[%s1371_s1 + $0x190] sm:$0xff] %vm456_vm0, %v450_v33  ;;  %v339_v42 = vpop.permute.xlu1 %338 }
  0xdf   :  { %v453_v43 = vmax.f32 %v1060_v30, %v339_v42  ;;  %v337_v0 = vpop.permute.xlu0 %336 }
  0xe0   :  { %v452_v1 = vmax.f32 %v1064_v31, %v337_v0 }
  0xe1   :  { %511 = vst.msk [vmem:[%s1371_s1 + $0x1a8] sm:$0x3f] %vm458_vm1, %v453_v43 }
  0xe2   :  { %510 = vst.msk [vmem:[%s1371_s1 + $0x1a0] sm:$0xff] %vm456_vm0, %v452_v1  ;;  %v343_v60 = vpop.permute.xlu1 %342 }
  0xe3   :  { %v455_v61 = vmax.f32 %v1080_v56, %v343_v60  ;;  %v341_v22 = vpop.permute.xlu0 %340 }
  0xe4   :  { %v454_v23 = vmax.f32 %v1084_v57, %v341_v22 }
  0xe5   :  { %513 = vst.msk [vmem:[%s1371_s1 + $0x1b8] sm:$0x3f] %vm458_vm1, %v455_v61 }
  0xe6   :  { %512 = vst.msk [vmem:[%s1371_s1 + $0x1b0] sm:$0xff] %vm456_vm0, %v454_v23 }

// kernel: mnist_cnn_forward.10
= control target key start
LH: loop header
LB: loop body
LE: loop exit
PB: predicated region body
PF: predicated region fallthrough
CT: control target
= control target key end

     0   :  { %s140_s22 = smov 64   ;;  %vm120_vm0 = vcmask 522240   ;;  %s305_s0 = inlined_call_operand.vmem [shape: f32[14,2,7,128], index: 0, kind: input, shape index: {}]   ;;  %s306_s1 = inlined_call_operand.vmem [shape: f32[14,7,64], index: 1, kind: output, shape index: {}]  }
   0x1   :  { %v12_v0 = vld [vmem:[%s305_s0 + $0x20] sm:$0x7f]  ;;  %v13_v1 = vld [vmem:[%s305_s0 + $0x28] sm:$0x7f]  ;;  %v14_v5 = vld [vmem:[%s305_s0 + $0x30] sm:$0x7f] }
   0x2   :  { %v8_v2 = vld [vmem:[%s305_s0] sm:$0x7f]  ;;  %v38_v3 = vmax.f32 %v12_v0, %v13_v1  ;;  %v9_v4 = vld [vmem:[%s305_s0 + $0x8] sm:$0x7f]  ;;  %v15_v6 = vld [vmem:[%s305_s0 + $0x38] sm:$0x7f] }
   0x3   :  { %v36_v7 = vmax.f32 %v8_v2, %v9_v4  ;;  %v10_v8 = vld [vmem:[%s305_s0 + $0x10] sm:$0x7f]  ;;  %v11_v9 = vld [vmem:[%s305_s0 + $0x18] sm:$0x7f]  ;;  %v39_v10 = vmax.f32 %v14_v5, %v15_v6  ;;  %v16_v14 = vld [vmem:[%s305_s0 + $0x40] sm:$0x7f] }
   0x4   :  { %68 = vrot.lane.b32.xlu1 %v38_v3, %s140_s22  ;;  %v37_v11 = vmax.f32 %v10_v8, %v11_v9  ;;  %v18_v12 = vld [vmem:[%s305_s0 + $0x50] sm:$0x7f]  ;;  %v19_v13 = vld [vmem:[%s305_s0 + $0x58] sm:$0x7f]  ;;  %v17_v15 = vld [vmem:[%s305_s0 + $0x48] sm:$0x7f] }
   0x5   :  { %64 = vrot.lane.b32.xlu0 %v36_v7, %s140_s22  ;;  %v41_v16 = vmax.f32 %v18_v12, %v19_v13  ;;  %v40_v17 = vmax.f32 %v16_v14, %v17_v15  ;;  %v22_v18 = vld [vmem:[%s305_s0 + $0x70] sm:$0x7f]  ;;  %v23_v19 = vld [vmem:[%s305_s0 + $0x78] sm:$0x7f]  ;;  %v20_v20 = vld [vmem:[%s305_s0 + $0x60] sm:$0x7f] }
   0x6   :  { %v21_v21 = vld [vmem:[%s305_s0 + $0x68] sm:$0x7f]  ;;  %v43_v22 = vmax.f32 %v22_v18, %v23_v19  ;;  %v26_v24 = vld [vmem:[%s305_s0 + $0x90] sm:$0x7f]  ;;  %v27_v25 = vld [vmem:[%s305_s0 + $0x98] sm:$0x7f] }
   0x7   :  { %v42_v23 = vmax.f32 %v20_v20, %v21_v21  ;;  %v24_v26 = vld [vmem:[%s305_s0 + $0x80] sm:$0x7f]  ;;  %v25_v27 = vld [vmem:[%s305_s0 + $0x88] sm:$0x7f]  ;;  %v45_v28 = vmax.f32 %v26_v24, %v27_v25  ;;  %v30_v30 = vld [vmem:[%s305_s0 + $0xb0] sm:$0x7f] }
   0x8   :  { %70 = vrot.lane.b32.xlu1 %v39_v10, %s140_s22  ;;  %v44_v29 = vmax.f32 %v24_v26, %v25_v27  ;;  %v31_v31 = vld [vmem:[%s305_s0 + $0xb8] sm:$0x7f]  ;;  %v28_v32 = vld [vmem:[%s305_s0 + $0xa0] sm:$0x7f]  ;;  %v29_v33 = vld [vmem:[%s305_s0 + $0xa8] sm:$0x7f] }
   0x9   :  { %66 = vrot.lane.b32.xlu0 %v37_v11, %s140_s22  ;;  %v47_v34 = vmax.f32 %v30_v30, %v31_v31  ;;  %v46_v35 = vmax.f32 %v28_v32, %v29_v33  ;;  %v34_v36 = vld [vmem:[%s305_s0 + $0xd0] sm:$0x7f]  ;;  %v35_v37 = vld [vmem:[%s305_s0 + $0xd8] sm:$0x7f]  ;;  %v32_v38 = vld [vmem:[%s305_s0 + $0xc0] sm:$0x7f] }
   0xa   :  { %v33_v39 = vld [vmem:[%s305_s0 + $0xc8] sm:$0x7f]  ;;  %v49_v40 = vmax.f32 %v34_v36, %v35_v37 }
   0xb   :  { %v48_v41 = vmax.f32 %v32_v38, %v33_v39 }
   0xc   :  { %74 = vrot.lane.b32.xlu1 %v41_v16, %s140_s22 }
   0xd   :  { %72 = vrot.lane.b32.xlu0 %v40_v17, %s140_s22 }
  0x10   :  { %78 = vrot.lane.b32.xlu1 %v43_v22, %s140_s22 }
  0x11   :  { %76 = vrot.lane.b32.xlu0 %v42_v23, %s140_s22 }
  0x14   :  { %82 = vrot.lane.b32.xlu1 %v45_v28, %s140_s22 }
  0x15   :  { %80 = vrot.lane.b32.xlu0 %v44_v29, %s140_s22 }
  0x18   :  { %86 = vrot.lane.b32.xlu1 %v47_v34, %s140_s22 }
  0x19   :  { %84 = vrot.lane.b32.xlu0 %v46_v35, %s140_s22 }
  0x1c   :  { %90 = vrot.lane.b32.xlu1 %v49_v40, %s140_s22 }
  0x1d   :  { %88 = vrot.lane.b32.xlu0 %v48_v41, %s140_s22 }
  0x76   :  { %v69_v42 = vpop.permute.xlu1 %68 }
  0x77   :  { %v108_v43 = vmax.f32 %v38_v3, %v69_v42  ;;  %v65_v44 = vpop.permute.xlu0 %64 }
  0x78   :  { %v106_v45 = vmax.f32 %v36_v7, %v65_v44 }
  0x79   :  { %123 = vst.msk [vmem:[%s306_s1 + $0x10] sm:$0x7f] %vm120_vm0, %v108_v43 }
  0x7a   :  { %121 = vst.msk [vmem:[%s306_s1] sm:$0x7f] %vm120_vm0, %v106_v45  ;;  %v71_v46 = vpop.permute.xlu1 %70 }
  0x7b   :  { %v109_v47 = vmax.f32 %v39_v10, %v71_v46  ;;  %v67_v48 = vpop.permute.xlu0 %66 }
  0x7c   :  { %v107_v49 = vmax.f32 %v37_v11, %v67_v48 }
  0x7d   :  { %124 = vst.msk [vmem:[%s306_s1 + $0x18] sm:$0x7f] %vm120_vm0, %v109_v47 }
  0x7e   :  { %122 = vst.msk [vmem:[%s306_s1 + $0x8] sm:$0x7f] %vm120_vm0, %v107_v49  ;;  %v75_v50 = vpop.permute.xlu1 %74 }
  0x7f   :  { %v111_v51 = vmax.f32 %v41_v16, %v75_v50  ;;  %v73_v52 = vpop.permute.xlu0 %72 }
  0x80   :  { %v110_v53 = vmax.f32 %v40_v17, %v73_v52 }
  0x81   :  { %126 = vst.msk [vmem:[%s306_s1 + $0x28] sm:$0x7f] %vm120_vm0, %v111_v51 }
  0x82   :  { %125 = vst.msk [vmem:[%s306_s1 + $0x20] sm:$0x7f] %vm120_vm0, %v110_v53  ;;  %v79_v54 = vpop.permute.xlu1 %78 }
  0x83   :  { %v113_v55 = vmax.f32 %v43_v22, %v79_v54  ;;  %v77_v56 = vpop.permute.xlu0 %76 }
  0x84   :  { %v112_v57 = vmax.f32 %v42_v23, %v77_v56 }
  0x85   :  { %128 = vst.msk [vmem:[%s306_s1 + $0x38] sm:$0x7f] %vm120_vm0, %v113_v55 }
  0x86   :  { %127 = vst.msk [vmem:[%s306_s1 + $0x30] sm:$0x7f] %vm120_vm0, %v112_v57  ;;  %v83_v58 = vpop.permute.xlu1 %82 }
  0x87   :  { %v115_v59 = vmax.f32 %v45_v28, %v83_v58  ;;  %v81_v60 = vpop.permute.xlu0 %80 }
  0x88   :  { %v114_v61 = vmax.f32 %v44_v29, %v81_v60 }
  0x89   :  { %130 = vst.msk [vmem:[%s306_s1 + $0x48] sm:$0x7f] %vm120_vm0, %v115_v59 }
  0x8a   :  { %129 = vst.msk [vmem:[%s306_s1 + $0x40] sm:$0x7f] %vm120_vm0, %v114_v61  ;;  %v87_v62 = vpop.permute.xlu1 %86 }
  0x8b   :  { %v117_v63 = vmax.f32 %v47_v34, %v87_v62  ;;  %v85_v0 = vpop.permute.xlu0 %84 }
  0x8c   :  { %v116_v1 = vmax.f32 %v46_v35, %v85_v0 }
  0x8d   :  { %132 = vst.msk [vmem:[%s306_s1 + $0x58] sm:$0x7f] %vm120_vm0, %v117_v63 }
  0x8e   :  { %131 = vst.msk [vmem:[%s306_s1 + $0x50] sm:$0x7f] %vm120_vm0, %v116_v1  ;;  %v91_v2 = vpop.permute.xlu1 %90 }
  0x8f   :  { %v119_v3 = vmax.f32 %v49_v40, %v91_v2  ;;  %v89_v4 = vpop.permute.xlu0 %88 }
  0x90   :  { %v118_v5 = vmax.f32 %v48_v41, %v89_v4 }
  0x91   :  { %134 = vst.msk [vmem:[%s306_s1 + $0x68] sm:$0x7f] %vm120_vm0, %v119_v3 }
  0x92   :  { %133 = vst.msk [vmem:[%s306_s1 + $0x60] sm:$0x7f] %vm120_vm0, %v118_v5 }

// kernel: mnist_cnn_forward.9
= control target key start
LH: loop header
LB: loop body
LE: loop exit
PB: predicated region body
PF: predicated region fallthrough
CT: control target
= control target key end

     0   :  { %v1745_v0 = vmov 0   ;;  %v1746_v2 = vmov 0.0   ;;  %vm1747_vm0 = vmmov 0   ;;  %vm634_vm1 = vcmask 261120   ;;  %s2516_s1 = inlined_call_operand.vmem [shape: bf16[288,64], index: 1, kind: input, shape index: {}]   ;;  %s2517_s0 = inlined_call_operand.vmem [shape: bf16[392,288], index: 0, kind: input, shape index: {}]   ;;  %s2518_s2 = inlined_call_operand.vmem [shape: f32[1,64], index: 2, kind: input, shape index: {}]   ;;  %s2519_s3 = inlined_call_operand.vmem [shape: f32[392,64], index: 3, kind: output, shape index: {}]  }
   0x1   :  { %710 = vmatprep.subr.bf16.mxu1 %v1745_v0  ;;  %v1628_v1 = vld [vmem:[%s2516_s1] sm:$0xff]   ;;  %1423 = vmatprep.subr.bf16.mxu0 %v1746_v2  ;;  %v1629_v3 = vld [vmem:[%s2516_s1 + $0x8] sm:$0xff]   ;;  %v1630_v4 = vld [vmem:[%s2516_s1 + $0x10] sm:$0xff]   ;;  %vm1223_vm2 = vcmask 523264  }
   0x2   :  { %1427 = vmatprep.mubr.msk.bf16.mxu0 %vm1747_vm0, %v1746_v2  ;;  %711 = vmatpush1.bf16.msra.mxu1 %v1628_v1  ;;  %v1631_v5 = vld [vmem:[%s2516_s1 + $0x18] sm:$0xff]   ;;  %v1632_v6 = vld [vmem:[%s2516_s1 + $0x20] sm:$0xff]   ;;  %v1644_v8 = vld [vmem:[%s2516_s1 + $0x88] sm:$0xff]  }
   0x3   :  { %712 = vmatprep.subr.bf16.mxu1 %v1745_v0  ;;  %v1642_v7 = vld [vmem:[%s2516_s1 + $0x80] sm:$0xff]   ;;  %v1633_v9 = vld [vmem:[%s2516_s1 + $0x28] sm:$0xff]   ;;  %v1634_v12 = vld [vmem:[%s2516_s1 + $0x30] sm:$0xff]  }
   0x4   :  { %1424 = vmatpush3.bf16.msra.mxu0 %v1642_v7  ;;  %v1648_v10 = vld [vmem:[%s2517_s0 + $0x4] ss:$12 sps:$4 sm:$0xff]   ;;  %v1649_v11 = vld [vmem:[%s2517_s0 + $0x8] ss:$12 sps:$4 sm:$0xff]   ;;  %v1635_v13 = vld [vmem:[%s2516_s1 + $0x38] sm:$0xff]  }
   0x5   :  { %1425 = vmatprep.subr.bf16.mxu0 %v1746_v2  ;;  %742 = vmatprep.mubr.bf16.mxu1 %v1648_v10  ;;  %v1652_v14 = vld [vmem:[%s2517_s0 + $0x20] ss:$12 sps:$4 sm:$0xff]   ;;  %v1656_v17 = vld [vmem:[%s2517_s0 + $0x38] ss:$12 sps:$4 sm:$0xff]   ;;  %v1638_v18 = vld [vmem:[%s2516_s1 + $0x50] sm:$0xff]  }
   0x6   :  { %713 = vmatpush1.bf16.msra.mxu1 %v1629_v3  ;;  %v1636_v15 = vld [vmem:[%s2516_s1 + $0x40] sm:$0xff]   ;;  %v1637_v16 = vld [vmem:[%s2516_s1 + $0x48] sm:$0xff]   ;;  %v1639_v19 = vld [vmem:[%s2516_s1 + $0x58] sm:$0xff]  }
   0x7   :  { %714 = vmatprep.subr.bf16.mxu1 %v1745_v0  ;;  %v1660_v20 = vld [vmem:[%s2517_s0 + $0x50] ss:$12 sps:$4 sm:$0xff]   ;;  %v1640_v21 = vld [vmem:[%s2516_s1 + $0x60] sm:$0xff]   ;;  %v1641_v22 = vld [vmem:[%s2516_s1 + $0x68] sm:$0xff]  }
   0x8   :  { %1426 = vmatpush3.bf16.msra.mxu0 %v1644_v8  ;;  %v1664_v23 = vld [vmem:[%s2517_s0 + $0x68] ss:$12 sps:$4 sm:$0xff]   ;;  %v1645_v25 = vld [vmem:[%s2516_s1 + $0x78] sm:$0xff]   ;;  %v1668_v26 = vld [vmem:[%s2517_s0 + $0x80] ss:$12 sps:$4 sm:$0xff]  }
   0x9   :  { %v1643_v24 = vld [vmem:[%s2516_s1 + $0x70] sm:$0xff]   ;;  %v1646_v27 = vld [vmem:[%s2517_s0] ss:$12 sps:$4 sm:$0xff]   ;;  %v1650_v28 = vld [vmem:[%s2517_s0 + $0x1c] ss:$12 sps:$4 sm:$0xff]  }
   0xa   :  { %715 = vmatpush1.bf16.msra.mxu1 %v1630_v4  ;;  %v1672_v29 = vld [vmem:[%s2517_s0 + $0x98] ss:$12 sps:$4 sm:$0xff]   ;;  %v1654_v31 = vld [vmem:[%s2517_s0 + $0x34] ss:$12 sps:$4 sm:$0xff]   ;;  %v1676_v32 = vld [vmem:[%s2517_s0 + $0xb0] ss:$12 sps:$4 sm:$0xff]  }
   0xb   :  { %716 = vmatprep.subr.bf16.mxu1 %v1745_v0  ;;  %1428 = vmatmul.mubr.msk.bf16.vlgmr.msra.gmra.mrb[0].mxu0 %vm634_vm1, %v1649_v11  ;;  %v1653_v30 = vld [vmem:[%s2517_s0 + $0x18] ss:$12 sps:$4 sm:$0xff]   ;;  %v1657_v33 = vld [vmem:[%s2517_s0 + $0x30] ss:$12 sps:$4 sm:$0xff]   ;;  %v1680_v35 = vld [vmem:[%s2517_s0 + $0xc8] ss:$12 sps:$4 sm:$0xff]  }
   0xc   :  { %1431 = vmatprep.mubr.msk.bf16.mxu0 %vm1747_vm0, %v1746_v2  ;;  %v1658_v34 = vld [vmem:[%s2517_s0 + $0x4c] ss:$12 sps:$4 sm:$0xff]   ;;  %v1661_v36 = vld [vmem:[%s2517_s0 + $0x48] ss:$12 sps:$4 sm:$0xff]   ;;  %v1662_v37 = vld [vmem:[%s2517_s0 + $0x64] ss:$12 sps:$4 sm:$0xff]  }
   0xd   :  { %v1684_v38 = vld [vmem:[%s2517_s0 + $0xe0] ss:$12 sps:$4 sm:$0xff]   ;;  %v1666_v40 = vld [vmem:[%s2517_s0 + $0x7c] ss:$12 sps:$4 sm:$0xff]   ;;  %v1688_v41 = vld [vmem:[%s2517_s0 + $0xf8] ss:$12 sps:$4 sm:$0xff]  }
   0xe   :  { %717 = vmatpush1.bf16.msra.mxu1 %v1631_v5  ;;  %v1665_v39 = vld [vmem:[%s2517_s0 + $0x60] ss:$12 sps:$4 sm:$0xff]   ;;  %v1669_v42 = vld [vmem:[%s2517_s0 + $0x78] ss:$12 sps:$4 sm:$0xff]   ;;  %v1692_v44 = vld [vmem:[%s2517_s0 + $0x110] ss:$12 sps:$4 sm:$0xff]  }
   0xf   :  { %718 = vmatprep.subr.bf16.mxu1 %v1745_v0  ;;  %v1670_v43 = vld [vmem:[%s2517_s0 + $0x94] ss:$12 sps:$4 sm:$0xff]   ;;  %v1673_v45 = vld [vmem:[%s2517_s0 + $0x90] ss:$12 sps:$4 sm:$0xff]   ;;  %v1674_v46 = vld [vmem:[%s2517_s0 + $0xac] ss:$12 sps:$4 sm:$0xff]  }
  0x10   :  { %v1696_v47 = vld [vmem:[%s2517_s0 + $0x128] ss:$12 sps:$4 sm:$0xff]   ;;  %v1678_v49 = vld [vmem:[%s2517_s0 + $0xc4] ss:$12 sps:$4 sm:$0xff]   ;;  %v1700_v50 = vld [vmem:[%s2517_s0 + $0x140] ss:$12 sps:$4 sm:$0xff]  }
  0x11   :  { %v1677_v48 = vld [vmem:[%s2517_s0 + $0xa8] ss:$12 sps:$4 sm:$0xff]   ;;  %v1681_v51 = vld [vmem:[%s2517_s0 + $0xc0] ss:$12 sps:$4 sm:$0xff]   ;;  %v1704_v53 = vld [vmem:[%s2517_s0 + $0x158] ss:$12 sps:$4 sm:$0xff]  }
  0x12   :  { %719 = vmatpush1.bf16.msra.mxu1 %v1632_v6  ;;  %v1682_v52 = vld [vmem:[%s2517_s0 + $0xdc] ss:$12 sps:$4 sm:$0xff]   ;;  %v1685_v54 = vld [vmem:[%s2517_s0 + $0xd8] ss:$12 sps:$4 sm:$0xff]   ;;  %v1686_v55 = vld [vmem:[%s2517_s0 + $0xf4] ss:$12 sps:$4 sm:$0xff]  }
  0x13   :  { %720 = vmatprep.subr.bf16.mxu1 %v1745_v0  ;;  %1432 = vmatmul.mubr.msk.bf16.gmra.mrb[4].mxu0 %vm634_vm1, %v1652_v14  ;;  %v1708_v56 = vld [vmem:[%s2517_s0 + $0x170] ss:$12 sps:$4 sm:$0xff]   ;;  %v1690_v58 = vld [vmem:[%s2517_s0 + $0x10c] ss:$12 sps:$4 sm:$0xff]   ;;  %v1712_v59 = vld [vmem:[%s2517_s0 + $0x188] ss:$12 sps:$4 sm:$0xff]  }
  0x14   :  { %1435 = vmatprep.mubr.msk.bf16.mxu0 %vm1747_vm0, %v1746_v2  ;;  %v1689_v57 = vld [vmem:[%s2517_s0 + $0xf0] ss:$12 sps:$4 sm:$0xff]   ;;  %v1693_v60 = vld [vmem:[%s2517_s0 + $0x108] ss:$12 sps:$4 sm:$0xff]   ;;  %v1716_v62 = vld [vmem:[%s2517_s0 + $0x1a0] ss:$12 sps:$4 sm:$0xff]  }
  0x15   :  { %v1694_v61 = vld [vmem:[%s2517_s0 + $0x124] ss:$12 sps:$4 sm:$0xff]   ;;  %v1697_v63 = vld [vmem:[%s2517_s0 + $0x120] ss:$12 sps:$4 sm:$0xff]   ;;  %v1728_v8 = vld [vmem:[%s2517_s0 + $0x1e8] ss:$12 sps:$4 sm:$0xff]  }
  0x16   :  { %721 = vmatpush1.bf16.msra.mxu1 %v1633_v9  ;;  %v1720_v1 = vld [vmem:[%s2517_s0 + $0x1b8] ss:$12 sps:$4 sm:$0xff]   ;;  %v1702_v4 = vld [vmem:[%s2517_s0 + $0x154] ss:$12 sps:$4 sm:$0xff]   ;;  %v1724_v5 = vld [vmem:[%s2517_s0 + $0x1d0] ss:$12 sps:$4 sm:$0xff]  }
  0x17   :  { %722 = vmatprep.subr.bf16.mxu1 %v1745_v0  ;;  %v1701_v3 = vld [vmem:[%s2517_s0 + $0x138] ss:$12 sps:$4 sm:$0xff]   ;;  %v1705_v6 = vld [vmem:[%s2517_s0 + $0x150] ss:$12 sps:$4 sm:$0xff]   ;;  %v1709_v9 = vld [vmem:[%s2517_s0 + $0x168] ss:$12 sps:$4 sm:$0xff]  }
  0x18   :  { %v1706_v7 = vld [vmem:[%s2517_s0 + $0x16c] ss:$12 sps:$4 sm:$0xff]   ;;  %v1710_v10 = vld [vmem:[%s2517_s0 + $0x184] ss:$12 sps:$4 sm:$0xff]  }
  0x19   :  { %v1732_v11 = vld [vmem:[%s2517_s0 + $0x200] ss:$12 sps:$4 sm:$0xff]   ;;  %v1736_v14 = vld [vmem:[%s2517_s0 + $0x218] ss:$12 sps:$4 sm:$0xff]  }
  0x1a   :  { %723 = vmatpush1.bf16.msra.mxu1 %v1634_v12  ;;  %v1713_v12 = vld [vmem:[%s2517_s0 + $0x180] ss:$12 sps:$4 sm:$0xff]  }
  0x1b   :  { %724 = vmatprep.subr.bf16.mxu1 %v1745_v0  ;;  %1436 = vmatmul.mubr.msk.bf16.gmra.mrb[8].mxu0 %vm634_vm1, %v1656_v17  ;;  %v1740_v17 = vld [vmem:[%s2517_s0 + $0x230] ss:$12 sps:$4 sm:$0xff]  }
  0x1c   :  { %1439 = vmatprep.mubr.msk.bf16.mxu0 %vm1747_vm0, %v1746_v2 }
  0x1e   :  { %725 = vmatpush1.bf16.msra.mxu1 %v1635_v13  ;;  %v1714_v13 = vld [vmem:[%s2517_s0 + $0x19c] ss:$12 sps:$4 sm:$0xff]  }
  0x1f   :  { %726 = vmatprep.subr.bf16.mxu1 %v1745_v0 }
  0x22   :  { %727 = vmatpush1.bf16.msra.mxu1 %v1636_v15  ;;  %v1717_v15 = vld [vmem:[%s2517_s0 + $0x198] ss:$12 sps:$4 sm:$0xff]  }
  0x23   :  { %728 = vmatprep.subr.bf16.mxu1 %v1745_v0  ;;  %1440 = vmatmul.mubr.msk.bf16.gmra.mrb[12].mxu0 %vm634_vm1, %v1660_v20  ;;  %v1743_v20 = vld [vmem:[%s2517_s0 + $0x248] ss:$0 sps:$4 sm:$0xff]  }
  0x24   :  { %1443 = vmatprep.mubr.msk.bf16.mxu0 %vm1747_vm0, %v1746_v2 }
  0x26   :  { %729 = vmatpush1.bf16.msra.mxu1 %v1637_v16  ;;  %v1718_v16 = vld [vmem:[%s2517_s0 + $0x1b4] ss:$12 sps:$4 sm:$0xff]  }
  0x27   :  { %730 = vmatprep.subr.bf16.mxu1 %v1745_v0 }
  0x2a   :  { %731 = vmatpush1.bf16.msra.mxu1 %v1638_v18  ;;  %v1721_v18 = vld [vmem:[%s2517_s0 + $0x1b0] ss:$12 sps:$4 sm:$0xff]  }
  0x2b   :  { %732 = vmatprep.subr.bf16.mxu1 %v1745_v0  ;;  %1444 = vmatmul.mubr.msk.bf16.gmra.mrb[16].mxu0 %vm634_vm1, %v1664_v23  ;;  %v1730_v23 = vld [vmem:[%s2517_s0 + $0x1fc] ss:$12 sps:$4 sm:$0xff]  }
  0x2c   :  { %1447 = vmatprep.mubr.msk.bf16.mxu0 %vm1747_vm0, %v1746_v2 }
  0x2e   :  { %733 = vmatpush1.bf16.msra.mxu1 %v1639_v19  ;;  %v1722_v19 = vld [vmem:[%s2517_s0 + $0x1cc] ss:$12 sps:$4 sm:$0xff]  }
  0x2f   :  { %734 = vmatprep.subr.bf16.mxu1 %v1745_v0 }
  0x32   :  { %735 = vmatpush1.bf16.msra.mxu1 %v1640_v21  ;;  %v1725_v21 = vld [vmem:[%s2517_s0 + $0x1c8] ss:$12 sps:$4 sm:$0xff]  }
  0x33   :  { %736 = vmatprep.subr.bf16.mxu1 %v1745_v0  ;;  %1448 = vmatmul.mubr.msk.bf16.gmra.mrb[20].mxu0 %vm634_vm1, %v1668_v26 }
  0x34   :  { %1451 = vmatprep.mubr.msk.bf16.mxu0 %vm1747_vm0, %v1746_v2 }
  0x36   :  { %737 = vmatpush1.bf16.msra.mxu1 %v1641_v22  ;;  %v1726_v22 = vld [vmem:[%s2517_s0 + $0x1e4] ss:$12 sps:$4 sm:$0xff]  }
  0x37   :  { %738 = vmatprep.subr.bf16.mxu1 %v1745_v0 }
  0x3a   :  { %739 = vmatpush1.bf16.msra.mxu1 %v1643_v24  ;;  %v1733_v24 = vld [vmem:[%s2517_s0 + $0x1f8] ss:$12 sps:$4 sm:$0xff]  }
  0x3b   :  { %740 = vmatprep.subr.bf16.mxu1 %v1745_v0  ;;  %1452 = vmatmul.mubr.msk.bf16.gmra.mrb[24].mxu0 %vm634_vm1, %v1672_v29  ;;  %v1698_v0 = vld [vmem:[%s2517_s0 + $0x13c] ss:$12 sps:$4 sm:$0xff]  }
  0x3c   :  { %1455 = vmatprep.mubr.msk.bf16.mxu0 %vm1747_vm0, %v1746_v2  ;;  %v1737_v29 = vld [vmem:[%s2517_s0 + $0x210] ss:$12 sps:$4 sm:$0xff]  }
  0x3e   :  { %741 = vmatpush1.bf16.msra.mxu1 %v1645_v25  ;;  %v1734_v25 = vld [vmem:[%s2517_s0 + $0x214] ss:$12 sps:$4 sm:$0xff]  }
  0x41   :  { %743 = vmatmul.mubr.bf16.vlgmr.msra.gmra.mrb[0].mxu1 %v1646_v27 }
  0x42   :  { %750 = vmatprep.mubr.bf16.mxu1 %v1650_v28 }
  0x43   :  { %1456 = vmatmul.mubr.msk.bf16.gmra.mrb[28].mxu0 %vm634_vm1, %v1676_v32 }
  0x44   :  { %1459 = vmatprep.mubr.msk.bf16.mxu0 %vm1747_vm0, %v1746_v2 }
  0x49   :  { %751 = vmatmul.mubr.bf16.gmra.mrb[4].mxu1 %v1653_v30 }
  0x4a   :  { %758 = vmatprep.mubr.bf16.mxu1 %v1654_v31  ;;  %v1738_v31 = vld [vmem:[%s2517_s0 + $0x22c] ss:$12 sps:$4 sm:$0xff]  }
  0x4b   :  { %1460 = vmatmul.mubr.msk.bf16.gmra.mrb[32].mxu0 %vm634_vm1, %v1680_v35 }
  0x4c   :  { %1463 = vmatprep.mubr.msk.bf16.mxu0 %vm1747_vm0, %v1746_v2 }
  0x51   :  { %759 = vmatmul.mubr.bf16.gmra.mrb[8].mxu1 %v1657_v33  ;;  %v111_v33 = vld [vmem:[%s2517_s0 + $0x240] sm:$0xff] }
  0x52   :  { %766 = vmatprep.mubr.bf16.mxu1 %v1658_v34 }
  0x53   :  { %1464 = vmatmul.mubr.msk.bf16.gmra.mrb[36].mxu0 %vm634_vm1, %v1684_v38  ;;  %v1351_v38 = vcombine.high %v111_v33, %v111_v33 }
  0x54   :  { %1467 = vmatprep.mubr.msk.bf16.mxu0 %vm1747_vm0, %v1746_v2 }
  0x59   :  { %767 = vmatmul.mubr.bf16.gmra.mrb[12].mxu1 %v1661_v36  ;;  %v1741_v36 = vld [vmem:[%s2517_s0 + $0x228] ss:$12 sps:$4 sm:$0xff]  }
  0x5a   :  { %774 = vmatprep.mubr.bf16.mxu1 %v1662_v37 }
  0x5b   :  { %1468 = vmatmul.mubr.msk.bf16.gmra.mrb[40].mxu0 %vm634_vm1, %v1688_v41 }
  0x5c   :  { %1471 = vmatprep.mubr.msk.bf16.mxu0 %vm1747_vm0, %v1746_v2 }
  0x61   :  { %775 = vmatmul.mubr.bf16.gmra.mrb[16].mxu1 %v1665_v39 }
  0x62   :  { %782 = vmatprep.mubr.bf16.mxu1 %v1666_v40 }
  0x63   :  { %1472 = vmatmul.mubr.msk.bf16.gmra.mrb[44].mxu0 %vm634_vm1, %v1692_v44 }
  0x64   :  { %1475 = vmatprep.mubr.msk.bf16.mxu0 %vm1747_vm0, %v1746_v2 }
  0x69   :  { %783 = vmatmul.mubr.bf16.gmra.mrb[20].mxu1 %v1669_v42  ;;  %v1350_v42 = vcombine.low %v111_v33, %v111_v33 }
  0x6a   :  { %790 = vmatprep.mubr.bf16.mxu1 %v1670_v43 }
  0x6b   :  { %1476 = vmatmul.mubr.msk.bf16.gmra.mrb[48].mxu0 %vm634_vm1, %v1696_v47 }
  0x6c   :  { %1479 = vmatprep.mubr.msk.bf16.mxu0 %vm1747_vm0, %v1746_v2 }
  0x71   :  { %791 = vmatmul.mubr.bf16.gmra.mrb[24].mxu1 %v1673_v45 }
  0x72   :  { %798 = vmatprep.mubr.bf16.mxu1 %v1674_v46 }
  0x73   :  { %1480 = vmatmul.mubr.msk.bf16.gmra.mrb[52].mxu0 %vm634_vm1, %v1700_v50 }
  0x74   :  { %1483 = vmatprep.mubr.msk.bf16.mxu0 %vm1747_vm0, %v1746_v2 }
  0x79   :  { %799 = vmatmul.mubr.bf16.gmra.mrb[28].mxu1 %v1677_v48 }
  0x7a   :  { %806 = vmatprep.mubr.bf16.mxu1 %v1678_v49 }
  0x7b   :  { %1484 = vmatmul.mubr.msk.bf16.gmra.mrb[56].mxu0 %vm634_vm1, %v1704_v53 }
  0x7c   :  { %1487 = vmatprep.mubr.msk.bf16.mxu0 %vm1747_vm0, %v1746_v2 }
  0x81   :  { %807 = vmatmul.mubr.bf16.gmra.mrb[32].mxu1 %v1681_v51 }
  0x82   :  { %814 = vmatprep.mubr.bf16.mxu1 %v1682_v52  ;;  %v2148_v52 = vld [vmem:[%s2518_s2] ss:$0 sm:$0xff] }
  0x83   :  { %1488 = vmatmul.mubr.msk.bf16.gmra.mrb[60].mxu0 %vm634_vm1, %v1708_v56 }
  0x84   :  { %1491 = vmatprep.mubr.msk.bf16.mxu0 %vm1747_vm0, %v1746_v2 }
  0x89   :  { %815 = vmatmul.mubr.bf16.gmra.mrb[36].mxu1 %v1685_v54 }
  0x8a   :  { %822 = vmatprep.mubr.bf16.mxu1 %v1686_v55 }
  0x8b   :  { %1492 = vmatmul.mubr.msk.bf16.gmra.mrb[64].mxu0 %vm634_vm1, %v1712_v59 }
  0x8c   :  { %1495 = vmatprep.mubr.msk.bf16.mxu0 %vm1747_vm0, %v1746_v2 }
  0x91   :  { %823 = vmatmul.mubr.bf16.gmra.mrb[40].mxu1 %v1689_v57 }
  0x92   :  { %830 = vmatprep.mubr.bf16.mxu1 %v1690_v58 }
  0x93   :  { %1496 = vmatmul.mubr.msk.bf16.gmra.mrb[68].mxu0 %vm634_vm1, %v1716_v62 }
  0x94   :  { %1499 = vmatprep.mubr.msk.bf16.mxu0 %vm1747_vm0, %v1746_v2 }
  0x99   :  { %831 = vmatmul.mubr.bf16.gmra.mrb[44].mxu1 %v1693_v60 }
  0x9a   :  { %838 = vmatprep.mubr.bf16.mxu1 %v1694_v61 }
  0x9b   :  { %1500 = vmatmul.mubr.msk.bf16.gmra.mrb[72].mxu0 %vm634_vm1, %v1720_v1 }
  0x9c   :  { %1503 = vmatprep.mubr.msk.bf16.mxu0 %vm1747_vm0, %v1746_v2 }
  0xa1   :  { %839 = vmatmul.mubr.bf16.gmra.mrb[48].mxu1 %v1697_v63 }
  0xa2   :  { %846 = vmatprep.mubr.bf16.mxu1 %v1698_v0 }
  0xa3   :  { %1504 = vmatmul.mubr.msk.bf16.gmra.mrb[76].mxu0 %vm634_vm1, %v1724_v5 }
  0xa4   :  { %1507 = vmatprep.mubr.msk.bf16.mxu0 %vm1747_vm0, %v1746_v2 }
  0xa9   :  { %847 = vmatmul.mubr.bf16.gmra.mrb[52].mxu1 %v1701_v3 }
  0xaa   :  { %854 = vmatprep.mubr.bf16.mxu1 %v1702_v4 }
  0xab   :  { %1508 = vmatmul.mubr.msk.bf16.gmra.mrb[80].mxu0 %vm634_vm1, %v1728_v8 }
  0xac   :  { %1511 = vmatprep.mubr.msk.bf16.mxu0 %vm1747_vm0, %v1746_v2 }
  0xb1   :  { %855 = vmatmul.mubr.bf16.gmra.mrb[56].mxu1 %v1705_v6 }
  0xb2   :  { %862 = vmatprep.mubr.bf16.mxu1 %v1706_v7 }
  0xb3   :  { %1512 = vmatmul.mubr.msk.bf16.gmra.mrb[84].mxu0 %vm634_vm1, %v1732_v11 }
  0xb4   :  { %1515 = vmatprep.mubr.msk.bf16.mxu0 %vm1747_vm0, %v1746_v2 }
  0xb9   :  { %863 = vmatmul.mubr.bf16.gmra.mrb[60].mxu1 %v1709_v9 }
  0xba   :  { %870 = vmatprep.mubr.bf16.mxu1 %v1710_v10 }
  0xbb   :  { %1516 = vmatmul.mubr.msk.bf16.gmra.mrb[88].mxu0 %vm634_vm1, %v1736_v14 }
  0xbc   :  { %1519 = vmatprep.mubr.msk.bf16.mxu0 %vm1747_vm0, %v1746_v2 }
  0xc1   :  { %871 = vmatmul.mubr.bf16.gmra.mrb[64].mxu1 %v1713_v12 }
  0xc2   :  { %878 = vmatprep.mubr.bf16.mxu1 %v1714_v13 }
  0xc3   :  { %1520 = vmatmul.mubr.msk.bf16.gmra.mrb[92].mxu0 %vm634_vm1, %v1740_v17 }
  0xc4   :  { %1523 = vmatprep.mubr.msk.bf16.mxu0 %vm1747_vm0, %v1746_v2  ;;  %v1729_v2 = vld [vmem:[%s2517_s0 + $0x1e0] ss:$12 sps:$4 sm:$0xff]  }
  0xc9   :  { %879 = vmatmul.mubr.bf16.gmra.mrb[68].mxu1 %v1717_v15 }
  0xca   :  { %886 = vmatprep.mubr.bf16.mxu1 %v1718_v16 }
  0xcb   :  { %1524 = vmatmul.mubr.msk.bf16.gmra.mrb[96].mxu0 %vm634_vm1, %v1743_v20 }
  0xd1   :  { %887 = vmatmul.mubr.bf16.gmra.mrb[72].mxu1 %v1721_v18 }
  0xd2   :  { %894 = vmatprep.mubr.bf16.mxu1 %v1722_v19 }
  0xd9   :  { %895 = vmatmul.mubr.bf16.gmra.mrb[76].mxu1 %v1725_v21 }
  0xda   :  { %902 = vmatprep.mubr.bf16.mxu1 %v1726_v22 }
  0xde   :  { %v976_v26 = vpop.f32.mrb[0].mxu0 }
  0xdf   :  { %v1429_v27 = vpop.f32.mrb[1].mxu0 }
  0xe0   :  { %v979_v28 = vpop.f32.mrb[2].mxu0 }
  0xe1   :  { %903 = vmatmul.mubr.bf16.gmra.mrb[80].mxu1 %v1729_v2  ;;  %v1430_v30 = vpop.f32.mrb[3].mxu0 }
  0xe2   :  { %910 = vmatprep.mubr.bf16.mxu1 %v1730_v23 }
  0xe6   :  { %v984_v32 = vpop.f32.mrb[4].mxu0 }
  0xe7   :  { %v1433_v34 = vpop.f32.mrb[5].mxu0 }
  0xe8   :  { %v987_v35 = vpop.f32.mrb[6].mxu0 }
  0xe9   :  { %911 = vmatmul.mubr.bf16.gmra.mrb[84].mxu1 %v1733_v24  ;;  %v1434_v37 = vpop.f32.mrb[7].mxu0 }
  0xea   :  { %918 = vmatprep.mubr.bf16.mxu1 %v1734_v25 }
  0xee   :  { %v992_v39 = vpop.f32.mrb[8].mxu0 }
  0xef   :  { %v1437_v40 = vpop.f32.mrb[9].mxu0 }
  0xf0   :  { %v995_v41 = vpop.f32.mrb[10].mxu0 }
  0xf1   :  { %919 = vmatmul.mubr.bf16.gmra.mrb[88].mxu1 %v1737_v29  ;;  %v1438_v43 = vpop.f32.mrb[11].mxu0 }
  0xf2   :  { %926 = vmatprep.mubr.bf16.mxu1 %v1738_v31 }
  0xf6   :  { %v2137_v44 = vpop.f32.mrb[12].mxu0 }
  0xf7   :  { %v1441_v45 = vpop.f32.mrb[13].mxu0 }
  0xf8   :  { %v2139_v46 = vpop.f32.mrb[14].mxu0 }
  0xf9   :  { %927 = vmatmul.mubr.bf16.gmra.mrb[92].mxu1 %v1741_v36  ;;  %v1442_v47 = vpop.f32.mrb[15].mxu0 }
  0xfa   :  { %934 = vmatprep.mubr.bf16.mxu1 %v1351_v38 }
  0xfe   :  { %v2141_v48 = vpop.f32.mrb[16].mxu0 }
  0xff   :  { %v1445_v49 = vpop.f32.mrb[17].mxu0 }
 0x100   :  { %v2143_v50 = vpop.f32.mrb[18].mxu0 }
 0x101   :  { %935 = vmatmul.mubr.bf16.gmra.mrb[96].mxu1 %v1350_v42  ;;  %v1446_v51 = vpop.f32.mrb[19].mxu0 }
 0x106   :  { %v2150_v53 = vpop.f32.mrb[20].mxu0 }
 0x107   :  { %v1449_v54 = vpop.f32.mrb[21].mxu0 }
 0x108   :  { %v2152_v56 = vpop.f32.mrb[22].mxu0 }
 0x109   :  { %v1450_v59 = vpop.f32.mrb[23].mxu0 }
 0x10e   :  { %v2156_v3 = vpop.f32.mrb[24].mxu0 }
 0x10f   :  { %v1453_v5 = vpop.f32.mrb[25].mxu0 }
 0x110   :  { %v2162_v7 = vpop.f32.mrb[26].mxu0 }
 0x111   :  { %v1454_v10 = vpop.f32.mrb[27].mxu0 }
 0x114   :  { %v744_v55 = vpop.f32.mrb[0].mxu1 }
 0x115   :  { %v745_v57 = vadd.f32 %v2148_v52, %v744_v55  ;;  %v746_v58 = vpop.f32.mrb[1].mxu1 }
 0x116   :  { %v747_v60 = vpop.f32.mrb[2].mxu1  ;;  %v2170_v17 = vpop.f32.mrb[28].mxu0 }
 0x117   :  { %v977_v61 = vadd.f32 %v976_v26, %v745_v57  ;;  %v748_v62 = vadd.f32 %v2148_v52, %v747_v60  ;;  %v749_v63 = vpop.f32.mrb[3].mxu1  ;;  %v1457_v19 = vpop.f32.mrb[29].mxu0 }
 0x118   :  { %v2176_v21 = vpop.f32.mrb[30].mxu0 }
 0x119   :  { %v1174_v0 = vmax.f32 %v977_v61, 0.0  ;;  %v980_v1 = vadd.f32 %v979_v28, %v748_v62  ;;  %v1458_v23 = vpop.f32.mrb[31].mxu0 }
 0x11b   :  { %1224 = vst.msk [vmem:[%s2519_s3] sm:$0xff] %vm1223_vm2, %v1174_v0  ;;  %v1175_v4 = vmax.f32 %v980_v1, 0.0 }
 0x11c   :  { %v752_v6 = vpop.f32.mrb[4].mxu1 }
 0x11d   :  { %1225 = vst.msk [vmem:[%s2519_s3 + $0x8] sm:$0xff] %vm1223_vm2, %v1175_v4  ;;  %v753_v8 = vadd.f32 %v2148_v52, %v752_v6  ;;  %v754_v9 = vpop.f32.mrb[5].mxu1 }
 0x11e   :  { %v755_v11 = vpop.f32.mrb[6].mxu1  ;;  %v2184_v30 = vpop.f32.mrb[32].mxu0 }
 0x11f   :  { %v985_v12 = vadd.f32 %v984_v32, %v753_v8  ;;  %v756_v13 = vadd.f32 %v2148_v52, %v755_v11  ;;  %v757_v14 = vpop.f32.mrb[7].mxu1  ;;  %v1461_v32 = vpop.f32.mrb[33].mxu0 }
 0x120   :  { %v2190_v34 = vpop.f32.mrb[34].mxu0 }
 0x121   :  { %v1176_v15 = vmax.f32 %v985_v12, 0.0  ;;  %v988_v16 = vadd.f32 %v987_v35, %v756_v13  ;;  %v1462_v37 = vpop.f32.mrb[35].mxu0 }
 0x123   :  { %1226 = vst.msk [vmem:[%s2519_s3 + $0x10] sm:$0xff] %vm1223_vm2, %v1176_v15  ;;  %v1177_v18 = vmax.f32 %v988_v16, 0.0 }
 0x124   :  { %v760_v20 = vpop.f32.mrb[8].mxu1 }
 0x125   :  { %1227 = vst.msk [vmem:[%s2519_s3 + $0x18] sm:$0xff] %vm1223_vm2, %v1177_v18  ;;  %v761_v22 = vadd.f32 %v2148_v52, %v760_v20  ;;  %v762_v2 = vpop.f32.mrb[9].mxu1 }
 0x126   :  { %v763_v24 = vpop.f32.mrb[10].mxu1  ;;  %v2200_v45 = vpop.f32.mrb[36].mxu0 }
 0x127   :  { %v993_v25 = vadd.f32 %v992_v39, %v761_v22  ;;  %v764_v26 = vadd.f32 %v2148_v52, %v763_v24  ;;  %v765_v27 = vpop.f32.mrb[11].mxu1  ;;  %v1465_v49 = vpop.f32.mrb[37].mxu0 }
 0x128   :  { %v2206_v54 = vpop.f32.mrb[38].mxu0 }
 0x129   :  { %v1178_v28 = vmax.f32 %v993_v25, 0.0  ;;  %v996_v29 = vadd.f32 %v995_v41, %v764_v26  ;;  %v1466_v55 = vpop.f32.mrb[39].mxu0 }
 0x12b   :  { %1228 = vst.msk [vmem:[%s2519_s3 + $0x20] sm:$0xff] %vm1223_vm2, %v1178_v28  ;;  %v1179_v31 = vmax.f32 %v996_v29, 0.0 }
 0x12c   :  { %v768_v33 = vpop.f32.mrb[12].mxu1 }
 0x12d   :  { %1229 = vst.msk [vmem:[%s2519_s3 + $0x28] sm:$0xff] %vm1223_vm2, %v1179_v31  ;;  %v769_v35 = vadd.f32 %v2148_v52, %v768_v33  ;;  %v770_v36 = vpop.f32.mrb[13].mxu1 }
 0x12e   :  { %v771_v38 = vpop.f32.mrb[14].mxu1  ;;  %v2216_v63 = vpop.f32.mrb[40].mxu0 }
 0x12f   :  { %v1001_v39 = vadd.f32 %v2137_v44, %v769_v35  ;;  %v772_v40 = vadd.f32 %v2148_v52, %v771_v38  ;;  %v773_v41 = vpop.f32.mrb[15].mxu1  ;;  %v1469_v1 = vpop.f32.mrb[41].mxu0 }
 0x130   :  { %v2222_v5 = vpop.f32.mrb[42].mxu0 }
 0x131   :  { %v1180_v42 = vmax.f32 %v1001_v39, 0.0  ;;  %v1004_v43 = vadd.f32 %v2139_v46, %v772_v40  ;;  %v1470_v6 = vpop.f32.mrb[43].mxu0 }
 0x133   :  { %1230 = vst.msk [vmem:[%s2519_s3 + $0x30] sm:$0xff] %vm1223_vm2, %v1180_v42  ;;  %v1181_v47 = vmax.f32 %v1004_v43, 0.0 }
 0x134   :  { %v776_v51 = vpop.f32.mrb[16].mxu1 }
 0x135   :  { %1231 = vst.msk [vmem:[%s2519_s3 + $0x38] sm:$0xff] %vm1223_vm2, %v1181_v47  ;;  %v777_v44 = vadd.f32 %v2148_v52, %v776_v51  ;;  %v778_v46 = vpop.f32.mrb[17].mxu1 }
 0x136   :  { %v779_v57 = vpop.f32.mrb[18].mxu1  ;;  %v2232_v14 = vpop.f32.mrb[44].mxu0 }
 0x137   :  { %v1009_v58 = vadd.f32 %v2141_v48, %v777_v44  ;;  %v780_v59 = vadd.f32 %v2148_v52, %v779_v57  ;;  %v781_v60 = vpop.f32.mrb[19].mxu1  ;;  %v1473_v16 = vpop.f32.mrb[45].mxu0 }
 0x138   :  { %v2238_v19 = vpop.f32.mrb[46].mxu0 }
 0x139   :  { %v1182_v61 = vmax.f32 %v1009_v58, 0.0  ;;  %v1012_v62 = vadd.f32 %v2143_v50, %v780_v59  ;;  %v1474_v20 = vpop.f32.mrb[47].mxu0 }
 0x13b   :  { %1232 = vst.msk [vmem:[%s2519_s3 + $0x40] sm:$0xff] %vm1223_vm2, %v1182_v61  ;;  %v1183_v0 = vmax.f32 %v1012_v62, 0.0 }
 0x13c   :  { %v784_v4 = vpop.f32.mrb[20].mxu1 }
 0x13d   :  { %1233 = vst.msk [vmem:[%s2519_s3 + $0x48] sm:$0xff] %vm1223_vm2, %v1183_v0  ;;  %v785_v48 = vadd.f32 %v2148_v52, %v784_v4  ;;  %v786_v50 = vpop.f32.mrb[21].mxu1 }
 0x13e   :  { %v787_v8 = vpop.f32.mrb[22].mxu1  ;;  %v2248_v27 = vpop.f32.mrb[48].mxu0 }
 0x13f   :  { %v1017_v9 = vadd.f32 %v2150_v53, %v785_v48  ;;  %v788_v10 = vadd.f32 %v2148_v52, %v787_v8  ;;  %v789_v11 = vpop.f32.mrb[23].mxu1  ;;  %v1477_v29 = vpop.f32.mrb[49].mxu0 }
 0x140   :  { %v2254_v32 = vpop.f32.mrb[50].mxu0 }
 0x141   :  { %v1184_v12 = vmax.f32 %v1017_v9, 0.0  ;;  %v1020_v13 = vadd.f32 %v2152_v56, %v788_v10  ;;  %v1478_v33 = vpop.f32.mrb[51].mxu0 }
 0x143   :  { %1234 = vst.msk [vmem:[%s2519_s3 + $0x50] sm:$0xff] %vm1223_vm2, %v1184_v12  ;;  %v1185_v15 = vmax.f32 %v1020_v13, 0.0 }
 0x144   :  { %v792_v18 = vpop.f32.mrb[24].mxu1 }
 0x145   :  { %1235 = vst.msk [vmem:[%s2519_s3 + $0x58] sm:$0xff] %vm1223_vm2, %v1185_v15  ;;  %v793_v53 = vadd.f32 %v2148_v52, %v792_v18  ;;  %v794_v56 = vpop.f32.mrb[25].mxu1 }
 0x146   :  { %v795_v22 = vpop.f32.mrb[26].mxu1  ;;  %v2264_v41 = vpop.f32.mrb[52].mxu0 }
 0x147   :  { %v1025_v2 = vadd.f32 %v2156_v3, %v793_v53  ;;  %v796_v23 = vadd.f32 %v2148_v52, %v795_v22  ;;  %v797_v24 = vpop.f32.mrb[27].mxu1  ;;  %v1481_v43 = vpop.f32.mrb[53].mxu0 }
 0x148   :  { %v2270_v49 = vpop.f32.mrb[54].mxu0 }
 0x149   :  { %v1186_v25 = vmax.f32 %v1025_v2, 0.0  ;;  %v1028_v26 = vadd.f32 %v2162_v7, %v796_v23  ;;  %v1482_v51 = vpop.f32.mrb[55].mxu0 }
 0x14b   :  { %1236 = vst.msk [vmem:[%s2519_s3 + $0x60] sm:$0xff] %vm1223_vm2, %v1186_v25  ;;  %v1187_v28 = vmax.f32 %v1028_v26, 0.0 }
 0x14c   :  { %v800_v31 = vpop.f32.mrb[28].mxu1 }
 0x14d   :  { %1237 = vst.msk [vmem:[%s2519_s3 + $0x68] sm:$0xff] %vm1223_vm2, %v1187_v28  ;;  %v801_v3 = vadd.f32 %v2148_v52, %v800_v31  ;;  %v802_v7 = vpop.f32.mrb[29].mxu1 }
 0x14e   :  { %v803_v35 = vpop.f32.mrb[30].mxu1  ;;  %v2280_v60 = vpop.f32.mrb[56].mxu0 }
 0x14f   :  { %v1033_v36 = vadd.f32 %v2170_v17, %v801_v3  ;;  %v804_v37 = vadd.f32 %v2148_v52, %v803_v35  ;;  %v805_v38 = vpop.f32.mrb[31].mxu1  ;;  %v1485_v62 = vpop.f32.mrb[57].mxu0 }
 0x150   :  { %v2286_v1 = vpop.f32.mrb[58].mxu0 }
 0x151   :  { %v1188_v39 = vmax.f32 %v1033_v36, 0.0  ;;  %v1036_v40 = vadd.f32 %v2176_v21, %v804_v37  ;;  %v1486_v4 = vpop.f32.mrb[59].mxu0 }
 0x153   :  { %1238 = vst.msk [vmem:[%s2519_s3 + $0x70] sm:$0xff] %vm1223_vm2, %v1188_v39  ;;  %v1189_v42 = vmax.f32 %v1036_v40, 0.0 }
 0x154   :  { %v808_v47 = vpop.f32.mrb[32].mxu1 }
 0x155   :  { %1239 = vst.msk [vmem:[%s2519_s3 + $0x78] sm:$0xff] %vm1223_vm2, %v1189_v42  ;;  %v809_v17 = vadd.f32 %v2148_v52, %v808_v47  ;;  %v810_v21 = vpop.f32.mrb[33].mxu1 }
 0x156   :  { %v811_v44 = vpop.f32.mrb[34].mxu1  ;;  %v2296_v11 = vpop.f32.mrb[60].mxu0 }
 0x157   :  { %v1041_v46 = vadd.f32 %v2184_v30, %v809_v17  ;;  %v812_v55 = vadd.f32 %v2148_v52, %v811_v44  ;;  %v813_v57 = vpop.f32.mrb[35].mxu1  ;;  %v1489_v13 = vpop.f32.mrb[61].mxu0 }
 0x158   :  { %v2302_v16 = vpop.f32.mrb[62].mxu0 }
 0x159   :  { %v1190_v58 = vmax.f32 %v1041_v46, 0.0  ;;  %v1044_v59 = vadd.f32 %v2190_v34, %v812_v55  ;;  %v1490_v18 = vpop.f32.mrb[63].mxu0 }
 0x15b   :  { %1240 = vst.msk [vmem:[%s2519_s3 + $0x80] sm:$0xff] %vm1223_vm2, %v1190_v58  ;;  %v1191_v61 = vmax.f32 %v1044_v59, 0.0 }
 0x15c   :  { %v816_v0 = vpop.f32.mrb[36].mxu1 }
 0x15d   :  { %1241 = vst.msk [vmem:[%s2519_s3 + $0x88] sm:$0xff] %vm1223_vm2, %v1191_v61  ;;  %v817_v30 = vadd.f32 %v2148_v52, %v816_v0  ;;  %v818_v34 = vpop.f32.mrb[37].mxu1 }
 0x15e   :  { %v819_v48 = vpop.f32.mrb[38].mxu1  ;;  %v2312_v24 = vpop.f32.mrb[64].mxu0 }
 0x15f   :  { %v1049_v50 = vadd.f32 %v2200_v45, %v817_v30  ;;  %v820_v6 = vadd.f32 %v2148_v52, %v819_v48  ;;  %v821_v8 = vpop.f32.mrb[39].mxu1  ;;  %v1493_v26 = vpop.f32.mrb[65].mxu0 }
 0x160   :  { %v2318_v29 = vpop.f32.mrb[66].mxu0 }
 0x161   :  { %v1192_v9 = vmax.f32 %v1049_v50, 0.0  ;;  %v1052_v10 = vadd.f32 %v2206_v54, %v820_v6  ;;  %v1494_v31 = vpop.f32.mrb[67].mxu0 }
 0x163   :  { %1242 = vst.msk [vmem:[%s2519_s3 + $0x90] sm:$0xff] %vm1223_vm2, %v1192_v9  ;;  %v1193_v12 = vmax.f32 %v1052_v10, 0.0 }
 0x164   :  { %v824_v15 = vpop.f32.mrb[40].mxu1 }
 0x165   :  { %1243 = vst.msk [vmem:[%s2519_s3 + $0x98] sm:$0xff] %vm1223_vm2, %v1193_v12  ;;  %v825_v45 = vadd.f32 %v2148_v52, %v824_v15  ;;  %v826_v54 = vpop.f32.mrb[41].mxu1 }
 0x166   :  { %v827_v53 = vpop.f32.mrb[42].mxu1  ;;  %v2328_v38 = vpop.f32.mrb[68].mxu0 }
 0x167   :  { %v1057_v56 = vadd.f32 %v2216_v63, %v825_v45  ;;  %v828_v20 = vadd.f32 %v2148_v52, %v827_v53  ;;  %v829_v22 = vpop.f32.mrb[43].mxu1  ;;  %v1497_v40 = vpop.f32.mrb[69].mxu0 }
 0x168   :  { %v2334_v43 = vpop.f32.mrb[70].mxu0 }
 0x169   :  { %v1194_v2 = vmax.f32 %v1057_v56, 0.0  ;;  %v1060_v23 = vadd.f32 %v2222_v5, %v828_v20  ;;  %v1498_v47 = vpop.f32.mrb[71].mxu0 }
 0x16b   :  { %1244 = vst.msk [vmem:[%s2519_s3 + $0xa0] sm:$0xff] %vm1223_vm2, %v1194_v2  ;;  %v1195_v25 = vmax.f32 %v1060_v23, 0.0 }
 0x16c   :  { %v832_v28 = vpop.f32.mrb[44].mxu1 }
 0x16d   :  { %1245 = vst.msk [vmem:[%s2519_s3 + $0xa8] sm:$0xff] %vm1223_vm2, %v1195_v25  ;;  %v833_v63 = vadd.f32 %v2148_v52, %v832_v28  ;;  %v834_v5 = vpop.f32.mrb[45].mxu1 }
 0x16e   :  { %v835_v3 = vpop.f32.mrb[46].mxu1  ;;  %v2344_v57 = vpop.f32.mrb[72].mxu0 }
 0x16f   :  { %v1065_v7 = vadd.f32 %v2232_v14, %v833_v63  ;;  %v836_v33 = vadd.f32 %v2148_v52, %v835_v3  ;;  %v837_v35 = vpop.f32.mrb[47].mxu1  ;;  %v1501_v59 = vpop.f32.mrb[73].mxu0 }
 0x170   :  { %v2350_v62 = vpop.f32.mrb[74].mxu0 }
 0x171   :  { %v1196_v36 = vmax.f32 %v1065_v7, 0.0  ;;  %v1068_v37 = vadd.f32 %v2238_v19, %v836_v33  ;;  %v1502_v0 = vpop.f32.mrb[75].mxu0 }
 0x173   :  { %1246 = vst.msk [vmem:[%s2519_s3 + $0xb0] sm:$0xff] %vm1223_vm2, %v1196_v36  ;;  %v1197_v39 = vmax.f32 %v1068_v37, 0.0 }
 0x174   :  { %v840_v42 = vpop.f32.mrb[48].mxu1 }
 0x175   :  { %1247 = vst.msk [vmem:[%s2519_s3 + $0xb8] sm:$0xff] %vm1223_vm2, %v1197_v39  ;;  %v841_v14 = vadd.f32 %v2148_v52, %v840_v42  ;;  %v842_v19 = vpop.f32.mrb[49].mxu1 }
 0x176   :  { %v843_v17 = vpop.f32.mrb[50].mxu1  ;;  %v2360_v8 = vpop.f32.mrb[76].mxu0 }
 0x177   :  { %v1073_v21 = vadd.f32 %v2248_v27, %v841_v14  ;;  %v844_v51 = vadd.f32 %v2148_v52, %v843_v17  ;;  %v845_v44 = vpop.f32.mrb[51].mxu1  ;;  %v1505_v10 = vpop.f32.mrb[77].mxu0 }
 0x178   :  { %v2366_v13 = vpop.f32.mrb[78].mxu0 }
 0x179   :  { %v1198_v46 = vmax.f32 %v1073_v21, 0.0  ;;  %v1076_v55 = vadd.f32 %v2254_v32, %v844_v51  ;;  %v1506_v15 = vpop.f32.mrb[79].mxu0 }
 0x17b   :  { %1248 = vst.msk [vmem:[%s2519_s3 + $0xc0] sm:$0xff] %vm1223_vm2, %v1198_v46  ;;  %v1199_v58 = vmax.f32 %v1076_v55, 0.0 }
 0x17c   :  { %v848_v61 = vpop.f32.mrb[52].mxu1 }
 0x17d   :  { %1249 = vst.msk [vmem:[%s2519_s3 + $0xc8] sm:$0xff] %vm1223_vm2, %v1199_v58  ;;  %v849_v27 = vadd.f32 %v2148_v52, %v848_v61  ;;  %v850_v32 = vpop.f32.mrb[53].mxu1 }
 0x17e   :  { %v851_v30 = vpop.f32.mrb[54].mxu1  ;;  %v2376_v22 = vpop.f32.mrb[80].mxu0 }
 0x17f   :  { %v1081_v34 = vadd.f32 %v2264_v41, %v849_v27  ;;  %v852_v4 = vadd.f32 %v2148_v52, %v851_v30  ;;  %v853_v48 = vpop.f32.mrb[55].mxu1  ;;  %v1509_v23 = vpop.f32.mrb[81].mxu0 }
 0x180   :  { %v2382_v26 = vpop.f32.mrb[82].mxu0 }
 0x181   :  { %v1200_v50 = vmax.f32 %v1081_v34, 0.0  ;;  %v1084_v6 = vadd.f32 %v2270_v49, %v852_v4  ;;  %v1510_v28 = vpop.f32.mrb[83].mxu0 }
 0x183   :  { %1250 = vst.msk [vmem:[%s2519_s3 + $0xd0] sm:$0xff] %vm1223_vm2, %v1200_v50  ;;  %v1201_v9 = vmax.f32 %v1084_v6, 0.0 }
 0x184   :  { %v856_v12 = vpop.f32.mrb[56].mxu1 }
 0x185   :  { %1251 = vst.msk [vmem:[%s2519_s3 + $0xd8] sm:$0xff] %vm1223_vm2, %v1201_v9  ;;  %v857_v41 = vadd.f32 %v2148_v52, %v856_v12  ;;  %v858_v49 = vpop.f32.mrb[57].mxu1 }
 0x186   :  { %v859_v45 = vpop.f32.mrb[58].mxu1  ;;  %v2392_v35 = vpop.f32.mrb[84].mxu0 }
 0x187   :  { %v1089_v54 = vadd.f32 %v2280_v60, %v857_v41  ;;  %v860_v18 = vadd.f32 %v2148_v52, %v859_v45  ;;  %v861_v53 = vpop.f32.mrb[59].mxu1  ;;  %v1513_v37 = vpop.f32.mrb[85].mxu0 }
 0x188   :  { %v2398_v40 = vpop.f32.mrb[86].mxu0 }
 0x189   :  { %v1202_v56 = vmax.f32 %v1089_v54, 0.0  ;;  %v1092_v20 = vadd.f32 %v2286_v1, %v860_v18  ;;  %v1514_v42 = vpop.f32.mrb[87].mxu0 }
 0x18b   :  { %1252 = vst.msk [vmem:[%s2519_s3 + $0xe0] sm:$0xff] %vm1223_vm2, %v1202_v56  ;;  %v1203_v2 = vmax.f32 %v1092_v20, 0.0 }
 0x18c   :  { %v864_v25 = vpop.f32.mrb[60].mxu1 }
 0x18d   :  { %1253 = vst.msk [vmem:[%s2519_s3 + $0xe8] sm:$0xff] %vm1223_vm2, %v1203_v2  ;;  %v865_v60 = vadd.f32 %v2148_v52, %v864_v25  ;;  %v866_v1 = vpop.f32.mrb[61].mxu1 }
 0x18e   :  { %v867_v63 = vpop.f32.mrb[62].mxu1  ;;  %v2408_v44 = vpop.f32.mrb[88].mxu0 }
 0x18f   :  { %v1097_v5 = vadd.f32 %v2296_v11, %v865_v60  ;;  %v868_v31 = vadd.f32 %v2148_v52, %v867_v63  ;;  %v869_v3 = vpop.f32.mrb[63].mxu1  ;;  %v1517_v55 = vpop.f32.mrb[89].mxu0 }
 0x190   :  { %v2414_v59 = vpop.f32.mrb[90].mxu0 }
 0x191   :  { %v1204_v7 = vmax.f32 %v1097_v5, 0.0  ;;  %v1100_v33 = vadd.f32 %v2302_v16, %v868_v31  ;;  %v1518_v61 = vpop.f32.mrb[91].mxu0 }
 0x193   :  { %1254 = vst.msk [vmem:[%s2519_s3 + $0xf0] sm:$0xff] %vm1223_vm2, %v1204_v7  ;;  %v1205_v36 = vmax.f32 %v1100_v33, 0.0 }
 0x194   :  { %v872_v39 = vpop.f32.mrb[64].mxu1 }
 0x195   :  { %1255 = vst.msk [vmem:[%s2519_s3 + $0xf8] sm:$0xff] %vm1223_vm2, %v1205_v36  ;;  %v873_v11 = vadd.f32 %v2148_v52, %v872_v39  ;;  %v874_v16 = vpop.f32.mrb[65].mxu1 }
 0x196   :  { %v875_v14 = vpop.f32.mrb[66].mxu1  ;;  %v2424_v48 = vpop.f32.mrb[92].mxu0 }
 0x197   :  { %v1105_v19 = vadd.f32 %v2312_v24, %v873_v11  ;;  %v876_v47 = vadd.f32 %v2148_v52, %v875_v14  ;;  %v877_v17 = vpop.f32.mrb[67].mxu1  ;;  %v1521_v6 = vpop.f32.mrb[93].mxu0 }
 0x198   :  { %v2430_v10 = vpop.f32.mrb[94].mxu0 }
 0x199   :  { %v1206_v21 = vmax.f32 %v1105_v19, 0.0  ;;  %v1108_v51 = vadd.f32 %v2318_v29, %v876_v47  ;;  %v1522_v12 = vpop.f32.mrb[95].mxu0 }
 0x19b   :  { %1256 = vst.msk [vmem:[%s2519_s3 + $0x100] sm:$0xff] %vm1223_vm2, %v1206_v21  ;;  %v1207_v46 = vmax.f32 %v1108_v51, 0.0 }
 0x19c   :  { %v880_v58 = vpop.f32.mrb[68].mxu1 }
 0x19d   :  { %1257 = vst.msk [vmem:[%s2519_s3 + $0x108] sm:$0xff] %vm1223_vm2, %v1207_v46  ;;  %v881_v24 = vadd.f32 %v2148_v52, %v880_v58  ;;  %v882_v29 = vpop.f32.mrb[69].mxu1 }
 0x19e   :  { %v883_v27 = vpop.f32.mrb[70].mxu1  ;;  %v2440_v53 = vpop.f32.mrb[96].mxu0 }
 0x19f   :  { %v1113_v32 = vadd.f32 %v2328_v38, %v881_v24  ;;  %v884_v0 = vadd.f32 %v2148_v52, %v883_v27  ;;  %v885_v30 = vpop.f32.mrb[71].mxu1  ;;  %v1525_v20 = vpop.f32.mrb[97].mxu0 }
 0x1a0   :  { %v1171_v23 = vpop.f32.mrb[98].mxu0 }
 0x1a1   :  { %v1208_v34 = vmax.f32 %v1113_v32, 0.0  ;;  %v1116_v4 = vadd.f32 %v2334_v43, %v884_v0 }
 0x1a3   :  { %1258 = vst.msk [vmem:[%s2519_s3 + $0x110] sm:$0xff] %vm1223_vm2, %v1208_v34  ;;  %v1209_v50 = vmax.f32 %v1116_v4, 0.0 }
 0x1a4   :  { %v888_v9 = vpop.f32.mrb[72].mxu1 }
 0x1a5   :  { %1259 = vst.msk [vmem:[%s2519_s3 + $0x118] sm:$0xff] %vm1223_vm2, %v1209_v50  ;;  %v889_v38 = vadd.f32 %v2148_v52, %v888_v9  ;;  %v890_v43 = vpop.f32.mrb[73].mxu1 }
 0x1a6   :  { %v891_v41 = vpop.f32.mrb[74].mxu1 }
 0x1a7   :  { %v1121_v49 = vadd.f32 %v2344_v57, %v889_v38  ;;  %v892_v15 = vadd.f32 %v2148_v52, %v891_v41  ;;  %v893_v45 = vpop.f32.mrb[75].mxu1 }
 0x1a9   :  { %v1210_v54 = vmax.f32 %v1121_v49, 0.0  ;;  %v1124_v18 = vadd.f32 %v2350_v62, %v892_v15  ;;  %v1526_v62 = vpop.f32.mrb[99].mxu0 }
 0x1ab   :  { %1260 = vst.msk [vmem:[%s2519_s3 + $0x120] sm:$0xff] %vm1223_vm2, %v1210_v54  ;;  %v1211_v56 = vmax.f32 %v1124_v18, 0.0 }
 0x1ac   :  { %v896_v2 = vpop.f32.mrb[76].mxu1 }
 0x1ad   :  { %1261 = vst.msk [vmem:[%s2519_s3 + $0x128] sm:$0xff] %vm1223_vm2, %v1211_v56  ;;  %v897_v57 = vadd.f32 %v2148_v52, %v896_v2  ;;  %v898_v25 = vpop.f32.mrb[77].mxu1 }
 0x1ae   :  { %v899_v60 = vpop.f32.mrb[78].mxu1 }
 0x1af   :  { %v1129_v1 = vadd.f32 %v2360_v8, %v897_v57  ;;  %v900_v28 = vadd.f32 %v2148_v52, %v899_v60  ;;  %v901_v63 = vpop.f32.mrb[79].mxu1 }
 0x1b1   :  { %v1212_v5 = vmax.f32 %v1129_v1, 0.0  ;;  %v1132_v31 = vadd.f32 %v2366_v13, %v900_v28 }
 0x1b3   :  { %1262 = vst.msk [vmem:[%s2519_s3 + $0x130] sm:$0xff] %vm1223_vm2, %v1212_v5  ;;  %v1213_v3 = vmax.f32 %v1132_v31, 0.0 }
 0x1b4   :  { %v904_v7 = vpop.f32.mrb[80].mxu1 }
 0x1b5   :  { %1263 = vst.msk [vmem:[%s2519_s3 + $0x138] sm:$0xff] %vm1223_vm2, %v1213_v3  ;;  %v905_v8 = vadd.f32 %v2148_v52, %v904_v7  ;;  %v906_v33 = vpop.f32.mrb[81].mxu1 }
 0x1b6   :  { %v907_v36 = vpop.f32.mrb[82].mxu1 }
 0x1b7   :  { %v1137_v37 = vadd.f32 %v2376_v22, %v905_v8  ;;  %v908_v13 = vadd.f32 %v2148_v52, %v907_v36  ;;  %v909_v39 = vpop.f32.mrb[83].mxu1 }
 0x1b9   :  { %v1214_v11 = vmax.f32 %v1137_v37, 0.0  ;;  %v1140_v16 = vadd.f32 %v2382_v26, %v908_v13 }
 0x1bb   :  { %1264 = vst.msk [vmem:[%s2519_s3 + $0x140] sm:$0xff] %vm1223_vm2, %v1214_v11  ;;  %v1215_v42 = vmax.f32 %v1140_v16, 0.0 }
 0x1bc   :  { %v912_v14 = vpop.f32.mrb[84].mxu1 }
 0x1bd   :  { %1265 = vst.msk [vmem:[%s2519_s3 + $0x148] sm:$0xff] %vm1223_vm2, %v1215_v42  ;;  %v913_v22 = vadd.f32 %v2148_v52, %v912_v14  ;;  %v914_v19 = vpop.f32.mrb[85].mxu1 }
 0x1be   :  { %v915_v47 = vpop.f32.mrb[86].mxu1 }
 0x1bf   :  { %v1145_v17 = vadd.f32 %v2392_v35, %v913_v22  ;;  %v916_v26 = vadd.f32 %v2148_v52, %v915_v47  ;;  %v917_v21 = vpop.f32.mrb[87].mxu1 }
 0x1c1   :  { %v1216_v51 = vmax.f32 %v1145_v17, 0.0  ;;  %v1148_v46 = vadd.f32 %v2398_v40, %v916_v26 }
 0x1c3   :  { %1266 = vst.msk [vmem:[%s2519_s3 + $0x150] sm:$0xff] %vm1223_vm2, %v1216_v51  ;;  %v1217_v55 = vmax.f32 %v1148_v46, 0.0 }
 0x1c4   :  { %v920_v58 = vpop.f32.mrb[88].mxu1 }
 0x1c5   :  { %1267 = vst.msk [vmem:[%s2519_s3 + $0x158] sm:$0xff] %vm1223_vm2, %v1217_v55  ;;  %v921_v35 = vadd.f32 %v2148_v52, %v920_v58  ;;  %v922_v24 = vpop.f32.mrb[89].mxu1 }
 0x1c6   :  { %v923_v29 = vpop.f32.mrb[90].mxu1 }
 0x1c7   :  { %v1153_v61 = vadd.f32 %v2408_v44, %v921_v35  ;;  %v924_v40 = vadd.f32 %v2148_v52, %v923_v29  ;;  %v925_v27 = vpop.f32.mrb[91].mxu1 }
 0x1c9   :  { %v1218_v32 = vmax.f32 %v1153_v61, 0.0  ;;  %v1156_v0 = vadd.f32 %v2414_v59, %v924_v40 }
 0x1cb   :  { %1268 = vst.msk [vmem:[%s2519_s3 + $0x160] sm:$0xff] %vm1223_vm2, %v1218_v32  ;;  %v1219_v30 = vmax.f32 %v1156_v0, 0.0 }
 0x1cc   :  { %v928_v34 = vpop.f32.mrb[92].mxu1 }
 0x1cd   :  { %1269 = vst.msk [vmem:[%s2519_s3 + $0x168] sm:$0xff] %vm1223_vm2, %v1219_v30  ;;  %v929_v44 = vadd.f32 %v2148_v52, %v928_v34  ;;  %v930_v4 = vpop.f32.mrb[93].mxu1 }
 0x1ce   :  { %v931_v50 = vpop.f32.mrb[94].mxu1 }
 0x1cf   :  { %v1161_v6 = vadd.f32 %v2424_v48, %v929_v44  ;;  %v932_v59 = vadd.f32 %v2148_v52, %v931_v50  ;;  %v933_v9 = vpop.f32.mrb[95].mxu1 }
 0x1d1   :  { %v1220_v38 = vmax.f32 %v1161_v6, 0.0  ;;  %v1164_v43 = vadd.f32 %v2430_v10, %v932_v59 }
 0x1d3   :  { %1270 = vst.msk [vmem:[%s2519_s3 + $0x170] sm:$0xff] %vm1223_vm2, %v1220_v38  ;;  %v1221_v12 = vmax.f32 %v1164_v43, 0.0 }
 0x1d4   :  { %v936_v41 = vpop.f32.mrb[96].mxu1 }
 0x1d5   :  { %1271 = vst.msk [vmem:[%s2519_s3 + $0x178] sm:$0xff] %vm1223_vm2, %v1221_v12  ;;  %v937_v48 = vadd.f32 %v2148_v52, %v936_v41  ;;  %v938_v49 = vpop.f32.mrb[97].mxu1 }
 0x1d6   :  { %v939_v15 = vpop.f32.mrb[98].mxu1 }
 0x1d7   :  { %v1169_v45 = vadd.f32 %v2440_v53, %v937_v48  ;;  %v940_v54 = vpop.f32.mrb[99].mxu1 }
 0x1d9   :  { %v1222_v10 = vmax.f32 %v1169_v45, 0.0 }
 0x1db   :  { %1272 = vst.msk [vmem:[%s2519_s3 + $0x180] sm:$0xff] %vm1223_vm2, %v1222_v10 }

// kernel: mnist_cnn_forward.12
= control target key start
LH: loop header
LB: loop body
LE: loop exit
PB: predicated region body
PF: predicated region fallthrough
CT: control target
= control target key end

     0   :  { %s124_s0 = inlined_call_operand.vmem [shape: f32[6,2,3,256], index: 0, kind: input, shape index: {}]   ;;  %s125_s1 = inlined_call_operand.vmem [shape: f32[6,3,128], index: 1, kind: output, shape index: {}]  }
   0x1   :  { %v8_v0 = vld [vmem:[%s124_s0] sm:$0x77]  ;;  %v9_v1 = vld [vmem:[%s124_s0 + $0x8] sm:$0x77]  ;;  %v10_v2 = vld [vmem:[%s124_s0 + $0x10] sm:$0x77] }
   0x2   :  { %v20_v3 = vmax.f32 %v8_v0, %v9_v1  ;;  %v11_v4 = vld [vmem:[%s124_s0 + $0x18] sm:$0x77]  ;;  %v12_v5 = vld [vmem:[%s124_s0 + $0x20] sm:$0x77]  ;;  %v13_v6 = vld [vmem:[%s124_s0 + $0x28] sm:$0x77] }
   0x3   :  { %v21_v7 = vmax.f32 %v10_v2, %v11_v4  ;;  %v22_v8 = vmax.f32 %v12_v5, %v13_v6  ;;  %v14_v9 = vld [vmem:[%s124_s0 + $0x30] sm:$0x77]  ;;  %v15_v10 = vld [vmem:[%s124_s0 + $0x38] sm:$0x77]  ;;  %v16_v11 = vld [vmem:[%s124_s0 + $0x40] sm:$0x77] }
   0x4   :  { %v32_v12 = vrot.slane %v20_v3, 4  ;;  %v23_v13 = vmax.f32 %v14_v9, %v15_v10  ;;  %v17_v14 = vld [vmem:[%s124_s0 + $0x48] sm:$0x77]  ;;  %v18_v15 = vld [vmem:[%s124_s0 + $0x50] sm:$0x77] }
   0x5   :  { %v33_v16 = vrot.slane %v21_v7, 4  ;;  %v34_v17 = vrot.slane %v22_v8, 4  ;;  %v24_v18 = vmax.f32 %v16_v11, %v17_v14  ;;  %v19_v19 = vld [vmem:[%s124_s0 + $0x58] sm:$0x77] }
   0x6   :  { %v44_v20 = vmax.f32 %v20_v3, %v32_v12  ;;  %v35_v21 = vrot.slane %v23_v13, 4  ;;  %v25_v22 = vmax.f32 %v18_v15, %v19_v19 }
   0x7   :  { %v45_v23 = vmax.f32 %v21_v7, %v33_v16  ;;  %v46_v24 = vmax.f32 %v22_v8, %v34_v17  ;;  %v36_v25 = vrot.slane %v24_v18, 4 }
   0x8   :  { %50 = vst [vmem:[%s125_s1] sm:$0x7] %v44_v20  ;;  %v47_v26 = vmax.f32 %v23_v13, %v35_v21  ;;  %v37_v27 = vrot.slane %v25_v22, 4 }
   0x9   :  { %51 = vst [vmem:[%s125_s1 + $0x4] sm:$0x7] %v45_v23  ;;  %52 = vst [vmem:[%s125_s1 + $0x8] sm:$0x7] %v46_v24  ;;  %v48_v28 = vmax.f32 %v24_v18, %v36_v25 }
   0xa   :  { %53 = vst [vmem:[%s125_s1 + $0xc] sm:$0x7] %v47_v26  ;;  %v49_v29 = vmax.f32 %v25_v22, %v37_v27 }
   0xb   :  { %54 = vst [vmem:[%s125_s1 + $0x10] sm:$0x7] %v48_v28 }
   0xc   :  { %55 = vst [vmem:[%s125_s1 + $0x14] sm:$0x7] %v49_v29 }

// kernel: mnist_cnn_forward.11
= control target key start
LH: loop header
LB: loop body
LE: loop exit
PB: predicated region body
PF: predicated region fallthrough
CT: control target
= control target key end

     0   :  { %v1167_v34 = vmov 0.0   ;;  %vm1168_vm0 = vmmov 0   ;;  %vm516_vm1 = vcmask 523264   ;;  %s1506_s1 = inlined_call_operand.vmem [shape: bf16[576,128], index: 1, kind: input, shape index: {}]   ;;  %s1507_s0 = inlined_call_operand.vmem [shape: bf16[98,576], index: 0, kind: input, shape index: {}]   ;;  %s1508_s2 = inlined_call_operand.vmem [shape: f32[1,128], index: 2, kind: input, shape index: {}]   ;;  %s1509_s3 = inlined_call_operand.vmem [shape: f32[98,128], index: 3, kind: output, shape index: {}]  }
   0x1   :  { %v1084_v0 = vld [vmem:[%s1506_s1 + $0x40] sm:$0xff]   ;;  %v1088_v4 = vld [vmem:[%s1506_s1 + $0x48] sm:$0xff]   ;;  %v1092_v8 = vld [vmem:[%s1506_s1 + $0x50] sm:$0xff]  }
   0x2   :  { %v1085_v1 = vld [vmem:[%s1506_s1 + $0xc0] sm:$0xff]   ;;  %911 = vmatprep.subr.bf16.mxu0 %v1084_v0  ;;  %v1089_v5 = vld [vmem:[%s1506_s1 + $0xc8] sm:$0xff]   ;;  %v1093_v9 = vld [vmem:[%s1506_s1 + $0xd0] sm:$0xff]  }
   0x3   :  { %v1086_v2 = vld [vmem:[%s1506_s1] sm:$0xff]   ;;  %969 = vmatprep.subr.bf16.mxu1 %v1085_v1  ;;  %v1090_v6 = vld [vmem:[%s1506_s1 + $0x8] sm:$0xff]   ;;  %v1094_v10 = vld [vmem:[%s1506_s1 + $0x10] sm:$0xff]  }
   0x4   :  { %v1087_v3 = vld [vmem:[%s1506_s1 + $0x80] sm:$0xff]   ;;  %912 = vmatpush3.bf16.msra.mxu0 %v1086_v2  ;;  %v1091_v7 = vld [vmem:[%s1506_s1 + $0x88] sm:$0xff]   ;;  %v1095_v11 = vld [vmem:[%s1506_s1 + $0x90] sm:$0xff]  }
   0x5   :  { %970 = vmatpush3.bf16.msra.mxu1 %v1087_v3  ;;  %913 = vmatprep.subr.bf16.mxu0 %v1088_v4  ;;  %v1096_v12 = vld [vmem:[%s1506_s1 + $0x58] sm:$0xff]   ;;  %v1100_v16 = vld [vmem:[%s1506_s1 + $0x60] sm:$0xff]   ;;  %v1104_v20 = vld [vmem:[%s1506_s1 + $0x68] sm:$0xff]  }
   0x6   :  { %971 = vmatprep.subr.bf16.mxu1 %v1089_v5  ;;  %v1097_v13 = vld [vmem:[%s1506_s1 + $0xd8] sm:$0xff]   ;;  %v1101_v17 = vld [vmem:[%s1506_s1 + $0xe0] sm:$0xff]   ;;  %v1105_v21 = vld [vmem:[%s1506_s1 + $0xe8] sm:$0xff]  }
   0x7   :  { %v1098_v14 = vld [vmem:[%s1506_s1 + $0x18] sm:$0xff]   ;;  %v1102_v18 = vld [vmem:[%s1506_s1 + $0x20] sm:$0xff]   ;;  %v1106_v22 = vld [vmem:[%s1506_s1 + $0x28] sm:$0xff]  }
   0x8   :  { %914 = vmatpush3.bf16.msra.mxu0 %v1090_v6  ;;  %v1099_v15 = vld [vmem:[%s1506_s1 + $0x98] sm:$0xff]   ;;  %v1103_v19 = vld [vmem:[%s1506_s1 + $0xa0] sm:$0xff]   ;;  %v1107_v23 = vld [vmem:[%s1506_s1 + $0xa8] sm:$0xff]  }
   0x9   :  { %972 = vmatpush3.bf16.msra.mxu1 %v1091_v7  ;;  %915 = vmatprep.subr.bf16.mxu0 %v1092_v8  ;;  %v1108_v24 = vld [vmem:[%s1506_s1 + $0x70] sm:$0xff]   ;;  %v1112_v28 = vld [vmem:[%s1506_s1 + $0x78] sm:$0xff]   ;;  %v1121_v36 = vld [vmem:[%s1507_s0 + $0xc] ss:$20 sps:$4 sm:$0xff]  }
   0xa   :  { %973 = vmatprep.subr.bf16.mxu1 %v1093_v9  ;;  %v1109_v25 = vld [vmem:[%s1506_s1 + $0xf0] sm:$0xff]   ;;  %v1113_v29 = vld [vmem:[%s1506_s1 + $0xf8] sm:$0xff]   ;;  %v1122_v37 = vld [vmem:[%s1506_s1 + $0x100] sm:$0xff]   ;;  %658 = vmatprep.mubr.bf16.mxu1 %v1121_v36 }
   0xb   :  { %v1110_v26 = vld [vmem:[%s1506_s1 + $0x30] sm:$0xff]   ;;  %v1114_v30 = vld [vmem:[%s1506_s1 + $0x38] sm:$0xff]   ;;  %v1123_v38 = vld [vmem:[%s1507_s0 + $0x2c] ss:$20 sps:$4 sm:$0xff]  }
   0xc   :  { %916 = vmatpush3.bf16.msra.mxu0 %v1094_v10  ;;  %v1111_v27 = vld [vmem:[%s1506_s1 + $0xb0] sm:$0xff]   ;;  %v1115_v31 = vld [vmem:[%s1506_s1 + $0xb8] sm:$0xff]   ;;  %v1133_v43 = vld [vmem:[%s1506_s1 + $0x108] sm:$0xff]  }
   0xd   :  { %974 = vmatpush3.bf16.msra.mxu1 %v1095_v11  ;;  %917 = vmatprep.subr.bf16.mxu0 %v1096_v12  ;;  %v1116_v32 = vld [vmem:[%s1507_s0] ss:$20 sps:$4 sm:$0xff]   ;;  %v1118_v33 = vld [vmem:[%s1507_s0 + $0x4] ss:$20 sps:$4 sm:$0xff]   ;;  %v1119_v35 = vld [vmem:[%s1507_s0 + $0x8] ss:$20 sps:$4 sm:$0xff]  }
   0xe   :  { %975 = vmatprep.subr.bf16.mxu1 %v1097_v13  ;;  %570 = vmatprep.mubr.bf16.mxu0 %v1118_v33  ;;  %v1125_v39 = vld [vmem:[%s1507_s0 + $0x34] ss:$20 sps:$4 sm:$0xff]   ;;  %v1128_v41 = vld [vmem:[%s1507_s0 + $0x30] ss:$20 sps:$4 sm:$0xff]   ;;  %v1135_v47 = vld [vmem:[%s1507_s0 + $0x58] ss:$20 sps:$4 sm:$0xff]  }
   0xf   :  { %v1127_v40 = vld [vmem:[%s1507_s0 + $0x28] ss:$20 sps:$4 sm:$0xff]   ;;  %v1142_v45 = vld [vmem:[%s1506_s1 + $0x110] sm:$0xff]   ;;  %v1138_v49 = vld [vmem:[%s1507_s0 + $0x84] ss:$20 sps:$4 sm:$0xff]  }
  0x10   :  { %918 = vmatpush3.bf16.msra.mxu0 %v1098_v14  ;;  %v1129_v42 = vld [vmem:[%s1507_s0 + $0x54] ss:$20 sps:$4 sm:$0xff]   ;;  %v1131_v44 = vld [vmem:[%s1507_s0 + $0x5c] ss:$20 sps:$4 sm:$0xff]   ;;  %v1140_v51 = vld [vmem:[%s1507_s0 + $0x78] ss:$20 sps:$4 sm:$0xff]  }
  0x11   :  { %976 = vmatpush3.bf16.msra.mxu1 %v1099_v15  ;;  %919 = vmatprep.subr.bf16.mxu0 %v1100_v16  ;;  %v1134_v46 = vld [vmem:[%s1507_s0 + $0x50] ss:$20 sps:$4 sm:$0xff]   ;;  %v1155_v50 = vld [vmem:[%s1506_s1 + $0x118] sm:$0xff]   ;;  %v1141_v52 = vld [vmem:[%s1507_s0 + $0x80] ss:$20 sps:$4 sm:$0xff]  }
  0x12   :  { %977 = vmatprep.subr.bf16.mxu1 %v1101_v17  ;;  %v1136_v48 = vld [vmem:[%s1507_s0 + $0x7c] ss:$20 sps:$4 sm:$0xff]   ;;  %v1143_v53 = vld [vmem:[%s1507_s0 + $0xa4] ss:$20 sps:$4 sm:$0xff]   ;;  %v1145_v54 = vld [vmem:[%s1507_s0 + $0xac] ss:$20 sps:$4 sm:$0xff]  }
  0x13   :  { %v1147_v55 = vld [vmem:[%s1507_s0 + $0xa0] ss:$20 sps:$4 sm:$0xff]   ;;  %v1148_v56 = vld [vmem:[%s1507_s0 + $0xa8] ss:$20 sps:$4 sm:$0xff]   ;;  %v1154_v62 = vld [vmem:[%s1507_s0 + $0xd0] ss:$20 sps:$4 sm:$0xff]  }
  0x14   :  { %920 = vmatpush3.bf16.msra.mxu0 %v1102_v18  ;;  %v1149_v57 = vld [vmem:[%s1507_s0 + $0xcc] ss:$20 sps:$4 sm:$0xff]   ;;  %v1151_v58 = vld [vmem:[%s1507_s0 + $0xd4] ss:$20 sps:$4 sm:$0xff]   ;;  %v52_v60 = vld [vmem:[%s1507_s0 + $0xf8] sm:$0x11] }
  0x15   :  { %978 = vmatpush3.bf16.msra.mxu1 %v1103_v19  ;;  %921 = vmatprep.subr.bf16.mxu0 %v1104_v20  ;;  %v51_v59 = vld [vmem:[%s1507_s0 + $0xf0] sm:$0x11]  ;;  %v1153_v61 = vld [vmem:[%s1507_s0 + $0xc8] ss:$20 sps:$4 sm:$0xff]   ;;  %v866_v0 = vcombine.high %v52_v60, %v52_v60  ;;  %v865_v2 = vcombine.low %v52_v60, %v52_v60  ;;  %v1162_v5 = vld [vmem:[%s1507_s0 + $0x38] ss:$20 sps:$4 sm:$0xff]  }
  0x16   :  { %979 = vmatprep.subr.bf16.mxu1 %v1105_v21  ;;  %v864_v63 = vcombine.high %v51_v59, %v51_v59  ;;  %v863_v1 = vcombine.low %v51_v59, %v51_v59  ;;  %v1160_v3 = vld [vmem:[%s1507_s0 + $0x10] ss:$20 sps:$4 sm:$0xff]   ;;  %v1163_v6 = vld [vmem:[%s1507_s0 + $0xd8] ss:$20 sps:$4 sm:$0xff]   ;;  %v1164_v7 = vld [vmem:[%s1507_s0 + $0x60] ss:$20 sps:$4 sm:$0xff]  }
  0x17   :  { %v1161_v4 = vld [vmem:[%s1507_s0 + $0xb0] ss:$20 sps:$4 sm:$0xff]   ;;  %v1165_v8 = vld [vmem:[%s1507_s0 + $0x100] ss:$0 sps:$4 sm:$0x11]  }
  0x18   :  { %922 = vmatpush3.bf16.msra.mxu0 %v1106_v22  ;;  %v1166_v9 = vld [vmem:[%s1507_s0 + $0x88] ss:$20 sps:$4 sm:$0xff]   ;;  %v1428_v11 = vld [vmem:[%s1508_s2] ss:$0 sm:$0xff] }
  0x19   :  { %980 = vmatpush3.bf16.msra.mxu1 %v1107_v23  ;;  %923 = vmatprep.subr.bf16.mxu0 %v1108_v24 }
  0x1a   :  { %981 = vmatprep.subr.bf16.mxu1 %v1109_v25 }
  0x1c   :  { %924 = vmatpush3.bf16.msra.mxu0 %v1110_v26 }
  0x1d   :  { %982 = vmatpush3.bf16.msra.mxu1 %v1111_v27  ;;  %925 = vmatprep.subr.bf16.mxu0 %v1112_v28 }
  0x1e   :  { %983 = vmatprep.subr.bf16.mxu1 %v1113_v29 }
  0x20   :  { %926 = vmatpush3.bf16.msra.mxu0 %v1114_v30 }
  0x21   :  { %984 = vmatpush3.bf16.msra.mxu1 %v1115_v31  ;;  %1038 = vmatprep.subr.bf16.mxu0 %v1167_v34 }
  0x22   :  { %1074 = vmatprep.subr.bf16.mxu1 %v1167_v34 }
  0x23   :  { %571 = vmatmul.mubr.bf16.vlgmr.msra.gmra.mrb[0].mxu0 %v1116_v32 }
  0x24   :  { %659 = vmatmul.mubr.bf16.vlgmr.msra.gmra.mrb[0].mxu1 %v1119_v35  ;;  %1039 = vmatpush3.bf16.msra.mxu0 %v1122_v37 }
  0x25   :  { %578 = vmatprep.mubr.bf16.mxu0 %v1123_v38  ;;  %1078 = vmatpush3.bf16.msra.mxu1 %v1122_v37 }
  0x26   :  { %666 = vmatprep.mubr.bf16.mxu1 %v1125_v39  ;;  %1040 = vmatprep.subr.bf16.mxu0 %v1167_v34 }
  0x27   :  { %1075 = vmatprep.subr.bf16.mxu1 %v1167_v34 }
  0x28   :  { %1041 = vmatpush3.bf16.msra.mxu0 %v1133_v43 }
  0x29   :  { %1079 = vmatpush3.bf16.msra.mxu1 %v1133_v43  ;;  %1042 = vmatprep.subr.bf16.mxu0 %v1167_v34 }
  0x2a   :  { %1076 = vmatprep.subr.bf16.mxu1 %v1167_v34 }
  0x2b   :  { %579 = vmatmul.mubr.bf16.gmra.mrb[4].mxu0 %v1127_v40 }
  0x2c   :  { %667 = vmatmul.mubr.bf16.gmra.mrb[4].mxu1 %v1128_v41  ;;  %586 = vmatprep.mubr.bf16.mxu0 %v1129_v42 }
  0x2d   :  { %674 = vmatprep.mubr.bf16.mxu1 %v1131_v44  ;;  %1043 = vmatpush3.bf16.msra.mxu0 %v1142_v45 }
  0x2e   :  { %1080 = vmatpush3.bf16.msra.mxu1 %v1142_v45  ;;  %1044 = vmatprep.subr.bf16.mxu0 %v1167_v34 }
  0x2f   :  { %1077 = vmatprep.subr.bf16.mxu1 %v1167_v34 }
  0x31   :  { %1045 = vmatpush3.bf16.msra.mxu0 %v1155_v50 }
  0x32   :  { %1081 = vmatpush3.bf16.msra.mxu1 %v1155_v50 }
  0x33   :  { %587 = vmatmul.mubr.bf16.gmra.mrb[8].mxu0 %v1134_v46 }
  0x34   :  { %675 = vmatmul.mubr.bf16.gmra.mrb[8].mxu1 %v1135_v47  ;;  %594 = vmatprep.mubr.bf16.mxu0 %v1136_v48 }
  0x35   :  { %682 = vmatprep.mubr.bf16.mxu1 %v1138_v49 }
  0x3b   :  { %595 = vmatmul.mubr.bf16.gmra.mrb[12].mxu0 %v1140_v51 }
  0x3c   :  { %683 = vmatmul.mubr.bf16.gmra.mrb[12].mxu1 %v1141_v52  ;;  %602 = vmatprep.mubr.bf16.mxu0 %v1143_v53 }
  0x3d   :  { %690 = vmatprep.mubr.bf16.mxu1 %v1145_v54 }
  0x43   :  { %603 = vmatmul.mubr.bf16.gmra.mrb[16].mxu0 %v1147_v55 }
  0x44   :  { %691 = vmatmul.mubr.bf16.gmra.mrb[16].mxu1 %v1148_v56  ;;  %610 = vmatprep.mubr.bf16.mxu0 %v1149_v57 }
  0x45   :  { %698 = vmatprep.mubr.bf16.mxu1 %v1151_v58 }
  0x4b   :  { %611 = vmatmul.mubr.bf16.gmra.mrb[20].mxu0 %v1153_v61 }
  0x4c   :  { %699 = vmatmul.mubr.bf16.gmra.mrb[20].mxu1 %v1154_v62  ;;  %618 = vmatprep.mubr.bf16.mxu0 %v864_v63 }
  0x4d   :  { %706 = vmatprep.mubr.bf16.mxu1 %v866_v0 }
  0x53   :  { %619 = vmatmul.mubr.bf16.gmra.mrb[24].mxu0 %v863_v1 }
  0x54   :  { %707 = vmatmul.mubr.bf16.gmra.mrb[24].mxu1 %v865_v2  ;;  %1046 = vmatprep.mubr.msk.bf16.mxu0 %vm1168_vm0, %v1167_v34 }
  0x55   :  { %1062 = vmatprep.mubr.msk.bf16.mxu1 %vm1168_vm0, %v1167_v34 }
  0x5b   :  { %1047 = vmatmul.mubr.msk.bf16.vlgmr.msra.gmra.mrb[28].mxu0 %vm516_vm1, %v1160_v3 }
  0x5c   :  { %1063 = vmatmul.mubr.msk.bf16.vlgmr.msra.gmra.mrb[28].mxu1 %vm516_vm1, %v1161_v4  ;;  %1050 = vmatprep.mubr.msk.bf16.mxu0 %vm1168_vm0, %v1167_v34 }
  0x5d   :  { %1066 = vmatprep.mubr.msk.bf16.mxu1 %vm1168_vm0, %v1167_v34 }
  0x63   :  { %1051 = vmatmul.mubr.msk.bf16.gmra.mrb[32].mxu0 %vm516_vm1, %v1162_v5 }
  0x64   :  { %1067 = vmatmul.mubr.msk.bf16.gmra.mrb[32].mxu1 %vm516_vm1, %v1163_v6  ;;  %1054 = vmatprep.mubr.msk.bf16.mxu0 %vm1168_vm0, %v1167_v34 }
  0x65   :  { %1070 = vmatprep.mubr.msk.bf16.mxu1 %vm1168_vm0, %v1167_v34 }
  0x6b   :  { %1055 = vmatmul.mubr.msk.bf16.gmra.mrb[36].mxu0 %vm516_vm1, %v1164_v7 }
  0x6c   :  { %1071 = vmatmul.mubr.msk.bf16.gmra.mrb[36].mxu1 %vm516_vm1, %v1165_v8  ;;  %1058 = vmatprep.mubr.msk.bf16.mxu0 %vm1168_vm0, %v1167_v34 }
  0x73   :  { %1059 = vmatmul.mubr.msk.bf16.gmra.mrb[40].mxu0 %vm516_vm1, %v1166_v9 }
  0xf6   :  { %v927_v10 = vpop.f32.mrb[0].mxu0 }
  0xf7   :  { %v928_v12 = vpop.f32.mrb[1].mxu0  ;;  %v985_v13 = vpop.f32.mrb[0].mxu1 }
  0xf8   :  { %v929_v14 = vadd.f32 %v928_v12, %v927_v10  ;;  %v930_v15 = vpop.f32.mrb[2].mxu0  ;;  %v986_v16 = vpop.f32.mrb[1].mxu1 }
  0xf9   :  { %v931_v17 = vpop.f32.mrb[3].mxu0  ;;  %v987_v18 = vadd.f32 %v986_v16, %v985_v13  ;;  %v988_v19 = vpop.f32.mrb[2].mxu1 }
  0xfa   :  { %v573_v20 = vadd.f32 %v929_v14, %v1428_v11  ;;  %v932_v21 = vadd.f32 %v931_v17, %v930_v15  ;;  %v989_v22 = vpop.f32.mrb[3].mxu1 }
  0xfb   :  { %v990_v23 = vadd.f32 %v989_v22, %v988_v19 }
  0xfc   :  { %v576_v24 = vadd.f32 %v932_v21, %v1428_v11  ;;  %v1432_v25 = vadd.f32 %v987_v18, %v573_v20 }
  0xfe   :  { %v933_v26 = vpop.f32.mrb[4].mxu0  ;;  %v1434_v27 = vadd.f32 %v990_v23, %v576_v24 }
  0xff   :  { %v934_v28 = vpop.f32.mrb[5].mxu0  ;;  %v991_v29 = vpop.f32.mrb[4].mxu1 }
 0x100   :  { %v935_v30 = vadd.f32 %v934_v28, %v933_v26  ;;  %v936_v31 = vpop.f32.mrb[6].mxu0  ;;  %v992_v32 = vpop.f32.mrb[5].mxu1 }
 0x101   :  { %v937_v33 = vpop.f32.mrb[7].mxu0  ;;  %v993_v34 = vadd.f32 %v992_v32, %v991_v29  ;;  %v994_v35 = vpop.f32.mrb[6].mxu1 }
 0x102   :  { %v581_v36 = vadd.f32 %v935_v30, %v1428_v11  ;;  %v938_v37 = vadd.f32 %v937_v33, %v936_v31  ;;  %v995_v38 = vpop.f32.mrb[7].mxu1 }
 0x103   :  { %v996_v39 = vadd.f32 %v995_v38, %v994_v35 }
 0x104   :  { %v584_v40 = vadd.f32 %v938_v37, %v1428_v11  ;;  %v1438_v41 = vadd.f32 %v993_v34, %v581_v36 }
 0x106   :  { %v939_v42 = vpop.f32.mrb[8].mxu0  ;;  %v1440_v43 = vadd.f32 %v996_v39, %v584_v40 }
 0x107   :  { %v940_v44 = vpop.f32.mrb[9].mxu0  ;;  %v997_v45 = vpop.f32.mrb[8].mxu1 }
 0x108   :  { %v941_v46 = vadd.f32 %v940_v44, %v939_v42  ;;  %v942_v47 = vpop.f32.mrb[10].mxu0  ;;  %v998_v48 = vpop.f32.mrb[9].mxu1 }
 0x109   :  { %v943_v49 = vpop.f32.mrb[11].mxu0  ;;  %v999_v50 = vadd.f32 %v998_v48, %v997_v45  ;;  %v1000_v51 = vpop.f32.mrb[10].mxu1 }
 0x10a   :  { %v589_v52 = vadd.f32 %v941_v46, %v1428_v11  ;;  %v944_v53 = vadd.f32 %v943_v49, %v942_v47  ;;  %v1001_v54 = vpop.f32.mrb[11].mxu1 }
 0x10b   :  { %v1002_v55 = vadd.f32 %v1001_v54, %v1000_v51 }
 0x10c   :  { %v592_v56 = vadd.f32 %v944_v53, %v1428_v11  ;;  %v1444_v57 = vadd.f32 %v999_v50, %v589_v52 }
 0x10e   :  { %v945_v58 = vpop.f32.mrb[12].mxu0  ;;  %v1446_v59 = vadd.f32 %v1002_v55, %v592_v56 }
 0x10f   :  { %v946_v60 = vpop.f32.mrb[13].mxu0  ;;  %v1003_v61 = vpop.f32.mrb[12].mxu1 }
 0x110   :  { %v947_v62 = vadd.f32 %v946_v60, %v945_v58  ;;  %v948_v63 = vpop.f32.mrb[14].mxu0  ;;  %v1004_v0 = vpop.f32.mrb[13].mxu1 }
 0x111   :  { %v949_v1 = vpop.f32.mrb[15].mxu0  ;;  %v1005_v2 = vadd.f32 %v1004_v0, %v1003_v61  ;;  %v1006_v3 = vpop.f32.mrb[14].mxu1 }
 0x112   :  { %v597_v4 = vadd.f32 %v947_v62, %v1428_v11  ;;  %v950_v5 = vadd.f32 %v949_v1, %v948_v63  ;;  %v1007_v6 = vpop.f32.mrb[15].mxu1 }
 0x113   :  { %v1008_v7 = vadd.f32 %v1007_v6, %v1006_v3 }
 0x114   :  { %v600_v8 = vadd.f32 %v950_v5, %v1428_v11  ;;  %v1450_v9 = vadd.f32 %v1005_v2, %v597_v4 }
 0x116   :  { %v951_v10 = vpop.f32.mrb[16].mxu0  ;;  %v1452_v12 = vadd.f32 %v1008_v7, %v600_v8 }
 0x117   :  { %v952_v13 = vpop.f32.mrb[17].mxu0  ;;  %v1009_v14 = vpop.f32.mrb[16].mxu1 }
 0x118   :  { %v953_v15 = vadd.f32 %v952_v13, %v951_v10  ;;  %v954_v16 = vpop.f32.mrb[18].mxu0  ;;  %v1010_v17 = vpop.f32.mrb[17].mxu1 }
 0x119   :  { %v955_v18 = vpop.f32.mrb[19].mxu0  ;;  %v1011_v19 = vadd.f32 %v1010_v17, %v1009_v14  ;;  %v1012_v20 = vpop.f32.mrb[18].mxu1 }
 0x11a   :  { %v605_v21 = vadd.f32 %v953_v15, %v1428_v11  ;;  %v956_v22 = vadd.f32 %v955_v18, %v954_v16  ;;  %v1013_v23 = vpop.f32.mrb[19].mxu1 }
 0x11b   :  { %v1014_v24 = vadd.f32 %v1013_v23, %v1012_v20 }
 0x11c   :  { %v608_v26 = vadd.f32 %v956_v22, %v1428_v11  ;;  %v693_v28 = vadd.f32 %v1011_v19, %v605_v21 }
 0x11e   :  { %v957_v29 = vpop.f32.mrb[20].mxu0  ;;  %v696_v30 = vadd.f32 %v1014_v24, %v608_v26 }
 0x11f   :  { %v958_v31 = vpop.f32.mrb[21].mxu0  ;;  %v1015_v32 = vpop.f32.mrb[20].mxu1 }
 0x120   :  { %v959_v33 = vadd.f32 %v958_v31, %v957_v29  ;;  %v960_v34 = vpop.f32.mrb[22].mxu0  ;;  %v1016_v35 = vpop.f32.mrb[21].mxu1 }
 0x121   :  { %v961_v36 = vpop.f32.mrb[23].mxu0  ;;  %v1017_v37 = vadd.f32 %v1016_v35, %v1015_v32  ;;  %v1018_v38 = vpop.f32.mrb[22].mxu1 }
 0x122   :  { %v613_v39 = vadd.f32 %v959_v33, %v1428_v11  ;;  %v962_v40 = vadd.f32 %v961_v36, %v960_v34  ;;  %v1019_v42 = vpop.f32.mrb[23].mxu1 }
 0x123   :  { %v1020_v44 = vadd.f32 %v1019_v42, %v1018_v38 }
 0x124   :  { %v616_v45 = vadd.f32 %v962_v40, %v1428_v11  ;;  %v701_v46 = vadd.f32 %v1017_v37, %v613_v39 }
 0x126   :  { %v963_v47 = vpop.f32.mrb[24].mxu0  ;;  %v704_v48 = vadd.f32 %v1020_v44, %v616_v45 }
 0x127   :  { %v964_v49 = vpop.f32.mrb[25].mxu0  ;;  %v1021_v50 = vpop.f32.mrb[24].mxu1 }
 0x128   :  { %v965_v51 = vadd.f32 %v964_v49, %v963_v47  ;;  %v966_v52 = vpop.f32.mrb[26].mxu0  ;;  %v1022_v53 = vpop.f32.mrb[25].mxu1 }
 0x129   :  { %v967_v54 = vpop.f32.mrb[27].mxu0  ;;  %v1023_v55 = vadd.f32 %v1022_v53, %v1021_v50  ;;  %v1024_v56 = vpop.f32.mrb[26].mxu1 }
 0x12a   :  { %v621_v58 = vadd.f32 %v965_v51, %v1428_v11  ;;  %v1025_v60 = vpop.f32.mrb[27].mxu1 }
 0x12c   :  { %v709_v61 = vadd.f32 %v1023_v55, %v621_v58 }
 0x12e   :  { %v748_v62 = vpop.f32.mrb[28].mxu0 }
 0x12f   :  { %v749_v63 = vadd.f32 %v748_v62, %v1432_v25  ;;  %v780_v0 = vpop.f32.mrb[28].mxu1  ;;  %v1048_v1 = vpop.f32.mrb[29].mxu0 }
 0x130   :  { %v781_v2 = vadd.f32 %v780_v0, %v693_v28  ;;  %v1064_v3 = vpop.f32.mrb[29].mxu1  ;;  %v751_v4 = vpop.f32.mrb[30].mxu0 }
 0x131   :  { %v802_v5 = vmax.f32 %v749_v63, 0.0  ;;  %v752_v6 = vadd.f32 %v751_v4, %v1434_v27  ;;  %v783_v7 = vpop.f32.mrb[30].mxu1  ;;  %v1049_v8 = vpop.f32.mrb[31].mxu0 }
 0x132   :  { %v810_v10 = vmax.f32 %v781_v2, 0.0  ;;  %v784_v13 = vadd.f32 %v783_v7, %v696_v30  ;;  %v1065_v14 = vpop.f32.mrb[31].mxu1 }
 0x133   :  { %815 = vst [vmem:[%s1509_s3] sm:$0xff] %v802_v5  ;;  %v803_v11 = vmax.f32 %v752_v6, 0.0 }
 0x134   :  { %823 = vst [vmem:[%s1509_s3 + $0x40] sm:$0xff] %v810_v10  ;;  %v811_v25 = vmax.f32 %v784_v13, 0.0 }
 0x135   :  { %816 = vst [vmem:[%s1509_s3 + $0x8] sm:$0xff] %v803_v11 }
 0x136   :  { %824 = vst [vmem:[%s1509_s3 + $0x48] sm:$0xff] %v811_v25  ;;  %v756_v27 = vpop.f32.mrb[32].mxu0 }
 0x137   :  { %v757_v15 = vadd.f32 %v756_v27, %v1438_v41  ;;  %v788_v16 = vpop.f32.mrb[32].mxu1  ;;  %v1052_v17 = vpop.f32.mrb[33].mxu0 }
 0x138   :  { %v789_v18 = vadd.f32 %v788_v16, %v701_v46  ;;  %v1068_v19 = vpop.f32.mrb[33].mxu1  ;;  %v759_v20 = vpop.f32.mrb[34].mxu0 }
 0x139   :  { %v804_v21 = vmax.f32 %v757_v15, 0.0  ;;  %v760_v22 = vadd.f32 %v759_v20, %v1440_v43  ;;  %v791_v23 = vpop.f32.mrb[34].mxu1  ;;  %v1053_v24 = vpop.f32.mrb[35].mxu0 }
 0x13a   :  { %v812_v26 = vmax.f32 %v789_v18, 0.0  ;;  %v792_v28 = vadd.f32 %v791_v23, %v704_v48  ;;  %v1069_v29 = vpop.f32.mrb[35].mxu1 }
 0x13b   :  { %817 = vst [vmem:[%s1509_s3 + $0x10] sm:$0xff] %v804_v21  ;;  %v805_v30 = vmax.f32 %v760_v22, 0.0 }
 0x13c   :  { %825 = vst [vmem:[%s1509_s3 + $0x50] sm:$0xff] %v812_v26  ;;  %v813_v41 = vmax.f32 %v792_v28, 0.0 }
 0x13d   :  { %818 = vst [vmem:[%s1509_s3 + $0x18] sm:$0xff] %v805_v30 }
 0x13e   :  { %826 = vst [vmem:[%s1509_s3 + $0x58] sm:$0xff] %v813_v41  ;;  %v764_v43 = vpop.f32.mrb[36].mxu0 }
 0x13f   :  { %v765_v31 = vadd.f32 %v764_v43, %v1444_v57  ;;  %v796_v32 = vpop.f32.mrb[36].mxu1  ;;  %v1056_v33 = vpop.f32.mrb[37].mxu0 }
 0x140   :  { %v797_v34 = vadd.f32 %v796_v32, %v709_v61  ;;  %v767_v35 = vpop.f32.mrb[38].mxu0  ;;  %v1072_v36 = vpop.f32.mrb[37].mxu1 }
 0x141   :  { %v806_v37 = vmax.f32 %v765_v31, 0.0  ;;  %v768_v38 = vadd.f32 %v767_v35, %v1446_v59  ;;  %v1057_v39 = vpop.f32.mrb[39].mxu0  ;;  %v799_v40 = vpop.f32.mrb[38].mxu1 }
 0x142   :  { %v814_v42 = vmax.f32 %v797_v34, 0.0  ;;  %v1073_v44 = vpop.f32.mrb[39].mxu1 }
 0x143   :  { %819 = vst [vmem:[%s1509_s3 + $0x20] sm:$0xff] %v806_v37  ;;  %v807_v45 = vmax.f32 %v768_v38, 0.0 }
 0x144   :  { %827 = vst [vmem:[%s1509_s3 + $0x60] sm:$0x3] %v814_v42 }
 0x145   :  { %820 = vst [vmem:[%s1509_s3 + $0x28] sm:$0xff] %v807_v45 }
 0x146   :  { %v772_v57 = vpop.f32.mrb[40].mxu0 }
 0x147   :  { %v773_v59 = vadd.f32 %v772_v57, %v1450_v9  ;;  %v1060_v46 = vpop.f32.mrb[41].mxu0 }
 0x148   :  { %v775_v47 = vpop.f32.mrb[42].mxu0 }
 0x149   :  { %v808_v48 = vmax.f32 %v773_v59, 0.0  ;;  %v776_v49 = vadd.f32 %v775_v47, %v1452_v12  ;;  %v1061_v50 = vpop.f32.mrb[43].mxu0 }
 0x14b   :  { %821 = vst [vmem:[%s1509_s3 + $0x30] sm:$0xff] %v808_v48  ;;  %v809_v51 = vmax.f32 %v776_v49, 0.0 }
 0x14d   :  { %822 = vst [vmem:[%s1509_s3 + $0x38] sm:$0xff] %v809_v51 }

// kernel: mnist_cnn_forward.13
= control target key start
LH: loop header
LB: loop body
LE: loop exit
PB: predicated region body
PF: predicated region fallthrough
CT: control target
= control target key end

     0   :  { %v314_v36 = vlaneseq  ;;  %v3518_v37 = vmov 1966171168   ;;  %s4579_s0 = inlined_call_operand.vmem [shape: bf16[2,1152], index: 0, kind: input, shape index: {}]   ;;  %s4580_s1 = inlined_call_operand.vmem [shape: bf16[1152,512], index: 1, kind: input, shape index: {}]   ;;  %s4581_s2 = inlined_call_operand.vmem [shape: f32[1,512], index: 2, kind: input, shape index: {}]   ;;  %s4582_s3 = inlined_call_operand.vmem [shape: bf16[512,128], index: 3, kind: input, shape index: {}]   ;;  %s4583_s4 = inlined_call_operand.vmem [shape: f32[1,128], index: 4, kind: input, shape index: {}]   ;;  %s4584_s5 = inlined_call_operand.hbm [shape: f32[2,128], index: 5, kind: output, shape index: {}]  }
   0x1   :  { %v3029_v0 = vld [vmem:[%s4580_s1 + $0x4] ss:$16 sps:$4 sm:$0xff]   ;;  %v3031_v1 = vld [vmem:[%s4580_s1 + $0xc] ss:$16 sps:$4 sm:$0xff]   ;;  %v3033_v2 = vld [vmem:[%s4580_s1] ss:$16 sps:$4 sm:$0xff]   ;;  %v338_v38 = vunpack.c.l.s4 %v3518_v37 }
   0x2   :  { %1848 = vmatprep.subr.bf16.mxu0 %v3029_v0  ;;  %v3034_v3 = vld [vmem:[%s4580_s1 + $0x8] ss:$16 sps:$4 sm:$0xff]   ;;  %2053 = vmatprep.subr.bf16.mxu1 %v3031_v1  ;;  %v3035_v4 = vld [vmem:[%s4580_s1 + $0x24] ss:$16 sps:$4 sm:$0xff]   ;;  %v3037_v5 = vld [vmem:[%s4580_s1 + $0x2c] ss:$16 sps:$4 sm:$0xff]  }
   0x3   :  { %1849 = vmatpush1.bf16.msra.mxu0 %v3033_v2  ;;  %2054 = vmatpush1.bf16.msra.mxu1 %v3034_v3  ;;  %v3039_v6 = vld [vmem:[%s4580_s1 + $0x20] ss:$16 sps:$4 sm:$0xff]   ;;  %v3040_v7 = vld [vmem:[%s4580_s1 + $0x28] ss:$16 sps:$4 sm:$0xff]   ;;  %v3041_v8 = vld [vmem:[%s4580_s1 + $0x44] ss:$16 sps:$4 sm:$0xff]   ;;  %v339_v43 = vunpack.c.0.s8 %v338_v38 }
   0x4   :  { %1850 = vmatprep.subr.bf16.mxu0 %v3035_v4  ;;  %2055 = vmatprep.subr.bf16.mxu1 %v3037_v5  ;;  %v3043_v9 = vld [vmem:[%s4580_s1 + $0x4c] ss:$16 sps:$4 sm:$0xff]   ;;  %v3045_v10 = vld [vmem:[%s4580_s1 + $0x40] ss:$16 sps:$4 sm:$0xff]   ;;  %v3046_v11 = vld [vmem:[%s4580_s1 + $0x48] ss:$16 sps:$4 sm:$0xff]  }
   0x5   :  { %v3047_v12 = vld [vmem:[%s4580_s1 + $0x64] ss:$16 sps:$4 sm:$0xff]   ;;  %v3049_v13 = vld [vmem:[%s4580_s1 + $0x6c] ss:$16 sps:$4 sm:$0xff]   ;;  %v3051_v14 = vld [vmem:[%s4580_s1 + $0x60] ss:$16 sps:$4 sm:$0xff]  }
   0x6   :  { %v3052_v15 = vld [vmem:[%s4580_s1 + $0x68] ss:$16 sps:$4 sm:$0xff]   ;;  %v3053_v16 = vld [vmem:[%s4580_s1 + $0x84] ss:$16 sps:$4 sm:$0xff]   ;;  %v3055_v17 = vld [vmem:[%s4580_s1 + $0x8c] ss:$16 sps:$4 sm:$0xff]  }
   0x7   :  { %1851 = vmatpush1.bf16.msra.mxu0 %v3039_v6  ;;  %2056 = vmatpush1.bf16.msra.mxu1 %v3040_v7  ;;  %v3057_v18 = vld [vmem:[%s4580_s1 + $0x80] ss:$16 sps:$4 sm:$0xff]   ;;  %v3058_v19 = vld [vmem:[%s4580_s1 + $0x88] ss:$16 sps:$4 sm:$0xff]   ;;  %v3059_v20 = vld [vmem:[%s4580_s1 + $0xa4] ss:$16 sps:$4 sm:$0xff]  }
   0x8   :  { %1852 = vmatprep.subr.bf16.mxu0 %v3041_v8  ;;  %2057 = vmatprep.subr.bf16.mxu1 %v3043_v9  ;;  %v3061_v21 = vld [vmem:[%s4580_s1 + $0xac] ss:$16 sps:$4 sm:$0xff]   ;;  %v3063_v22 = vld [vmem:[%s4580_s1 + $0xa0] ss:$16 sps:$4 sm:$0xff]   ;;  %v3064_v23 = vld [vmem:[%s4580_s1 + $0xa8] ss:$16 sps:$4 sm:$0xff]  }
   0x9   :  { %v3065_v24 = vld [vmem:[%s4580_s1 + $0xc4] ss:$16 sps:$4 sm:$0xff]   ;;  %v3067_v25 = vld [vmem:[%s4580_s1 + $0xcc] ss:$16 sps:$4 sm:$0xff]   ;;  %v3069_v26 = vld [vmem:[%s4580_s1 + $0xc0] ss:$16 sps:$4 sm:$0xff]  }
   0xa   :  { %v3070_v27 = vld [vmem:[%s4580_s1 + $0xc8] ss:$16 sps:$4 sm:$0xff]   ;;  %v3071_v28 = vld [vmem:[%s4580_s1 + $0xe4] ss:$16 sps:$4 sm:$0xff]   ;;  %v3073_v29 = vld [vmem:[%s4580_s1 + $0xec] ss:$16 sps:$4 sm:$0xff]  }
   0xb   :  { %1853 = vmatpush1.bf16.msra.mxu0 %v3045_v10  ;;  %2058 = vmatpush1.bf16.msra.mxu1 %v3046_v11  ;;  %v3075_v30 = vld [vmem:[%s4580_s1 + $0xe0] ss:$16 sps:$4 sm:$0xff]   ;;  %v3076_v31 = vld [vmem:[%s4580_s1 + $0xe8] ss:$16 sps:$4 sm:$0xff]   ;;  %v3077_v32 = vld [vmem:[%s4580_s1 + $0x104] ss:$16 sps:$4 sm:$0xff]  }
   0xc   :  { %1854 = vmatprep.subr.bf16.mxu0 %v3047_v12  ;;  %2059 = vmatprep.subr.bf16.mxu1 %v3049_v13  ;;  %v3079_v33 = vld [vmem:[%s4580_s1 + $0x10c] ss:$16 sps:$4 sm:$0xff]   ;;  %v3081_v34 = vld [vmem:[%s4580_s1 + $0x100] ss:$16 sps:$4 sm:$0xff]   ;;  %v3082_v35 = vld [vmem:[%s4580_s1 + $0x108] ss:$16 sps:$4 sm:$0xff]  }
   0xd   :  { %v3083_v39 = vld [vmem:[%s4580_s1 + $0x124] ss:$16 sps:$4 sm:$0xff]   ;;  %v3085_v40 = vld [vmem:[%s4580_s1 + $0x12c] ss:$16 sps:$4 sm:$0xff]   ;;  %v3087_v41 = vld [vmem:[%s4580_s1 + $0x120] ss:$16 sps:$4 sm:$0xff]  }
   0xe   :  { %v3668_v42 = vshrl.u32 %v314_v36, 7  ;;  %v3088_v44 = vld [vmem:[%s4580_s1 + $0x128] ss:$16 sps:$4 sm:$0xff]   ;;  %v3089_v45 = vld [vmem:[%s4580_s1 + $0x144] ss:$16 sps:$4 sm:$0xff]  }
   0xf   :  { %1855 = vmatpush1.bf16.msra.mxu0 %v3051_v14  ;;  %2060 = vmatpush1.bf16.msra.mxu1 %v3052_v15  ;;  %v3091_v46 = vld [vmem:[%s4580_s1 + $0x14c] ss:$16 sps:$4 sm:$0xff]   ;;  %v3093_v47 = vld [vmem:[%s4580_s1 + $0x140] ss:$16 sps:$4 sm:$0xff]   ;;  %v3094_v48 = vld [vmem:[%s4580_s1 + $0x148] ss:$16 sps:$4 sm:$0xff]  }
  0x10   :  { %1856 = vmatprep.subr.bf16.mxu0 %v3053_v16  ;;  %2061 = vmatprep.subr.bf16.mxu1 %v3055_v17  ;;  %v3686_v49 = vsub.s32 %v339_v43, %v3668_v42  ;;  %v3095_v50 = vld [vmem:[%s4580_s1 + $0x164] ss:$16 sps:$4 sm:$0xff]   ;;  %v3097_v51 = vld [vmem:[%s4580_s1 + $0x16c] ss:$16 sps:$4 sm:$0xff]   ;;  %v3099_v53 = vld [vmem:[%s4580_s1 + $0x160] ss:$16 sps:$4 sm:$0xff]  }
  0x11   :  { %v3697_v52 = vld [vmem:[%s4579_s0] sm:$0xff]  ;;  %v3100_v55 = vld [vmem:[%s4580_s1 + $0x168] ss:$16 sps:$4 sm:$0xff]   ;;  %v3103_v57 = vld [vmem:[%s4580_s1 + $0x18c] ss:$16 sps:$4 sm:$0xff]  }
  0x12   :  { %v343_v54 = vrot.slane %v3697_v52, %v3686_v49  ;;  %v3101_v56 = vld [vmem:[%s4580_s1 + $0x184] ss:$16 sps:$4 sm:$0xff]   ;;  %v3105_v59 = vld [vmem:[%s4580_s1 + $0x180] ss:$16 sps:$4 sm:$0xff]   ;;  %v3106_v61 = vld [vmem:[%s4580_s1 + $0x188] ss:$16 sps:$4 sm:$0xff]  }
  0x13   :  { %1857 = vmatpush1.bf16.msra.mxu0 %v3057_v18  ;;  %2062 = vmatpush1.bf16.msra.mxu1 %v3058_v19  ;;  %v3107_v62 = vld [vmem:[%s4580_s1 + $0x1a4] ss:$16 sps:$4 sm:$0xff]   ;;  %v3109_v63 = vld [vmem:[%s4580_s1 + $0x1ac] ss:$16 sps:$4 sm:$0xff]   ;;  %v3111_v0 = vld [vmem:[%s4580_s1 + $0x1a0] ss:$16 sps:$4 sm:$0xff]  }
  0x14   :  { %1858 = vmatprep.subr.bf16.mxu0 %v3059_v20  ;;  %2063 = vmatprep.subr.bf16.mxu1 %v3061_v21  ;;  %v351_v58 = vcombine.high %v343_v54, %v343_v54  ;;  %v3112_v1 = vld [vmem:[%s4580_s1 + $0x1a8] ss:$16 sps:$4 sm:$0xff]   ;;  %v3113_v2 = vld [vmem:[%s4580_s1 + $0x1c4] ss:$16 sps:$4 sm:$0xff]   ;;  %v3115_v3 = vld [vmem:[%s4580_s1 + $0x1cc] ss:$16 sps:$4 sm:$0xff]   ;;  %v3766_v13 = vrot.slane %v343_v54, %v3686_v49 }
  0x15   :  { %v3117_v4 = vld [vmem:[%s4580_s1 + $0x1c0] ss:$16 sps:$4 sm:$0xff]   ;;  %v3118_v5 = vld [vmem:[%s4580_s1 + $0x1c8] ss:$16 sps:$4 sm:$0xff]   ;;  %v3119_v6 = vld [vmem:[%s4580_s1 + $0x1e4] ss:$16 sps:$4 sm:$0xff]  }
  0x16   :  { %v373_v60 = vrot.slane %v351_v58, %v3686_v49  ;;  %v3121_v7 = vld [vmem:[%s4580_s1 + $0x1ec] ss:$16 sps:$4 sm:$0xff]   ;;  %v3123_v8 = vld [vmem:[%s4580_s1 + $0x1e0] ss:$16 sps:$4 sm:$0xff]   ;;  %v3124_v9 = vld [vmem:[%s4580_s1 + $0x1e8] ss:$16 sps:$4 sm:$0xff]  }
  0x17   :  { %1859 = vmatpush1.bf16.msra.mxu0 %v3063_v22  ;;  %2064 = vmatpush1.bf16.msra.mxu1 %v3064_v23  ;;  %v3127_v10 = vld [vmem:[%s4580_s1 + $0x204] ss:$16 sps:$4 sm:$0xff]   ;;  %v3130_v11 = vld [vmem:[%s4580_s1 + $0x20c] ss:$16 sps:$4 sm:$0xff]   ;;  %v3125_v12 = vld [vmem:[%s4580_s1 + $0x200] ss:$16 sps:$4 sm:$0xff]  }
  0x18   :  { %1860 = vmatprep.subr.bf16.mxu0 %v3065_v24  ;;  %2065 = vmatprep.subr.bf16.mxu1 %v3067_v25  ;;  %v3128_v14 = vld [vmem:[%s4580_s1 + $0x208] ss:$16 sps:$4 sm:$0xff]   ;;  %v3133_v15 = vld [vmem:[%s4580_s1 + $0x224] ss:$16 sps:$4 sm:$0xff]   ;;  %v3136_v16 = vld [vmem:[%s4580_s1 + $0x22c] ss:$16 sps:$4 sm:$0xff]   ;;  %v383_v17 = vcombine.high %v373_v60, %v373_v60 }
  0x19   :  { %1880 = vmatprep.mubr.bf16.mxu0 %v373_v60  ;;  %2085 = vmatprep.mubr.bf16.mxu1 %v373_v60  ;;  %v3131_v18 = vld [vmem:[%s4580_s1 + $0x220] ss:$16 sps:$4 sm:$0xff]   ;;  %v3134_v19 = vld [vmem:[%s4580_s1 + $0x228] ss:$16 sps:$4 sm:$0xff]   ;;  %v3139_v20 = vld [vmem:[%s4580_s1 + $0x244] ss:$16 sps:$4 sm:$0xff]  }
  0x1a   :  { %v3142_v21 = vld [vmem:[%s4580_s1 + $0x24c] ss:$16 sps:$4 sm:$0xff]   ;;  %v3137_v22 = vld [vmem:[%s4580_s1 + $0x240] ss:$16 sps:$4 sm:$0xff]   ;;  %v3140_v23 = vld [vmem:[%s4580_s1 + $0x248] ss:$16 sps:$4 sm:$0xff]  }
  0x1b   :  { %1861 = vmatpush1.bf16.msra.mxu0 %v3069_v26  ;;  %2066 = vmatpush1.bf16.msra.mxu1 %v3070_v27  ;;  %v3145_v24 = vld [vmem:[%s4580_s1 + $0x264] ss:$16 sps:$4 sm:$0xff]   ;;  %v3148_v25 = vld [vmem:[%s4580_s1 + $0x26c] ss:$16 sps:$4 sm:$0xff]   ;;  %v3143_v26 = vld [vmem:[%s4580_s1 + $0x260] ss:$16 sps:$4 sm:$0xff]  }
  0x1c   :  { %1862 = vmatprep.subr.bf16.mxu0 %v3071_v28  ;;  %2067 = vmatprep.subr.bf16.mxu1 %v3073_v29  ;;  %v3146_v27 = vld [vmem:[%s4580_s1 + $0x268] ss:$16 sps:$4 sm:$0xff]   ;;  %v3151_v28 = vld [vmem:[%s4580_s1 + $0x284] ss:$16 sps:$4 sm:$0xff]   ;;  %v3154_v29 = vld [vmem:[%s4580_s1 + $0x28c] ss:$16 sps:$4 sm:$0xff]  }
  0x1d   :  { %v3163_v36 = vld [vmem:[%s4580_s1 + $0x2c4] ss:$16 sps:$4 sm:$0xff]   ;;  %v3166_v37 = vld [vmem:[%s4580_s1 + $0x2cc] ss:$16 sps:$4 sm:$0xff]   ;;  %v3161_v38 = vld [vmem:[%s4580_s1 + $0x2c0] ss:$16 sps:$4 sm:$0xff]  }
  0x1e   :  { %v3167_v43 = vld [vmem:[%s4580_s1 + $0x2e0] ss:$16 sps:$4 sm:$0xff]   ;;  %v3182_v54 = vld [vmem:[%s4580_s1 + $0x328] ss:$16 sps:$4 sm:$0xff]   ;;  %v3196_v60 = vld [vmem:[%s4580_s1 + $0x36c] ss:$16 sps:$4 sm:$0xff]  }
  0x1f   :  { %1863 = vmatpush1.bf16.msra.mxu0 %v3075_v30  ;;  %2068 = vmatpush1.bf16.msra.mxu1 %v3076_v31  ;;  %v3149_v30 = vld [vmem:[%s4580_s1 + $0x280] ss:$16 sps:$4 sm:$0xff]   ;;  %v3152_v31 = vld [vmem:[%s4580_s1 + $0x288] ss:$16 sps:$4 sm:$0xff]  }
  0x20   :  { %1864 = vmatprep.subr.bf16.mxu0 %v3077_v32  ;;  %2069 = vmatprep.subr.bf16.mxu1 %v3079_v33  ;;  %v3157_v32 = vld [vmem:[%s4580_s1 + $0x2a4] ss:$16 sps:$4 sm:$0xff]   ;;  %v3160_v33 = vld [vmem:[%s4580_s1 + $0x2ac] ss:$16 sps:$4 sm:$0xff]   ;;  %v3188_v58 = vld [vmem:[%s4580_s1 + $0x348] ss:$16 sps:$4 sm:$0xff]  }
  0x23   :  { %1865 = vmatpush1.bf16.msra.mxu0 %v3081_v34  ;;  %2070 = vmatpush1.bf16.msra.mxu1 %v3082_v35  ;;  %v3155_v34 = vld [vmem:[%s4580_s1 + $0x2a0] ss:$16 sps:$4 sm:$0xff]   ;;  %v3158_v35 = vld [vmem:[%s4580_s1 + $0x2a8] ss:$16 sps:$4 sm:$0xff]  }
  0x24   :  { %1866 = vmatprep.subr.bf16.mxu0 %v3083_v39  ;;  %2071 = vmatprep.subr.bf16.mxu1 %v3085_v40  ;;  %v3164_v39 = vld [vmem:[%s4580_s1 + $0x2c8] ss:$16 sps:$4 sm:$0xff]   ;;  %v3169_v40 = vld [vmem:[%s4580_s1 + $0x2e4] ss:$16 sps:$4 sm:$0xff]  }
  0x27   :  { %1867 = vmatpush1.bf16.msra.mxu0 %v3087_v41  ;;  %2072 = vmatpush1.bf16.msra.mxu1 %v3088_v44  ;;  %v3172_v41 = vld [vmem:[%s4580_s1 + $0x2ec] ss:$16 sps:$4 sm:$0xff]   ;;  %v3170_v44 = vld [vmem:[%s4580_s1 + $0x2e8] ss:$16 sps:$4 sm:$0xff]  }
  0x28   :  { %1868 = vmatprep.subr.bf16.mxu0 %v3089_v45  ;;  %2073 = vmatprep.subr.bf16.mxu1 %v3091_v46  ;;  %v3175_v45 = vld [vmem:[%s4580_s1 + $0x304] ss:$16 sps:$4 sm:$0xff]   ;;  %v3178_v46 = vld [vmem:[%s4580_s1 + $0x30c] ss:$16 sps:$4 sm:$0xff]  }
  0x2b   :  { %1869 = vmatpush1.bf16.msra.mxu0 %v3093_v47  ;;  %2074 = vmatpush1.bf16.msra.mxu1 %v3094_v48  ;;  %v3173_v47 = vld [vmem:[%s4580_s1 + $0x300] ss:$16 sps:$4 sm:$0xff]   ;;  %v3176_v48 = vld [vmem:[%s4580_s1 + $0x308] ss:$16 sps:$4 sm:$0xff]  }
  0x2c   :  { %1870 = vmatprep.subr.bf16.mxu0 %v3095_v50  ;;  %2075 = vmatprep.subr.bf16.mxu1 %v3097_v51  ;;  %v3181_v50 = vld [vmem:[%s4580_s1 + $0x324] ss:$16 sps:$4 sm:$0xff]   ;;  %v3184_v51 = vld [vmem:[%s4580_s1 + $0x32c] ss:$16 sps:$4 sm:$0xff]  }
  0x2f   :  { %1871 = vmatpush1.bf16.msra.mxu0 %v3099_v53  ;;  %2076 = vmatpush1.bf16.msra.mxu1 %v3100_v55  ;;  %v3179_v53 = vld [vmem:[%s4580_s1 + $0x320] ss:$16 sps:$4 sm:$0xff]   ;;  %v3187_v55 = vld [vmem:[%s4580_s1 + $0x344] ss:$16 sps:$4 sm:$0xff]  }
  0x30   :  { %1872 = vmatprep.subr.bf16.mxu0 %v3101_v56  ;;  %2077 = vmatprep.subr.bf16.mxu1 %v3103_v57  ;;  %v3190_v56 = vld [vmem:[%s4580_s1 + $0x34c] ss:$16 sps:$4 sm:$0xff]   ;;  %v3185_v57 = vld [vmem:[%s4580_s1 + $0x340] ss:$16 sps:$4 sm:$0xff]  }
  0x33   :  { %1873 = vmatpush1.bf16.msra.mxu0 %v3105_v59  ;;  %2078 = vmatpush1.bf16.msra.mxu1 %v3106_v61  ;;  %v3193_v59 = vld [vmem:[%s4580_s1 + $0x364] ss:$16 sps:$4 sm:$0xff]   ;;  %v3191_v61 = vld [vmem:[%s4580_s1 + $0x360] ss:$16 sps:$4 sm:$0xff]  }
  0x34   :  { %1874 = vmatprep.subr.bf16.mxu0 %v3107_v62  ;;  %2079 = vmatprep.subr.bf16.mxu1 %v3109_v63  ;;  %v3194_v62 = vld [vmem:[%s4580_s1 + $0x368] ss:$16 sps:$4 sm:$0xff]   ;;  %v3199_v63 = vld [vmem:[%s4580_s1 + $0x384] ss:$16 sps:$4 sm:$0xff]  }
  0x37   :  { %1875 = vmatpush1.bf16.msra.mxu0 %v3111_v0  ;;  %2080 = vmatpush1.bf16.msra.mxu1 %v3112_v1  ;;  %v3202_v0 = vld [vmem:[%s4580_s1 + $0x38c] ss:$16 sps:$4 sm:$0xff]   ;;  %v3197_v1 = vld [vmem:[%s4580_s1 + $0x380] ss:$16 sps:$4 sm:$0xff]  }
  0x38   :  { %1876 = vmatprep.subr.bf16.mxu0 %v3113_v2  ;;  %2081 = vmatprep.subr.bf16.mxu1 %v3115_v3  ;;  %v3200_v2 = vld [vmem:[%s4580_s1 + $0x388] ss:$16 sps:$4 sm:$0xff]   ;;  %v3205_v3 = vld [vmem:[%s4580_s1 + $0x3a4] ss:$16 sps:$4 sm:$0xff]  }
  0x3b   :  { %1877 = vmatpush1.bf16.msra.mxu0 %v3117_v4  ;;  %2082 = vmatpush1.bf16.msra.mxu1 %v3118_v5  ;;  %v3208_v4 = vld [vmem:[%s4580_s1 + $0x3ac] ss:$16 sps:$4 sm:$0xff]   ;;  %v3203_v5 = vld [vmem:[%s4580_s1 + $0x3a0] ss:$16 sps:$4 sm:$0xff]  }
  0x3c   :  { %1878 = vmatprep.subr.bf16.mxu0 %v3119_v6  ;;  %2083 = vmatprep.subr.bf16.mxu1 %v3121_v7  ;;  %v3206_v6 = vld [vmem:[%s4580_s1 + $0x3a8] ss:$16 sps:$4 sm:$0xff]   ;;  %v3211_v7 = vld [vmem:[%s4580_s1 + $0x3c4] ss:$16 sps:$4 sm:$0xff]  }
  0x3f   :  { %1879 = vmatpush1.bf16.msra.mxu0 %v3123_v8  ;;  %2084 = vmatpush1.bf16.msra.mxu1 %v3124_v9  ;;  %v3214_v8 = vld [vmem:[%s4580_s1 + $0x3cc] ss:$16 sps:$4 sm:$0xff]   ;;  %v336_v9 = vcombine.high %v3697_v52, %v3697_v52 }
  0x40   :  { %1889 = vmatprep.subr.bf16.mxu0 %v3127_v10  ;;  %2094 = vmatprep.subr.bf16.mxu1 %v3130_v11  ;;  %v3209_v10 = vld [vmem:[%s4580_s1 + $0x3c0] ss:$16 sps:$4 sm:$0xff]   ;;  %v3212_v11 = vld [vmem:[%s4580_s1 + $0x3c8] ss:$16 sps:$4 sm:$0xff]   ;;  %v3220_v52 = vld [vmem:[%s4580_s1 + $0x3ec] ss:$16 sps:$4 sm:$0xff]  }
  0x42   :  { %1881 = vmatmul.mubr.bf16.vlgmr.msra.gmra.mrb[0].mxu0 %v3766_v13  ;;  %2086 = vmatmul.mubr.bf16.vlgmr.msra.gmra.mrb[0].mxu1 %v3766_v13 }
  0x43   :  { %1890 = vmatpush1.bf16.msra.mxu0 %v3125_v12  ;;  %2095 = vmatpush1.bf16.msra.mxu1 %v3128_v14  ;;  %v3217_v12 = vld [vmem:[%s4580_s1 + $0x3e4] ss:$16 sps:$4 sm:$0xff]   ;;  %v3950_v14 = vrot.slane %v336_v9, %v3686_v49  ;;  %v3296_v9 = vld [vmem:[%s4580_s1 + $0x588] ss:$16 sps:$4 sm:$0xff]  }
  0x44   :  { %1891 = vmatprep.subr.bf16.mxu0 %v3133_v15  ;;  %2096 = vmatprep.subr.bf16.mxu1 %v3136_v16  ;;  %v3215_v15 = vld [vmem:[%s4580_s1 + $0x3e0] ss:$16 sps:$4 sm:$0xff]   ;;  %v3218_v16 = vld [vmem:[%s4580_s1 + $0x3e8] ss:$16 sps:$4 sm:$0xff]  }
  0x45   :  { %1921 = vmatprep.mubr.bf16.mxu0 %v383_v17  ;;  %2126 = vmatprep.mubr.bf16.mxu1 %v383_v17  ;;  %v3223_v17 = vld [vmem:[%s4580_s1 + $0x404] ss:$16 sps:$4 sm:$0xff]  }
  0x47   :  { %1892 = vmatpush1.bf16.msra.mxu0 %v3131_v18  ;;  %2097 = vmatpush1.bf16.msra.mxu1 %v3134_v19  ;;  %v3226_v18 = vld [vmem:[%s4580_s1 + $0x40c] ss:$16 sps:$4 sm:$0xff]   ;;  %v352_v19 = vcombine.high %v3950_v14, %v3950_v14 }
  0x48   :  { %1893 = vmatprep.subr.bf16.mxu0 %v3139_v20  ;;  %2098 = vmatprep.subr.bf16.mxu1 %v3142_v21  ;;  %v3221_v20 = vld [vmem:[%s4580_s1 + $0x400] ss:$16 sps:$4 sm:$0xff]   ;;  %v381_v21 = vcombine.high %v3766_v13, %v3766_v13 }
  0x49   :  { %v3227_v13 = vld [vmem:[%s4580_s1 + $0x420] ss:$16 sps:$4 sm:$0xff]  }
  0x4b   :  { %1894 = vmatpush1.bf16.msra.mxu0 %v3137_v22  ;;  %2099 = vmatpush1.bf16.msra.mxu1 %v3140_v23  ;;  %v3224_v22 = vld [vmem:[%s4580_s1 + $0x408] ss:$16 sps:$4 sm:$0xff]   ;;  %v3229_v23 = vld [vmem:[%s4580_s1 + $0x424] ss:$16 sps:$4 sm:$0xff]  }
  0x4c   :  { %1895 = vmatprep.subr.bf16.mxu0 %v3145_v24  ;;  %2100 = vmatprep.subr.bf16.mxu1 %v3148_v25  ;;  %v3232_v24 = vld [vmem:[%s4580_s1 + $0x42c] ss:$16 sps:$4 sm:$0xff]   ;;  %v3981_v25 = vrot.slane %v352_v19, %v3686_v49  ;;  %v3313_v19 = vld [vmem:[%s4580_s1 + $0x5e4] ss:$16 sps:$4 sm:$0xff]  }
  0x4f   :  { %1896 = vmatpush1.bf16.msra.mxu0 %v3143_v26  ;;  %2101 = vmatpush1.bf16.msra.mxu1 %v3146_v27  ;;  %v3230_v26 = vld [vmem:[%s4580_s1 + $0x428] ss:$16 sps:$4 sm:$0xff]   ;;  %v3235_v27 = vld [vmem:[%s4580_s1 + $0x444] ss:$16 sps:$4 sm:$0xff]  }
  0x50   :  { %1897 = vmatprep.subr.bf16.mxu0 %v3151_v28  ;;  %2102 = vmatprep.subr.bf16.mxu1 %v3154_v29  ;;  %v3238_v28 = vld [vmem:[%s4580_s1 + $0x44c] ss:$16 sps:$4 sm:$0xff]   ;;  %v3233_v29 = vld [vmem:[%s4580_s1 + $0x440] ss:$16 sps:$4 sm:$0xff]  }
  0x53   :  { %1898 = vmatpush1.bf16.msra.mxu0 %v3149_v30  ;;  %2103 = vmatpush1.bf16.msra.mxu1 %v3152_v31  ;;  %v3236_v30 = vld [vmem:[%s4580_s1 + $0x448] ss:$16 sps:$4 sm:$0xff]   ;;  %v3241_v31 = vld [vmem:[%s4580_s1 + $0x464] ss:$16 sps:$4 sm:$0xff]  }
  0x54   :  { %1899 = vmatprep.subr.bf16.mxu0 %v3157_v32  ;;  %2104 = vmatprep.subr.bf16.mxu1 %v3160_v33  ;;  %v3244_v32 = vld [vmem:[%s4580_s1 + $0x46c] ss:$16 sps:$4 sm:$0xff]   ;;  %v3239_v33 = vld [vmem:[%s4580_s1 + $0x460] ss:$16 sps:$4 sm:$0xff]  }
  0x57   :  { %1900 = vmatpush1.bf16.msra.mxu0 %v3155_v34  ;;  %2105 = vmatpush1.bf16.msra.mxu1 %v3158_v35  ;;  %v3242_v34 = vld [vmem:[%s4580_s1 + $0x468] ss:$16 sps:$4 sm:$0xff]   ;;  %v3247_v35 = vld [vmem:[%s4580_s1 + $0x484] ss:$16 sps:$4 sm:$0xff]  }
  0x58   :  { %1901 = vmatprep.subr.bf16.mxu0 %v3163_v36  ;;  %2106 = vmatprep.subr.bf16.mxu1 %v3166_v37  ;;  %v3250_v36 = vld [vmem:[%s4580_s1 + $0x48c] ss:$16 sps:$4 sm:$0xff]   ;;  %v3245_v37 = vld [vmem:[%s4580_s1 + $0x480] ss:$16 sps:$4 sm:$0xff]  }
  0x5b   :  { %1902 = vmatpush1.bf16.msra.mxu0 %v3161_v38  ;;  %2107 = vmatpush1.bf16.msra.mxu1 %v3164_v39  ;;  %v3248_v38 = vld [vmem:[%s4580_s1 + $0x488] ss:$16 sps:$4 sm:$0xff]   ;;  %v3253_v39 = vld [vmem:[%s4580_s1 + $0x4a4] ss:$16 sps:$4 sm:$0xff]  }
  0x5c   :  { %1903 = vmatprep.subr.bf16.mxu0 %v3169_v40  ;;  %2108 = vmatprep.subr.bf16.mxu1 %v3172_v41  ;;  %v3256_v40 = vld [vmem:[%s4580_s1 + $0x4ac] ss:$16 sps:$4 sm:$0xff]   ;;  %v3251_v41 = vld [vmem:[%s4580_s1 + $0x4a0] ss:$16 sps:$4 sm:$0xff]  }
  0x5f   :  { %1904 = vmatpush1.bf16.msra.mxu0 %v3167_v43  ;;  %2109 = vmatpush1.bf16.msra.mxu1 %v3170_v44  ;;  %v3254_v43 = vld [vmem:[%s4580_s1 + $0x4a8] ss:$16 sps:$4 sm:$0xff]   ;;  %v3259_v44 = vld [vmem:[%s4580_s1 + $0x4c4] ss:$16 sps:$4 sm:$0xff]  }
  0x60   :  { %1905 = vmatprep.subr.bf16.mxu0 %v3175_v45  ;;  %2110 = vmatprep.subr.bf16.mxu1 %v3178_v46  ;;  %v3262_v45 = vld [vmem:[%s4580_s1 + $0x4cc] ss:$16 sps:$4 sm:$0xff]   ;;  %v3257_v46 = vld [vmem:[%s4580_s1 + $0x4c0] ss:$16 sps:$4 sm:$0xff]  }
  0x63   :  { %1906 = vmatpush1.bf16.msra.mxu0 %v3173_v47  ;;  %2111 = vmatpush1.bf16.msra.mxu1 %v3176_v48  ;;  %v3260_v47 = vld [vmem:[%s4580_s1 + $0x4c8] ss:$16 sps:$4 sm:$0xff]   ;;  %v3265_v48 = vld [vmem:[%s4580_s1 + $0x4e4] ss:$16 sps:$4 sm:$0xff]  }
  0x64   :  { %1907 = vmatprep.subr.bf16.mxu0 %v3181_v50  ;;  %2112 = vmatprep.subr.bf16.mxu1 %v3184_v51  ;;  %v3268_v50 = vld [vmem:[%s4580_s1 + $0x4ec] ss:$16 sps:$4 sm:$0xff]   ;;  %v3263_v51 = vld [vmem:[%s4580_s1 + $0x4e0] ss:$16 sps:$4 sm:$0xff]  }
  0x67   :  { %1908 = vmatpush1.bf16.msra.mxu0 %v3179_v53  ;;  %2113 = vmatpush1.bf16.msra.mxu1 %v3182_v54  ;;  %v3266_v53 = vld [vmem:[%s4580_s1 + $0x4e8] ss:$16 sps:$4 sm:$0xff]   ;;  %v3271_v54 = vld [vmem:[%s4580_s1 + $0x504] ss:$16 sps:$4 sm:$0xff]  }
  0x68   :  { %1909 = vmatprep.subr.bf16.mxu0 %v3187_v55  ;;  %2114 = vmatprep.subr.bf16.mxu1 %v3190_v56  ;;  %v3274_v55 = vld [vmem:[%s4580_s1 + $0x50c] ss:$16 sps:$4 sm:$0xff]   ;;  %v3269_v56 = vld [vmem:[%s4580_s1 + $0x500] ss:$16 sps:$4 sm:$0xff]  }
  0x6b   :  { %1910 = vmatpush1.bf16.msra.mxu0 %v3185_v57  ;;  %2115 = vmatpush1.bf16.msra.mxu1 %v3188_v58  ;;  %v3272_v57 = vld [vmem:[%s4580_s1 + $0x508] ss:$16 sps:$4 sm:$0xff]   ;;  %v3277_v58 = vld [vmem:[%s4580_s1 + $0x524] ss:$16 sps:$4 sm:$0xff]  }
  0x6c   :  { %1911 = vmatprep.subr.bf16.mxu0 %v3193_v59  ;;  %2116 = vmatprep.subr.bf16.mxu1 %v3196_v60  ;;  %v3280_v59 = vld [vmem:[%s4580_s1 + $0x52c] ss:$16 sps:$4 sm:$0xff]   ;;  %v3275_v60 = vld [vmem:[%s4580_s1 + $0x520] ss:$16 sps:$4 sm:$0xff]  }
  0x6f   :  { %1912 = vmatpush1.bf16.msra.mxu0 %v3191_v61  ;;  %2117 = vmatpush1.bf16.msra.mxu1 %v3194_v62  ;;  %v3278_v61 = vld [vmem:[%s4580_s1 + $0x528] ss:$16 sps:$4 sm:$0xff]   ;;  %v3283_v62 = vld [vmem:[%s4580_s1 + $0x544] ss:$16 sps:$4 sm:$0xff]  }
  0x70   :  { %1913 = vmatprep.subr.bf16.mxu0 %v3199_v63  ;;  %2118 = vmatprep.subr.bf16.mxu1 %v3202_v0  ;;  %v3286_v63 = vld [vmem:[%s4580_s1 + $0x54c] ss:$16 sps:$4 sm:$0xff]   ;;  %v3281_v0 = vld [vmem:[%s4580_s1 + $0x540] ss:$16 sps:$4 sm:$0xff]  }
  0x73   :  { %1914 = vmatpush1.bf16.msra.mxu0 %v3197_v1  ;;  %2119 = vmatpush1.bf16.msra.mxu1 %v3200_v2  ;;  %v3284_v1 = vld [vmem:[%s4580_s1 + $0x548] ss:$16 sps:$4 sm:$0xff]   ;;  %v3289_v2 = vld [vmem:[%s4580_s1 + $0x564] ss:$16 sps:$4 sm:$0xff]  }
  0x74   :  { %1915 = vmatprep.subr.bf16.mxu0 %v3205_v3  ;;  %2120 = vmatprep.subr.bf16.mxu1 %v3208_v4  ;;  %v3292_v3 = vld [vmem:[%s4580_s1 + $0x56c] ss:$16 sps:$4 sm:$0xff]   ;;  %v3287_v4 = vld [vmem:[%s4580_s1 + $0x560] ss:$16 sps:$4 sm:$0xff]  }
  0x77   :  { %1916 = vmatpush1.bf16.msra.mxu0 %v3203_v5  ;;  %2121 = vmatpush1.bf16.msra.mxu1 %v3206_v6  ;;  %v3290_v5 = vld [vmem:[%s4580_s1 + $0x568] ss:$16 sps:$4 sm:$0xff]   ;;  %v3295_v6 = vld [vmem:[%s4580_s1 + $0x584] ss:$16 sps:$4 sm:$0xff]  }
  0x78   :  { %1917 = vmatprep.subr.bf16.mxu0 %v3211_v7  ;;  %2122 = vmatprep.subr.bf16.mxu1 %v3214_v8  ;;  %v3298_v7 = vld [vmem:[%s4580_s1 + $0x58c] ss:$16 sps:$4 sm:$0xff]   ;;  %v3293_v8 = vld [vmem:[%s4580_s1 + $0x580] ss:$16 sps:$4 sm:$0xff]  }
  0x7b   :  { %1918 = vmatpush1.bf16.msra.mxu0 %v3209_v10  ;;  %2123 = vmatpush1.bf16.msra.mxu1 %v3212_v11  ;;  %v3301_v10 = vld [vmem:[%s4580_s1 + $0x5a4] ss:$16 sps:$4 sm:$0xff]   ;;  %v3304_v11 = vld [vmem:[%s4580_s1 + $0x5ac] ss:$16 sps:$4 sm:$0xff]  }
  0x7c   :  { %1919 = vmatprep.subr.bf16.mxu0 %v3217_v12  ;;  %2124 = vmatprep.subr.bf16.mxu1 %v3220_v52  ;;  %v3299_v12 = vld [vmem:[%s4580_s1 + $0x5a0] ss:$16 sps:$4 sm:$0xff]   ;;  %v3302_v52 = vld [vmem:[%s4580_s1 + $0x5a8] ss:$16 sps:$4 sm:$0xff]  }
  0x7f   :  { %1920 = vmatpush1.bf16.msra.mxu0 %v3215_v15  ;;  %2125 = vmatpush1.bf16.msra.mxu1 %v3218_v16  ;;  %v3307_v15 = vld [vmem:[%s4580_s1 + $0x5c4] ss:$16 sps:$4 sm:$0xff]   ;;  %v3310_v16 = vld [vmem:[%s4580_s1 + $0x5cc] ss:$16 sps:$4 sm:$0xff]  }
  0x80   :  { %1930 = vmatprep.subr.bf16.mxu0 %v3223_v17  ;;  %2135 = vmatprep.subr.bf16.mxu1 %v3226_v18  ;;  %v3305_v17 = vld [vmem:[%s4580_s1 + $0x5c0] ss:$16 sps:$4 sm:$0xff]   ;;  %v3308_v18 = vld [vmem:[%s4580_s1 + $0x5c8] ss:$16 sps:$4 sm:$0xff]  }
  0x82   :  { %1922 = vmatmul.mubr.bf16.vlgmr.msra.gmra.mrb[0].mxu0 %v381_v21  ;;  %2127 = vmatmul.mubr.bf16.vlgmr.msra.gmra.mrb[0].mxu1 %v381_v21  ;;  %v3311_v21 = vld [vmem:[%s4580_s1 + $0x5e0] ss:$16 sps:$4 sm:$0xff]  }
  0x83   :  { %1931 = vmatpush1.bf16.msra.mxu0 %v3221_v20  ;;  %2136 = vmatpush1.bf16.msra.mxu1 %v3224_v22  ;;  %v3316_v20 = vld [vmem:[%s4580_s1 + $0x5ec] ss:$16 sps:$4 sm:$0xff]   ;;  %v3314_v22 = vld [vmem:[%s4580_s1 + $0x5e8] ss:$16 sps:$4 sm:$0xff]  }
  0x84   :  { %1932 = vmatprep.subr.bf16.mxu0 %v3229_v23  ;;  %2137 = vmatprep.subr.bf16.mxu1 %v3232_v24  ;;  %v3320_v23 = vld [vmem:[%s4580_s1 + $0x604] ss:$16 sps:$4 sm:$0xff]   ;;  %v3323_v24 = vld [vmem:[%s4580_s1 + $0x60c] ss:$16 sps:$4 sm:$0xff]  }
  0x85   :  { %1962 = vmatprep.mubr.bf16.mxu0 %v3981_v25  ;;  %2167 = vmatprep.mubr.bf16.mxu1 %v3981_v25 }
  0x87   :  { %1933 = vmatpush1.bf16.msra.mxu0 %v3227_v13  ;;  %2138 = vmatpush1.bf16.msra.mxu1 %v3230_v26  ;;  %v4167_v13 = vrot.slane %v3950_v14, %v3686_v49  ;;  %v3318_v26 = vld [vmem:[%s4580_s1 + $0x600] ss:$16 sps:$4 sm:$0xff]   ;;  %v3329_v14 = vld [vmem:[%s4580_s1 + $0x62c] ss:$16 sps:$4 sm:$0xff]  }
  0x88   :  { %1934 = vmatprep.subr.bf16.mxu0 %v3235_v27  ;;  %2139 = vmatprep.subr.bf16.mxu1 %v3238_v28  ;;  %v3321_v27 = vld [vmem:[%s4580_s1 + $0x608] ss:$16 sps:$4 sm:$0xff]   ;;  %v3326_v28 = vld [vmem:[%s4580_s1 + $0x624] ss:$16 sps:$4 sm:$0xff]  }
  0x8b   :  { %1935 = vmatpush1.bf16.msra.mxu0 %v3233_v29  ;;  %2140 = vmatpush1.bf16.msra.mxu1 %v3236_v30  ;;  %v3324_v29 = vld [vmem:[%s4580_s1 + $0x620] ss:$16 sps:$4 sm:$0xff]   ;;  %v384_v30 = vcombine.high %v3981_v25, %v3981_v25  ;;  %v3335_v25 = vld [vmem:[%s4580_s1 + $0x64c] ss:$16 sps:$4 sm:$0xff]  }
  0x8c   :  { %1936 = vmatprep.subr.bf16.mxu0 %v3241_v31  ;;  %2141 = vmatprep.subr.bf16.mxu1 %v3244_v32  ;;  %v3327_v31 = vld [vmem:[%s4580_s1 + $0x628] ss:$16 sps:$4 sm:$0xff]   ;;  %v3332_v32 = vld [vmem:[%s4580_s1 + $0x644] ss:$16 sps:$4 sm:$0xff]  }
  0x8f   :  { %1937 = vmatpush1.bf16.msra.mxu0 %v3239_v33  ;;  %2142 = vmatpush1.bf16.msra.mxu1 %v3242_v34  ;;  %v3330_v33 = vld [vmem:[%s4580_s1 + $0x640] ss:$16 sps:$4 sm:$0xff]   ;;  %v3333_v34 = vld [vmem:[%s4580_s1 + $0x648] ss:$16 sps:$4 sm:$0xff]  }
  0x90   :  { %1938 = vmatprep.subr.bf16.mxu0 %v3247_v35  ;;  %2143 = vmatprep.subr.bf16.mxu1 %v3250_v36  ;;  %v3338_v35 = vld [vmem:[%s4580_s1 + $0x664] ss:$16 sps:$4 sm:$0xff]   ;;  %v3341_v36 = vld [vmem:[%s4580_s1 + $0x66c] ss:$16 sps:$4 sm:$0xff]  }
  0x93   :  { %1939 = vmatpush1.bf16.msra.mxu0 %v3245_v37  ;;  %2144 = vmatpush1.bf16.msra.mxu1 %v3248_v38  ;;  %v3336_v37 = vld [vmem:[%s4580_s1 + $0x660] ss:$16 sps:$4 sm:$0xff]   ;;  %v3339_v38 = vld [vmem:[%s4580_s1 + $0x668] ss:$16 sps:$4 sm:$0xff]  }
  0x94   :  { %1940 = vmatprep.subr.bf16.mxu0 %v3253_v39  ;;  %2145 = vmatprep.subr.bf16.mxu1 %v3256_v40  ;;  %v3344_v39 = vld [vmem:[%s4580_s1 + $0x684] ss:$16 sps:$4 sm:$0xff]   ;;  %v3347_v40 = vld [vmem:[%s4580_s1 + $0x68c] ss:$16 sps:$4 sm:$0xff]  }
  0x97   :  { %1941 = vmatpush1.bf16.msra.mxu0 %v3251_v41  ;;  %2146 = vmatpush1.bf16.msra.mxu1 %v3254_v43  ;;  %v3342_v41 = vld [vmem:[%s4580_s1 + $0x680] ss:$16 sps:$4 sm:$0xff]   ;;  %v3345_v43 = vld [vmem:[%s4580_s1 + $0x688] ss:$16 sps:$4 sm:$0xff]  }
  0x98   :  { %1942 = vmatprep.subr.bf16.mxu0 %v3259_v44  ;;  %2147 = vmatprep.subr.bf16.mxu1 %v3262_v45  ;;  %v3350_v44 = vld [vmem:[%s4580_s1 + $0x6a4] ss:$16 sps:$4 sm:$0xff]   ;;  %v3353_v45 = vld [vmem:[%s4580_s1 + $0x6ac] ss:$16 sps:$4 sm:$0xff]  }
  0x9b   :  { %1943 = vmatpush1.bf16.msra.mxu0 %v3257_v46  ;;  %2148 = vmatpush1.bf16.msra.mxu1 %v3260_v47  ;;  %v3348_v46 = vld [vmem:[%s4580_s1 + $0x6a0] ss:$16 sps:$4 sm:$0xff]   ;;  %v3351_v47 = vld [vmem:[%s4580_s1 + $0x6a8] ss:$16 sps:$4 sm:$0xff]  }
  0x9c   :  { %1944 = vmatprep.subr.bf16.mxu0 %v3265_v48  ;;  %2149 = vmatprep.subr.bf16.mxu1 %v3268_v50  ;;  %v3356_v48 = vld [vmem:[%s4580_s1 + $0x6c4] ss:$16 sps:$4 sm:$0xff]   ;;  %v3359_v50 = vld [vmem:[%s4580_s1 + $0x6cc] ss:$16 sps:$4 sm:$0xff]  }
  0x9f   :  { %1945 = vmatpush1.bf16.msra.mxu0 %v3263_v51  ;;  %2150 = vmatpush1.bf16.msra.mxu1 %v3266_v53  ;;  %v3354_v51 = vld [vmem:[%s4580_s1 + $0x6c0] ss:$16 sps:$4 sm:$0xff]   ;;  %v3357_v53 = vld [vmem:[%s4580_s1 + $0x6c8] ss:$16 sps:$4 sm:$0xff]  }
  0xa0   :  { %1946 = vmatprep.subr.bf16.mxu0 %v3271_v54  ;;  %2151 = vmatprep.subr.bf16.mxu1 %v3274_v55  ;;  %v3362_v54 = vld [vmem:[%s4580_s1 + $0x6e4] ss:$16 sps:$4 sm:$0xff]   ;;  %v3365_v55 = vld [vmem:[%s4580_s1 + $0x6ec] ss:$16 sps:$4 sm:$0xff]  }
  0xa3   :  { %1947 = vmatpush1.bf16.msra.mxu0 %v3269_v56  ;;  %2152 = vmatpush1.bf16.msra.mxu1 %v3272_v57  ;;  %v3360_v56 = vld [vmem:[%s4580_s1 + $0x6e0] ss:$16 sps:$4 sm:$0xff]   ;;  %v3363_v57 = vld [vmem:[%s4580_s1 + $0x6e8] ss:$16 sps:$4 sm:$0xff]  }
  0xa4   :  { %1948 = vmatprep.subr.bf16.mxu0 %v3277_v58  ;;  %2153 = vmatprep.subr.bf16.mxu1 %v3280_v59  ;;  %v3368_v58 = vld [vmem:[%s4580_s1 + $0x704] ss:$16 sps:$4 sm:$0xff]   ;;  %v3371_v59 = vld [vmem:[%s4580_s1 + $0x70c] ss:$16 sps:$4 sm:$0xff]  }
  0xa7   :  { %1949 = vmatpush1.bf16.msra.mxu0 %v3275_v60  ;;  %2154 = vmatpush1.bf16.msra.mxu1 %v3278_v61 }
  0xa8   :  { %1950 = vmatprep.subr.bf16.mxu0 %v3283_v62  ;;  %2155 = vmatprep.subr.bf16.mxu1 %v3286_v63 }
  0xab   :  { %1951 = vmatpush1.bf16.msra.mxu0 %v3281_v0  ;;  %2156 = vmatpush1.bf16.msra.mxu1 %v3284_v1 }
  0xac   :  { %1952 = vmatprep.subr.bf16.mxu0 %v3289_v2  ;;  %2157 = vmatprep.subr.bf16.mxu1 %v3292_v3 }
  0xaf   :  { %1953 = vmatpush1.bf16.msra.mxu0 %v3287_v4  ;;  %2158 = vmatpush1.bf16.msra.mxu1 %v3290_v5 }
  0xb0   :  { %1954 = vmatprep.subr.bf16.mxu0 %v3295_v6  ;;  %2159 = vmatprep.subr.bf16.mxu1 %v3298_v7 }
  0xb3   :  { %1955 = vmatpush1.bf16.msra.mxu0 %v3293_v8  ;;  %2160 = vmatpush1.bf16.msra.mxu1 %v3296_v9 }
  0xb4   :  { %1956 = vmatprep.subr.bf16.mxu0 %v3301_v10  ;;  %2161 = vmatprep.subr.bf16.mxu1 %v3304_v11 }
  0xb7   :  { %1957 = vmatpush1.bf16.msra.mxu0 %v3299_v12  ;;  %2162 = vmatpush1.bf16.msra.mxu1 %v3302_v52 }
  0xb8   :  { %1958 = vmatprep.subr.bf16.mxu0 %v3307_v15  ;;  %2163 = vmatprep.subr.bf16.mxu1 %v3310_v16 }
  0xbb   :  { %1959 = vmatpush1.bf16.msra.mxu0 %v3305_v17  ;;  %2164 = vmatpush1.bf16.msra.mxu1 %v3308_v18 }
  0xbc   :  { %1960 = vmatprep.subr.bf16.mxu0 %v3313_v19  ;;  %2165 = vmatprep.subr.bf16.mxu1 %v3316_v20 }
  0xbf   :  { %1961 = vmatpush1.bf16.msra.mxu0 %v3311_v21  ;;  %2166 = vmatpush1.bf16.msra.mxu1 %v3314_v22 }
  0xc0   :  { %1971 = vmatprep.subr.bf16.mxu0 %v3320_v23  ;;  %2176 = vmatprep.subr.bf16.mxu1 %v3323_v24 }
  0xc2   :  { %1963 = vmatmul.mubr.bf16.vlgmr.msra.gmra.mrb[0].mxu0 %v4167_v13  ;;  %2168 = vmatmul.mubr.bf16.vlgmr.msra.gmra.mrb[0].mxu1 %v4167_v13 }
  0xc3   :  { %1972 = vmatpush1.bf16.msra.mxu0 %v3318_v26  ;;  %2177 = vmatpush1.bf16.msra.mxu1 %v3321_v27 }
  0xc4   :  { %1973 = vmatprep.subr.bf16.mxu0 %v3326_v28  ;;  %2178 = vmatprep.subr.bf16.mxu1 %v3329_v14 }
  0xc5   :  { %2003 = vmatprep.mubr.bf16.mxu0 %v384_v30  ;;  %2208 = vmatprep.mubr.bf16.mxu1 %v384_v30 }
  0xc7   :  { %1974 = vmatpush1.bf16.msra.mxu0 %v3324_v29  ;;  %2179 = vmatpush1.bf16.msra.mxu1 %v3327_v31 }
  0xc8   :  { %1975 = vmatprep.subr.bf16.mxu0 %v3332_v32  ;;  %2180 = vmatprep.subr.bf16.mxu1 %v3335_v25 }
  0xcb   :  { %1976 = vmatpush1.bf16.msra.mxu0 %v3330_v33  ;;  %2181 = vmatpush1.bf16.msra.mxu1 %v3333_v34 }
  0xcc   :  { %1977 = vmatprep.subr.bf16.mxu0 %v3338_v35  ;;  %2182 = vmatprep.subr.bf16.mxu1 %v3341_v36 }
  0xcf   :  { %1978 = vmatpush1.bf16.msra.mxu0 %v3336_v37  ;;  %2183 = vmatpush1.bf16.msra.mxu1 %v3339_v38 }
  0xd0   :  { %1979 = vmatprep.subr.bf16.mxu0 %v3344_v39  ;;  %2184 = vmatprep.subr.bf16.mxu1 %v3347_v40 }
  0xd3   :  { %1980 = vmatpush1.bf16.msra.mxu0 %v3342_v41  ;;  %2185 = vmatpush1.bf16.msra.mxu1 %v3345_v43 }
  0xd4   :  { %1981 = vmatprep.subr.bf16.mxu0 %v3350_v44  ;;  %2186 = vmatprep.subr.bf16.mxu1 %v3353_v45 }
  0xd7   :  { %1982 = vmatpush1.bf16.msra.mxu0 %v3348_v46  ;;  %2187 = vmatpush1.bf16.msra.mxu1 %v3351_v47 }
  0xd8   :  { %1983 = vmatprep.subr.bf16.mxu0 %v3356_v48  ;;  %2188 = vmatprep.subr.bf16.mxu1 %v3359_v50 }
  0xdb   :  { %1984 = vmatpush1.bf16.msra.mxu0 %v3354_v51  ;;  %2189 = vmatpush1.bf16.msra.mxu1 %v3357_v53 }
  0xdc   :  { %1985 = vmatprep.subr.bf16.mxu0 %v3362_v54  ;;  %2190 = vmatprep.subr.bf16.mxu1 %v3365_v55 }
  0xdd   :  { %10 = vsyncpa [#allocation3], 0  ;;  %v3366_v60 = vld [vmem:[%s4580_s1 + $0x700] ss:$16 sps:$4 sm:$0xff]   ;;  %v3369_v61 = vld [vmem:[%s4580_s1 + $0x708] ss:$16 sps:$4 sm:$0xff]   ;;  %v382_v29 = vcombine.high %v4167_v13, %v4167_v13 }
  0xde   :  { %v3374_v62 = vld [vmem:[%s4580_s1 + $0x724] ss:$16 sps:$4 sm:$0xff]   ;;  %v3377_v63 = vld [vmem:[%s4580_s1 + $0x72c] ss:$16 sps:$4 sm:$0xff]   ;;  %v3372_v0 = vld [vmem:[%s4580_s1 + $0x720] ss:$16 sps:$4 sm:$0xff]  }
  0xdf   :  { %1986 = vmatpush1.bf16.msra.mxu0 %v3360_v56  ;;  %2191 = vmatpush1.bf16.msra.mxu1 %v3363_v57  ;;  %v3375_v1 = vld [vmem:[%s4580_s1 + $0x728] ss:$16 sps:$4 sm:$0xff]   ;;  %v3380_v2 = vld [vmem:[%s4580_s1 + $0x744] ss:$16 sps:$4 sm:$0xff]   ;;  %v3383_v3 = vld [vmem:[%s4580_s1 + $0x74c] ss:$16 sps:$4 sm:$0xff]  }
  0xe0   :  { %1987 = vmatprep.subr.bf16.mxu0 %v3368_v58  ;;  %2192 = vmatprep.subr.bf16.mxu1 %v3371_v59  ;;  %v3378_v4 = vld [vmem:[%s4580_s1 + $0x740] ss:$16 sps:$4 sm:$0xff]   ;;  %v3381_v5 = vld [vmem:[%s4580_s1 + $0x748] ss:$16 sps:$4 sm:$0xff]   ;;  %v3386_v6 = vld [vmem:[%s4580_s1 + $0x764] ss:$16 sps:$4 sm:$0xff]  }
  0xe1   :  { %v3389_v7 = vld [vmem:[%s4580_s1 + $0x76c] ss:$16 sps:$4 sm:$0xff]   ;;  %v3384_v8 = vld [vmem:[%s4580_s1 + $0x760] ss:$16 sps:$4 sm:$0xff]   ;;  %v3387_v9 = vld [vmem:[%s4580_s1 + $0x768] ss:$16 sps:$4 sm:$0xff]  }
  0xe2   :  { %v3392_v10 = vld [vmem:[%s4580_s1 + $0x784] ss:$16 sps:$4 sm:$0xff]   ;;  %v3395_v11 = vld [vmem:[%s4580_s1 + $0x78c] ss:$16 sps:$4 sm:$0xff]   ;;  %v3390_v12 = vld [vmem:[%s4580_s1 + $0x780] ss:$16 sps:$4 sm:$0xff]  }
  0xe3   :  { %1988 = vmatpush1.bf16.msra.mxu0 %v3366_v60  ;;  %2193 = vmatpush1.bf16.msra.mxu1 %v3369_v61  ;;  %v3393_v52 = vld [vmem:[%s4580_s1 + $0x788] ss:$16 sps:$4 sm:$0xff]   ;;  %v3398_v15 = vld [vmem:[%s4580_s1 + $0x7a4] ss:$16 sps:$4 sm:$0xff]   ;;  %v3401_v16 = vld [vmem:[%s4580_s1 + $0x7ac] ss:$16 sps:$4 sm:$0xff]  }
  0xe4   :  { %1989 = vmatprep.subr.bf16.mxu0 %v3374_v62  ;;  %2194 = vmatprep.subr.bf16.mxu1 %v3377_v63  ;;  %v3396_v17 = vld [vmem:[%s4580_s1 + $0x7a0] ss:$16 sps:$4 sm:$0xff]   ;;  %v3399_v18 = vld [vmem:[%s4580_s1 + $0x7a8] ss:$16 sps:$4 sm:$0xff]   ;;  %v3404_v19 = vld [vmem:[%s4580_s1 + $0x7c4] ss:$16 sps:$4 sm:$0xff]  }
  0xe5   :  { %v3407_v20 = vld [vmem:[%s4580_s1 + $0x7cc] ss:$16 sps:$4 sm:$0xff]   ;;  %v3402_v21 = vld [vmem:[%s4580_s1 + $0x7c0] ss:$16 sps:$4 sm:$0xff]   ;;  %v3405_v22 = vld [vmem:[%s4580_s1 + $0x7c8] ss:$16 sps:$4 sm:$0xff]  }
  0xe6   :  { %v3410_v23 = vld [vmem:[%s4580_s1 + $0x7e4] ss:$16 sps:$4 sm:$0xff]   ;;  %v3413_v24 = vld [vmem:[%s4580_s1 + $0x7ec] ss:$16 sps:$4 sm:$0xff]   ;;  %v3408_v26 = vld [vmem:[%s4580_s1 + $0x7e0] ss:$16 sps:$4 sm:$0xff]  }
  0xe7   :  { %1990 = vmatpush1.bf16.msra.mxu0 %v3372_v0  ;;  %2195 = vmatpush1.bf16.msra.mxu1 %v3375_v1  ;;  %v3411_v27 = vld [vmem:[%s4580_s1 + $0x7e8] ss:$16 sps:$4 sm:$0xff]   ;;  %v3416_v28 = vld [vmem:[%s4580_s1 + $0x804] ss:$16 sps:$4 sm:$0xff]   ;;  %v3419_v14 = vld [vmem:[%s4580_s1 + $0x80c] ss:$16 sps:$4 sm:$0xff]  }
  0xe8   :  { %1991 = vmatprep.subr.bf16.mxu0 %v3380_v2  ;;  %2196 = vmatprep.subr.bf16.mxu1 %v3383_v3  ;;  %v3414_v30 = vld [vmem:[%s4580_s1 + $0x800] ss:$16 sps:$4 sm:$0xff]   ;;  %v3417_v31 = vld [vmem:[%s4580_s1 + $0x808] ss:$16 sps:$4 sm:$0xff]   ;;  %v3422_v32 = vld [vmem:[%s4580_s1 + $0x824] ss:$16 sps:$4 sm:$0xff]  }
  0xe9   :  { %v3425_v13 = vld [vmem:[%s4580_s1 + $0x82c] ss:$16 sps:$4 sm:$0xff]   ;;  %v3420_v25 = vld [vmem:[%s4580_s1 + $0x820] ss:$16 sps:$4 sm:$0xff]   ;;  %v3423_v33 = vld [vmem:[%s4580_s1 + $0x828] ss:$16 sps:$4 sm:$0xff]  }
  0xea   :  { %v3428_v34 = vld [vmem:[%s4580_s1 + $0x844] ss:$16 sps:$4 sm:$0xff]   ;;  %v3431_v35 = vld [vmem:[%s4580_s1 + $0x84c] ss:$16 sps:$4 sm:$0xff]   ;;  %v3519_v36 = vmov 0   ;;  %s3520_s8 = smov [#allocation2]  }
  0xeb   :  { %1992 = vmatpush1.bf16.msra.mxu0 %v3378_v4  ;;  %2197 = vmatpush1.bf16.msra.mxu1 %v3381_v5  ;;  %v3426_v37 = vld [vmem:[%s4580_s1 + $0x840] ss:$16 sps:$4 sm:$0xff]   ;;  %v3429_v38 = vld [vmem:[%s4580_s1 + $0x848] ss:$16 sps:$4 sm:$0xff]   ;;  %v3434_v39 = vld [vmem:[%s4580_s1 + $0x864] ss:$16 sps:$4 sm:$0xff]  }
  0xec   :  { %1993 = vmatprep.subr.bf16.mxu0 %v3386_v6  ;;  %2198 = vmatprep.subr.bf16.mxu1 %v3389_v7  ;;  %v3437_v40 = vld [vmem:[%s4580_s1 + $0x86c] ss:$16 sps:$4 sm:$0xff]   ;;  %v3432_v41 = vld [vmem:[%s4580_s1 + $0x860] ss:$16 sps:$4 sm:$0xff]   ;;  %v3435_v43 = vld [vmem:[%s4580_s1 + $0x868] ss:$16 sps:$4 sm:$0xff]  }
  0xed   :  { %v3440_v44 = vld [vmem:[%s4580_s1 + $0x884] ss:$16 sps:$4 sm:$0xff]   ;;  %v3443_v45 = vld [vmem:[%s4580_s1 + $0x88c] ss:$16 sps:$4 sm:$0xff]   ;;  %v3438_v46 = vld [vmem:[%s4580_s1 + $0x880] ss:$16 sps:$4 sm:$0xff]  }
  0xee   :  { %v3441_v47 = vld [vmem:[%s4580_s1 + $0x888] ss:$16 sps:$4 sm:$0xff]   ;;  %v3446_v48 = vld [vmem:[%s4580_s1 + $0x8a4] ss:$16 sps:$4 sm:$0xff]   ;;  %v3449_v50 = vld [vmem:[%s4580_s1 + $0x8ac] ss:$16 sps:$4 sm:$0xff]  }
  0xef   :  { %1994 = vmatpush1.bf16.msra.mxu0 %v3384_v8  ;;  %2199 = vmatpush1.bf16.msra.mxu1 %v3387_v9  ;;  %v3444_v51 = vld [vmem:[%s4580_s1 + $0x8a0] ss:$16 sps:$4 sm:$0xff]   ;;  %v3447_v53 = vld [vmem:[%s4580_s1 + $0x8a8] ss:$16 sps:$4 sm:$0xff]   ;;  %v3452_v54 = vld [vmem:[%s4580_s1 + $0x8c4] ss:$16 sps:$4 sm:$0xff]  }
  0xf0   :  { %1995 = vmatprep.subr.bf16.mxu0 %v3392_v10  ;;  %2200 = vmatprep.subr.bf16.mxu1 %v3395_v11  ;;  %v3455_v55 = vld [vmem:[%s4580_s1 + $0x8cc] ss:$16 sps:$4 sm:$0xff]   ;;  %v3450_v56 = vld [vmem:[%s4580_s1 + $0x8c0] ss:$16 sps:$4 sm:$0xff]   ;;  %v3453_v57 = vld [vmem:[%s4580_s1 + $0x8c8] ss:$16 sps:$4 sm:$0xff]  }
  0xf1   :  { %v3458_v58 = vld [vmem:[%s4580_s1 + $0x8e4] ss:$16 sps:$4 sm:$0xff]   ;;  %v3461_v59 = vld [vmem:[%s4580_s1 + $0x8ec] ss:$16 sps:$4 sm:$0xff]   ;;  %v3456_v60 = vld [vmem:[%s4580_s1 + $0x8e0] ss:$16 sps:$4 sm:$0xff]  }
  0xf2   :  { %v3459_v61 = vld [vmem:[%s4580_s1 + $0x8e8] ss:$16 sps:$4 sm:$0xff]   ;;  %v3462_v63 = vld [vmem:[%s4582_s3 + $0x40] sm:$0xff]   ;;  %v3470_v7 = vld [vmem:[%s4582_s3 + $0x50] sm:$0xff]   ;;  %s2616_s9 = sshll.u32 %s3520_s8, 4  ;;  %s2617_s9 = int_to_ptr.vmem [resolvable:$true] %s2616_s9 }
  0xf3   :  { %1996 = vmatpush1.bf16.msra.mxu0 %v3390_v12  ;;  %2201 = vmatpush1.bf16.msra.mxu1 %v3393_v52  ;;  %v2624_v62 = vld.sshfl [vmem:[%s4579_s0 + $0x8] sm:$0x1 pattern:$0x75316420]  ;;  %v3463_v0 = vld [vmem:[%s4582_s3 + $0xc0] sm:$0xff]   ;;  %v3471_v8 = vld [vmem:[%s4582_s3 + $0xd0] sm:$0xff]   ;;  %p3499_p1 = scmp.lt.s32.totalorder %s2617_s9, %s2617_s9 }
  0xf4   :  { %1997 = vmatprep.subr.bf16.mxu0 %v3398_v15  ;;  %2202 = vmatprep.subr.bf16.mxu1 %v3401_v16  ;;  %v398_v1 = vrot.slane %v2624_v62, %v3686_v49  ;;  %v3464_v2 = vld [vmem:[%s4582_s3] sm:$0xff]   ;;  %v3466_v4 = vld [vmem:[%s4582_s3 + $0x48] sm:$0xff]   ;;  %v3472_v9 = vld [vmem:[%s4582_s3 + $0x10] sm:$0xff]   ;;  %s3494_s10 = scalar_lea.vmem %s2617_s9, 32 }
  0xf5   :  { %v3465_v3 = vld [vmem:[%s4582_s3 + $0x80] sm:$0xff]   ;;  %v3467_v49 = vld [vmem:[%s4582_s3 + $0xc8] sm:$0xff]   ;;  %v3473_v10 = vld [vmem:[%s4582_s3 + $0x90] sm:$0xff]   ;;  %p3495_p0 = scmp.ne.s32.totalorder %s2617_s9, %s3494_s10  ;;  %p3500_p2 = scmp.lt.s32.totalorder %s3494_s10, %s3494_s10 }
  0xf6   :  { %v3468_v5 = vld [vmem:[%s4582_s3 + $0x8] sm:$0xff]   ;;  %v3474_v11 = vld [vmem:[%s4582_s3 + $0x58] sm:$0xff]   ;;  %v3478_v16 = vld [vmem:[%s4582_s3 + $0x60] sm:$0xff]  }
  0xf7   :  { %1998 = vmatpush1.bf16.msra.mxu0 %v3396_v17  ;;  %2203 = vmatpush1.bf16.msra.mxu1 %v3399_v18  ;;  %v3469_v6 = vld [vmem:[%s4582_s3 + $0x88] sm:$0xff]   ;;  %v3475_v12 = vld [vmem:[%s4582_s3 + $0xd8] sm:$0xff]   ;;  %v3479_v17 = vld [vmem:[%s4582_s3 + $0xe0] sm:$0xff]   ;;  %p3501_p3 = por %p3500_p2, %p3499_p1 }
  0xf8   :  { %1999 = vmatprep.subr.bf16.mxu0 %v3404_v19  ;;  %2204 = vmatprep.subr.bf16.mxu1 %v3407_v20  ;;  %v3476_v52 = vld [vmem:[%s4582_s3 + $0x18] sm:$0xff]   ;;  %v3480_v18 = vld [vmem:[%s4582_s3 + $0x20] sm:$0xff]   ;;  %v3482_v20 = vld [vmem:[%s4582_s3 + $0x68] sm:$0xff]  }
  0xf9   :  { %v3477_v15 = vld [vmem:[%s4582_s3 + $0x98] sm:$0xff]   ;;  %v3481_v19 = vld [vmem:[%s4582_s3 + $0xa0] sm:$0xff]   ;;  %p3502_p4 = pnand %p3501_p3, %p3495_p0 }
  0xfb   :  { %2000 = vmatpush1.bf16.msra.mxu0 %v3402_v21  ;;  %2205 = vmatpush1.bf16.msra.mxu1 %v3405_v22  ;;  %v3483_v21 = vld [vmem:[%s4582_s3 + $0xe8] sm:$0xff]  }
  0xfc   :  { %2001 = vmatprep.subr.bf16.mxu0 %v3410_v23  ;;  %2206 = vmatprep.subr.bf16.mxu1 %v3413_v24  ;;  %v3484_v22 = vld [vmem:[%s4582_s3 + $0x28] sm:$0xff]   ;;  %v3486_v24 = vld [vmem:[%s4582_s3 + $0x70] sm:$0xff]  }
  0xfd   :  { %v3485_v23 = vld [vmem:[%s4582_s3 + $0xa8] sm:$0xff]  }
  0xff   :  { %2002 = vmatpush1.bf16.msra.mxu0 %v3408_v26  ;;  %2207 = vmatpush1.bf16.msra.mxu1 %v3411_v27  ;;  %v3487_v26 = vld [vmem:[%s4582_s3 + $0xf0] sm:$0xff]  }
 0x100   :  { %2012 = vmatprep.subr.bf16.mxu0 %v3416_v28  ;;  %2217 = vmatprep.subr.bf16.mxu1 %v3419_v14  ;;  %v3488_v27 = vld [vmem:[%s4582_s3 + $0x30] sm:$0xff]   ;;  %v3490_v14 = vld [vmem:[%s4582_s3 + $0x78] sm:$0xff]  }
 0x101   :  { %v3489_v28 = vld [vmem:[%s4582_s3 + $0xb0] sm:$0xff]  }
 0x102   :  { %2004 = vmatmul.mubr.bf16.vlgmr.msra.gmra.mrb[0].mxu0 %v382_v29  ;;  %2209 = vmatmul.mubr.bf16.vlgmr.msra.gmra.mrb[0].mxu1 %v382_v29  ;;  %v3491_v29 = vld [vmem:[%s4582_s3 + $0xf8] sm:$0xff]  }
 0x103   :  { %2013 = vmatpush1.bf16.msra.mxu0 %v3414_v30  ;;  %2218 = vmatpush1.bf16.msra.mxu1 %v3417_v31  ;;  %v3492_v30 = vld [vmem:[%s4582_s3 + $0x38] sm:$0xff]  }
 0x104   :  { %2014 = vmatprep.subr.bf16.mxu0 %v3422_v32  ;;  %2219 = vmatprep.subr.bf16.mxu1 %v3425_v13  ;;  %v3493_v31 = vld [vmem:[%s4582_s3 + $0xb8] sm:$0xff]   ;;  %v316_v32 = vsub.s32 0, %v3668_v42  ;;  %v324_v13 = vsub.s32 2, %v3668_v42 }
 0x105   :  { %2044 = vmatprep.mubr.bf16.mxu0 %v3519_v36  ;;  %2249 = vmatprep.mubr.bf16.mxu1 %v3519_v36 }
 0x107   :  { %2015 = vmatpush1.bf16.msra.mxu0 %v3420_v25  ;;  %2220 = vmatpush1.bf16.msra.mxu1 %v3423_v33  ;;  %v312_v25 = vld [vmem:[%s4581_s2] sm:$0xf]  ;;  %v320_v33 = vsub.s32 1, %v3668_v42 }
 0x108   :  { %2016 = vmatprep.subr.bf16.mxu0 %v3428_v34  ;;  %2221 = vmatprep.subr.bf16.mxu1 %v3431_v35  ;;  %v328_v34 = vsub.s32 3, %v3668_v42  ;;  %v317_v35 = vrot.slane %v312_v25, %v316_v32  ;;  %v325_v36 = vrot.slane %v312_v25, %v324_v13 }
 0x10b   :  { %2017 = vmatpush1.bf16.msra.mxu0 %v3426_v37  ;;  %2222 = vmatpush1.bf16.msra.mxu1 %v3429_v38  ;;  %v321_v37 = vrot.slane %v312_v25, %v320_v33  ;;  %v329_v38 = vrot.slane %v312_v25, %v328_v34 }
 0x10c   :  { %2018 = vmatprep.subr.bf16.mxu0 %v3434_v39  ;;  %2223 = vmatprep.subr.bf16.mxu1 %v3437_v40 }
 0x10f   :  { %2019 = vmatpush1.bf16.msra.mxu0 %v3432_v41  ;;  %2224 = vmatpush1.bf16.msra.mxu1 %v3435_v43 }
 0x110   :  { %2020 = vmatprep.subr.bf16.mxu0 %v3440_v44  ;;  %2225 = vmatprep.subr.bf16.mxu1 %v3443_v45 }
 0x113   :  { %2021 = vmatpush1.bf16.msra.mxu0 %v3438_v46  ;;  %2226 = vmatpush1.bf16.msra.mxu1 %v3441_v47 }
 0x114   :  { %2022 = vmatprep.subr.bf16.mxu0 %v3446_v48  ;;  %2227 = vmatprep.subr.bf16.mxu1 %v3449_v50 }
 0x117   :  { %2023 = vmatpush1.bf16.msra.mxu0 %v3444_v51  ;;  %2228 = vmatpush1.bf16.msra.mxu1 %v3447_v53 }
 0x118   :  { %2024 = vmatprep.subr.bf16.mxu0 %v3452_v54  ;;  %2229 = vmatprep.subr.bf16.mxu1 %v3455_v55 }
 0x11b   :  { %2025 = vmatpush1.bf16.msra.mxu0 %v3450_v56  ;;  %2230 = vmatpush1.bf16.msra.mxu1 %v3453_v57 }
 0x11c   :  { %2026 = vmatprep.subr.bf16.mxu0 %v3458_v58  ;;  %2231 = vmatprep.subr.bf16.mxu1 %v3461_v59 }
 0x11f   :  { %2027 = vmatpush1.bf16.msra.mxu0 %v3456_v60  ;;  %2232 = vmatpush1.bf16.msra.mxu1 %v3459_v61 }
 0x120   :  { %2946 = vmatprep.subr.bf16.mxu0 %v3462_v63  ;;  %2968 = vmatprep.subr.bf16.mxu1 %v3463_v0  ;;  %v2913_v63 = vld [vmem:[%s4583_s4] ss:$0 sm:$0xff] }
 0x122   :  { %2045 = vmatmul.mubr.bf16.vlgmr.msra.gmra.mrb[0].mxu0 %v398_v1  ;;  %2250 = vmatmul.mubr.bf16.vlgmr.msra.gmra.mrb[0].mxu1 %v398_v1 }
 0x123   :  { %2947 = vmatpush3.bf16.msra.mxu0 %v3464_v2  ;;  %2969 = vmatpush3.bf16.msra.mxu1 %v3465_v3 }
 0x124   :  { %2948 = vmatprep.subr.bf16.mxu0 %v3466_v4  ;;  %2970 = vmatprep.subr.bf16.mxu1 %v3467_v49 }
 0x127   :  { %2949 = vmatpush3.bf16.msra.mxu0 %v3468_v5  ;;  %2971 = vmatpush3.bf16.msra.mxu1 %v3469_v6 }
 0x128   :  { %2950 = vmatprep.subr.bf16.mxu0 %v3470_v7  ;;  %2972 = vmatprep.subr.bf16.mxu1 %v3471_v8 }
 0x12b   :  { %2951 = vmatpush3.bf16.msra.mxu0 %v3472_v9  ;;  %2973 = vmatpush3.bf16.msra.mxu1 %v3473_v10 }
 0x12c   :  { %2952 = vmatprep.subr.bf16.mxu0 %v3474_v11  ;;  %2974 = vmatprep.subr.bf16.mxu1 %v3475_v12 }
 0x12f   :  { %2953 = vmatpush3.bf16.msra.mxu0 %v3476_v52  ;;  %2975 = vmatpush3.bf16.msra.mxu1 %v3477_v15 }
 0x130   :  { %2954 = vmatprep.subr.bf16.mxu0 %v3478_v16  ;;  %2976 = vmatprep.subr.bf16.mxu1 %v3479_v17 }
 0x133   :  { %2955 = vmatpush3.bf16.msra.mxu0 %v3480_v18  ;;  %2977 = vmatpush3.bf16.msra.mxu1 %v3481_v19 }
 0x134   :  { %2956 = vmatprep.subr.bf16.mxu0 %v3482_v20  ;;  %2978 = vmatprep.subr.bf16.mxu1 %v3483_v21 }
 0x137   :  { %2957 = vmatpush3.bf16.msra.mxu0 %v3484_v22  ;;  %2979 = vmatpush3.bf16.msra.mxu1 %v3485_v23 }
 0x138   :  { %2958 = vmatprep.subr.bf16.mxu0 %v3486_v24  ;;  %2980 = vmatprep.subr.bf16.mxu1 %v3487_v26 }
 0x13b   :  { %2959 = vmatpush3.bf16.msra.mxu0 %v3488_v27  ;;  %2981 = vmatpush3.bf16.msra.mxu1 %v3489_v28 }
 0x13c   :  { %2960 = vmatprep.subr.bf16.mxu0 %v3490_v14  ;;  %2982 = vmatprep.subr.bf16.mxu1 %v3491_v29 }
 0x13f   :  { %2961 = vmatpush3.bf16.msra.mxu0 %v3492_v30  ;;  %2983 = vmatpush3.bf16.msra.mxu1 %v3493_v31 }
 0x1f5   :  { %v2046_v39 = vpop.f32.mrb[0].mxu0  ;;  %v2251_v40 = vpop.f32.mrb[0].mxu1 }
 0x1f6   :  { %v2990_v41 = vadd.f32 %v2046_v39, %v317_v35  ;;  %v2992_v43 = vadd.f32 %v2251_v40, %v325_v36  ;;  %v2048_v44 = vpop.f32.mrb[1].mxu0  ;;  %v2253_v45 = vpop.f32.mrb[1].mxu1 }
 0x1f7   :  { %v2991_v46 = vadd.f32 %v2048_v44, %v321_v37  ;;  %v2993_v47 = vadd.f32 %v2253_v45, %v329_v38  ;;  %v2050_v48 = vpop.f32.mrb[2].mxu0  ;;  %v2255_v50 = vpop.f32.mrb[2].mxu1 }
 0x1f8   :  { %v2258_v51 = vmax.f32 %v2990_v41, 0.0  ;;  %v2260_v53 = vmax.f32 %v2992_v43, 0.0  ;;  %v2051_v54 = vpop.f32.mrb[3].mxu0  ;;  %v2256_v55 = vpop.f32.mrb[3].mxu1 }
 0x1f9   :  { %v2259_v56 = vmax.f32 %v2991_v46, 0.0  ;;  %v2261_v42 = vmax.f32 %v2993_v47, 0.0 }
 0x1fa   :  { %v2262_v59 = vpack.c.bf16 %v2258_v51, %v2258_v51  ;;  %v2264_v60 = vpack.c.bf16 %v2260_v53, %v2260_v53 }
 0x1fb   :  { %v2263_v57 = vpack.c.bf16 %v2259_v56, %v2259_v56  ;;  %v2265_v58 = vpack.c.bf16 %v2261_v42, %v2261_v42 }
 0x1fd   :  { %2561 = vmatprep.mubr.bf16.mxu0 %v2263_v57  ;;  %2601 = vmatprep.mubr.bf16.mxu1 %v2265_v58 }
 0x1fe   :  { %2562 = vmatmul.mubr.bf16.vlgmr.msra.gmra.mrb[4].mxu0 %v2262_v59  ;;  %2602 = vmatmul.mubr.bf16.vlgmr.msra.gmra.mrb[4].mxu1 %v2264_v60 }
 0x2d1   :  { %v2962_v61 = vpop.f32.mrb[4].mxu0  ;;  %v2984_v62 = vpop.f32.mrb[4].mxu1 }
 0x2d2   :  { %v2963_v0 = vpop.f32.mrb[5].mxu0  ;;  %v2985_v1 = vpop.f32.mrb[5].mxu1 }
 0x2d3   :  { %v2964_v2 = vadd.f32 %v2963_v0, %v2962_v61  ;;  %v2986_v3 = vadd.f32 %v2985_v1, %v2984_v62  ;;  %v2965_v4 = vpop.f32.mrb[6].mxu0  ;;  %v2987_v49 = vpop.f32.mrb[6].mxu1 }
 0x2d4   :  { %v2966_v5 = vpop.f32.mrb[7].mxu0  ;;  %v2988_v6 = vpop.f32.mrb[7].mxu1 }
 0x2d5   :  { %v2564_v7 = vadd.f32 %v2964_v2, %v2913_v63 }
 0x2d7   :  { %v2604_v8 = vadd.f32 %v2986_v3, %v2564_v7 }
 0x2d9   :  { %2609 = vst [vmem:[#allocation2] sm:$0x3] %v2604_v8 }
 0x2da   :  { %3505 = shalt.err (!%p3502_p4)
}
 0x2db   :  { %s3506_s12 = scalar_lea.hbm %s4584_s5, 32 }
 0x2dc   :  { %p3507_p5 = scmp.ne.s32.totalorder %s4584_s5, %s3506_s12  ;;  %p3510_p6 = scmp.lt.u32.totalorder %s3506_s12, %s4584_s5 }
 0x2de   :  { %p3512_p7 = pnand %p3510_p6, %p3507_p5 }
 0x2e0   :  { %3515 = shalt.err (!%p3512_p7)
}
 0x2e1   :  { %2619 = dma.vmem_to_hbm [thread:$0]  %s2617_s9, 32, %s4584_s5, [#allocation3]  }
 0x2e2   :  { %3516 = dma.done.wait [#allocation3], 32  }
 0x2e3   :  { %3517 = vsyncadd [#allocation3], 4294967264 }
 0x2e4   :  { %2623 = vsyncpa [#allocation3], 1 }

</bundles_post_ra>
